<compile_context>
chip_gen: v6e
topology: v6e:2x2x1
jax: 0.10.0
libtpu: 0.0.40
codegen_flags: <defaults>
</compile_context>

<pallas_src>
import functools

import jax
import jax.numpy as jnp
from jax.experimental import pallas as pl
from jax.experimental.pallas import tpu as pltpu

EPS = 1e-5
_VMEM = pl.BlockSpec(memory_space=pltpu.MemorySpace.VMEM)


def _pad_to(x, rows, cols):
    return jnp.pad(x, ((0, rows - x.shape[0]), (0, cols - x.shape[1])))


def _pad_last(x, target):
    pad = [(0, 0)] * (x.ndim - 1) + [(0, target - x.shape[-1])]
    return jnp.pad(x, pad)


def _gb_row(v, width):
    """(C,) BN gamma/beta -> zero-padded (1, width) f32 row (padded lanes stay 0)."""
    return jnp.pad(v, (0, width - v.shape[0])).reshape(1, width).astype(jnp.float32)


def _vmem_limit(need_bytes):
    """Explicit scoped-VMEM limit: 2x (double buffering) + headroom, clamped to a
    v7x-safe 48 MiB (v7x physical VMEM is 64 MiB per TensorCore)."""
    return int(min(max(32 << 20, 2 * need_bytes + (4 << 20)), 48 << 20))


# ---------------------------------------------------------------------------
# Pallas kernels
# ---------------------------------------------------------------------------
def conv_bn_relu_pool_kernel(p_ref, w_ref, g_ref, b_ref, o_ref, sum_ref, sq_ref,
                             *, inv_count):
    """Fused conv-as-GEMM + train-mode BatchNorm + MaxPool2d(2,2) + ReLU, two-pass grid.

    grid = (pass, sample).  Pass 0: accumulate per-feature sum / sum-of-squares of the
    pre-pool conv outputs into persistent VMEM scratch (BN batch statistics).  Pass 1:
    re-run the cheap GEMM, apply the folded BN scale/shift, max over the 4 pool
    quadrants, then ReLU once on the pooled rows.

    p_ref: (4, S, K) bf16 im2col patches of one sample; axis0 = (dy,dx) pool quadrant,
           axis1 = pooled output position (ph,pw), axis2 = (kh,kw,cin).
    w_ref: (K, C) bf16 weights (real out_ch in leading columns, rest zero).
    g_ref/b_ref: (1, C) f32 BN gamma/beta (zero in padded columns).
    o_ref: (S, C) bf16 pooled activations for this sample.
    sum_ref/sq_ref: (1, C) f32 scratch, persists across the whole grid.
    """
    pass_id = pl.program_id(0)

    @pl.when(jnp.logical_and(pass_id == 0, pl.program_id(1) == 0))
    def _():
        sum_ref[...] = jnp.zeros(sum_ref.shape, sum_ref.dtype)
        sq_ref[...] = jnp.zeros(sq_ref.shape, sq_ref.dtype)

    w = w_ref[...]

    @pl.when(pass_id == 0)
    def _():
        s = jnp.zeros(sum_ref.shape, jnp.float32)
        sq = jnp.zeros(sq_ref.shape, jnp.float32)
        for q in range(4):                       # static unroll: 4 pool quadrants
            z = jnp.dot(p_ref[q], w, preferred_element_type=jnp.float32)
            s = s + jnp.sum(z, axis=0, keepdims=True)
            sq = sq + jnp.sum(z * z, axis=0, keepdims=True)
        sum_ref[...] += s
        sq_ref[...] += sq
        o_ref[...] = jnp.zeros(o_ref.shape, o_ref.dtype)   # overwritten in pass 1

    @pl.when(pass_id == 1)
    def _():
        # Folded BN (z*scale + shift).  One-pass stats: var = E[z^2] - mean^2 is a bit
        # less numerically robust than the centered form but fine at these magnitudes.
        mean = sum_ref[...] * inv_count
        var = sq_ref[...] * inv_count - mean * mean
        scale = jax.lax.rsqrt(var + EPS) * g_ref[...]
        shift = b_ref[...] - mean * scale
        pooled = None
        for q in range(4):
            z = jnp.dot(p_ref[q], w, preferred_element_type=jnp.float32) * scale + shift
            pooled = z if pooled is None else jnp.maximum(pooled, z)
        o_ref[...] = jnp.maximum(pooled, 0.0).astype(o_ref.dtype)   # ReLU after pool


def head_kernel(x_ref, w3_ref, wf1_ref, wf2_ref, g_ref, b_ref, o_ref):
    """conv3 (5x5 over the full 5x5 map == FC 400->120) + BN + ReLU,
    fc1 + BN + tanh, fc2 + BN + softmax — all fused, single block.

    x_ref: (N, 400) bf16 flattened pool2 output.  w*: bf16, feature dims padded to 128.
    g_ref/b_ref: (3, 128) f32; rows = [conv3, fc1, fc2] (zero in padded columns).
    o_ref: (N, 128) f32; softmax probabilities in columns [0, 10), ~0 elsewhere.
    """
    inv_n = 1.0 / x_ref.shape[0]

    def bn(z, k):
        mean = jnp.sum(z, axis=0, keepdims=True) * inv_n
        var = jnp.sum(z * z, axis=0, keepdims=True) * inv_n - mean * mean
        scale = jax.lax.rsqrt(var + EPS) * g_ref[k:k + 1, :]
        shift = b_ref[k:k + 1, :] - mean * scale
        return z * scale + shift

    z = jnp.dot(x_ref[...], w3_ref[...], preferred_element_type=jnp.float32)
    z = jnp.maximum(bn(z, 0), 0.0)                                            # conv3
    z = jnp.dot(z.astype(jnp.bfloat16), wf1_ref[...], preferred_element_type=jnp.float32)
    z = jnp.tanh(bn(z, 1))                                                    # fc1
    z = jnp.dot(z.astype(jnp.bfloat16), wf2_ref[...], preferred_element_type=jnp.float32)
    z = bn(z, 2)                                                              # fc2
    col = jax.lax.broadcasted_iota(jnp.int32, z.shape, 1)
    z = jnp.where(col < 10, z, -1e30)            # softmax over the 10 real classes only
    z = z - jnp.max(z, axis=-1, keepdims=True)
    e = jnp.exp(z)
    o_ref[...] = e * pl.reciprocal(jnp.sum(e, axis=-1, keepdims=True), approx=False)


# ---------------------------------------------------------------------------
# Thin wrapper glue (plain JAX, tiny bf16 arrays)
# ---------------------------------------------------------------------------
def _pool_ordered_patches(x_nhwc, k):
    """k x k stride-1 im2col patches, grouped so MaxPool2d(2,2) fuses in-kernel.

    Returns (n, 4, (oh//2)*(ow//2), k*k*c): axis1 = (dy,dx) pool quadrant, axis2 is the
    pooled output position (ph,pw); K ordering is (kh, kw, c)."""
    n, ih, iw, c = x_nhwc.shape
    oh, ow = ih - k + 1, iw - k + 1
    cols = [x_nhwc[:, i:i + oh, j:j + ow, :] for i in range(k) for j in range(k)]
    p = jnp.stack(cols, axis=3)                               # (n, oh, ow, k*k, c)
    p = p.reshape(n, oh // 2, 2, ow // 2, 2, k * k * c)
    p = p.transpose(0, 2, 4, 1, 3, 5)                         # (n, dy, dx, ph, pw, K)
    return p.reshape(n, 4, (oh // 2) * (ow // 2), k * k * c)


def _conv_weight_2d(w_pt, k_pad, n_pad):
    """PyTorch (O, I, KH, KW) conv weight -> (k_pad, n_pad) bf16 GEMM weight with rows
    ordered (kh, kw, in_ch) to match the im2col layout; zero padded."""
    o, i, kh, kw = w_pt.shape
    w2 = w_pt.transpose(2, 3, 1, 0).reshape(kh * kw * i, o)
    return _pad_to(w2, k_pad, n_pad).astype(jnp.bfloat16)


def _conv_stage(patches, w2d, gamma, beta):
    n, _, s, kp = patches.shape
    c = w2d.shape[1]
    inv_count = 1.0 / float(n * 4 * s)           # BN stats over all pre-pool positions
    kernel = functools.partial(conv_bn_relu_pool_kernel, inv_count=inv_count)
    # Per-step live bytes: patch block + weight + gamma/beta + out block + f32 temps.
    need = 4 * s * kp * 2 + kp * c * 2 + 8 * c + s * c * 2 + 8 * s * c * 4
    return pl.pallas_call(
        kernel,
        out_shape=jax.ShapeDtypeStruct((n, s, c), jnp.bfloat16),
        grid=(2, n),                              # (pass, sample); pass must run outer
        in_specs=[
            pl.BlockSpec((pl.Squeezed(), 4, s, kp), lambda p, i: (i, 0, 0, 0)),
            pl.BlockSpec((kp, c), lambda p, i: (0, 0)),
            pl.BlockSpec((1, c), lambda p, i: (0, 0)),
            pl.BlockSpec((1, c), lambda p, i: (0, 0)),
        ],
        out_specs=pl.BlockSpec((pl.Squeezed(), s, c), lambda p, i: (i, 0, 0)),
        scratch_shapes=[pltpu.VMEM((1, c), jnp.float32),
                        pltpu.VMEM((1, c), jnp.float32)],
        compiler_params=pltpu.CompilerParams(
            # Sample axis carries the BN scratch accumulation -> must stay 'arbitrary'.
            dimension_semantics=("arbitrary", "arbitrary"),
            vmem_limit_bytes=_vmem_limit(need)),
    )(patches, w2d, gamma, beta)


# ---------------------------------------------------------------------------
# LeNet5
# ---------------------------------------------------------------------------
def init_params(key):
    ks = jax.random.split(key, 5)

    def conv_p(k, out_ch, in_ch, ksz):
        k1, k2 = jax.random.split(k)
        return dict(
            w=0.1 * jax.random.normal(k1, (out_ch, in_ch, ksz, ksz), jnp.float32),
            # bias kept for parity with nn.Conv2d; a no-op under train-mode BatchNorm.
            b=0.1 * jax.random.normal(k2, (out_ch,), jnp.float32),
            gamma=jnp.ones((out_ch,), jnp.float32),
            beta=jnp.zeros((out_ch,), jnp.float32))

    def fc_p(k, in_dim, out_dim):
        k1, k2 = jax.random.split(k)
        return dict(
            w=0.1 * jax.random.normal(k1, (out_dim, in_dim), jnp.float32),
            b=0.1 * jax.random.normal(k2, (out_dim,), jnp.float32),
            gamma=jnp.ones((out_dim,), jnp.float32),
            beta=jnp.zeros((out_dim,), jnp.float32))

    return dict(conv1=conv_p(ks[0], 6, 1, 5),
                conv2=conv_p(ks[1], 16, 6, 5),
                conv3=conv_p(ks[2], 120, 16, 5),
                fc1=fc_p(ks[3], 120, 84),
                fc2=fc_p(ks[4], 84, 10))


def lenet5_forward(params, x_nchw):
    p = params
    n, c_in, ih, iw = x_nchw.shape
    # The NCHW->NHWC below is only a reshape because C == 1; geometry needs 28x28.
    assert c_in == 1 and ih == 28 and iw == 28, "LeNet5 expects (N, 1, 28, 28) inputs"

    # Parameter prep (tiny): bf16 matmul operands, bf16 contraction dims padded to
    # multiples of 16, output-feature dims padded only as far as needed (8/16/128) so
    # the conv stages write narrow real-channel slabs.  Biases intentionally unused
    # (train-mode BN cancels them) — see header comment.
    w1 = _conv_weight_2d(p["conv1"]["w"], 32, 8)      # K 25->32,   C 6->8
    w2 = _conv_weight_2d(p["conv2"]["w"], 160, 16)    # K 150->160, C 16
    w3 = _conv_weight_2d(p["conv3"]["w"], 400, 128)   # K 400,      C 120->128
    wf1 = _pad_to(p["fc1"]["w"].T, 128, 128).astype(jnp.bfloat16)
    wf2 = _pad_to(p["fc2"]["w"].T, 128, 128).astype(jnp.bfloat16)
    g1, b1 = _gb_row(p["conv1"]["gamma"], 8), _gb_row(p["conv1"]["beta"], 8)
    g2, b2 = _gb_row(p["conv2"]["gamma"], 16), _gb_row(p["conv2"]["beta"], 16)
    g_head = jnp.concatenate([_gb_row(p["conv3"]["gamma"], 128),
                              _gb_row(p["fc1"]["gamma"], 128),
                              _gb_row(p["fc2"]["gamma"], 128)], axis=0)
    b_head = jnp.concatenate([_gb_row(p["conv3"]["beta"], 128),
                              _gb_row(p["fc1"]["beta"], 128),
                              _gb_row(p["fc2"]["beta"], 128)], axis=0)

    # --- stage 1: conv1 (1->6, k5, pad=2) + BN + MaxPool(2,2) + ReLU ---
    x = x_nchw.reshape(n, 28, 28, 1).astype(jnp.bfloat16)     # bf16 BEFORE im2col
    x = jnp.pad(x, ((0, 0), (2, 2), (2, 2), (0, 0)))          # conv1 padding=2
    p1 = _pad_last(_pool_ordered_patches(x, 5), 32)           # (n, 4, 196, 32) bf16
    h1 = _conv_stage(p1, w1, g1, b1)                          # (n, 196, 8) bf16

    # --- stage 2: conv2 (6->16, k5) + BN + MaxPool(2,2) + ReLU ---
    a1 = h1[:, :, :6].reshape(n, 14, 14, 6)                   # real channels, NHWC bf16
    p2 = _pad_last(_pool_ordered_patches(a1, 5), 160)         # (n, 4, 25, 160) bf16
    h2 = _conv_stage(p2, w2, g2, b2)                          # (n, 25, 16) bf16

    # --- head: conv3 (== FC over flattened 5x5x16) + fc1 + fc2, one fused kernel ---
    x3 = h2.reshape(n, 400)                                   # (h, w, c) order, bf16
    head_need = (sum(int(a.size) * a.dtype.itemsize
                     for a in (x3, w3, wf1, wf2, g_head, b_head))
                 + n * 128 * 4 * 4)                           # f32 intermediates/out
    out = pl.pallas_call(
        head_kernel,
        out_shape=jax.ShapeDtypeStruct((n, 128), jnp.float32),
        in_specs=[_VMEM] * 6,
        out_specs=_VMEM,
        compiler_params=pltpu.CompilerParams(vmem_limit_bytes=_vmem_limit(head_need)),
    )(x3, w3, wf1, wf2, g_head, b_head)
    return out[:, :10]                                        # softmax probs, 10 classes


if __name__ == "__main__":
    key = jax.random.PRNGKey(0)
    k_param, k_x = jax.random.split(key)
    params = init_params(k_param)
    # LeNet5 geometry requires 1x28x28 inputs (pad=2 conv -> 28 -> 14 -> 10 -> 5 -> 1).
    x = jax.random.normal(k_x, (2, 1, 28, 28), jnp.float32)

    out = jax.jit(lenet5_forward)(params, x)
    out = jax.block_until_ready(out)

    assert out.shape == (2, 10), out.shape
    assert bool(jnp.all(jnp.isfinite(out)))
    # softmax rows should sum to ~1
    assert bool(jnp.allclose(jnp.sum(out, axis=-1), 1.0, atol=1e-5))
    print("KERNEL_OK")
</pallas_src>

<mosaic_0001>
module attributes {stable_mosaic.version = 11 : i64} {
  func.func @conv_bn_relu_pool_kernel(%arg0: i32, %arg1: i32, %arg2: memref<1x4x196x32xbf16, #tpu.memory_space<vmem>>, %arg3: memref<32x8xbf16, #tpu.memory_space<vmem>>, %arg4: memref<1x8xf32, #tpu.memory_space<vmem>>, %arg5: memref<1x8xf32, #tpu.memory_space<vmem>>, %arg6: memref<1x196x8xbf16, #tpu.memory_space<vmem>>, %arg7: memref<1x8xf32, #tpu.memory_space<vmem>>, %arg8: memref<1x8xf32, #tpu.memory_space<vmem>>) attributes {dimension_semantics = [#tpu.dimension_semantics<arbitrary>, #tpu.dimension_semantics<arbitrary>], iteration_bounds = array<i64: 2, 2>, scalar_prefetch = 0 : i64, scratch_operands = 2 : i64, tpu.core_type = #tpu.core_type<tc>, window_params = [{transform_indices = @transform_0, window_bounds = array<i64: 1, 4, 196, 32>}, {pipeline_mode = #tpu.pipeline_mode<synchronous>, transform_indices = @transform_1, window_bounds = array<i64: 32, 8>}, {pipeline_mode = #tpu.pipeline_mode<synchronous>, transform_indices = @transform_2, window_bounds = array<i64: 1, 8>}, {pipeline_mode = #tpu.pipeline_mode<synchronous>, transform_indices = @transform_3, window_bounds = array<i64: 1, 8>}, {transform_indices = @transform_4, window_bounds = array<i64: 1, 196, 8>}]} {
    %c0_i32 = arith.constant 0 : i32
    %0 = arith.cmpi eq, %arg0, %c0_i32 : i32
    %c0_i32_0 = arith.constant 0 : i32
    %1 = arith.cmpi eq, %arg1, %c0_i32_0 : i32
    %2 = arith.andi %0, %1 : i1
    %3 = arith.extui %2 : i1 to i32
    %c0_i32_1 = arith.constant 0 : i32
    %4 = arith.cmpi ne, %3, %c0_i32_1 : i32
    scf.if %4 {
      %cst = arith.constant 0.000000e+00 : f32
      %12 = vector.broadcast %cst : f32 to vector<1x8xf32>
      %c0_6 = arith.constant 0 : index
      %c0_7 = arith.constant 0 : index
      %13 = vector.load %arg7[%c0_6, %c0_7] : memref<1x8xf32, #tpu.memory_space<vmem>>, vector<1x8xf32>
      tpu.vector_store %arg7[%c0_6, %c0_7], %12 {strides = array<i32>} : memref<1x8xf32, #tpu.memory_space<vmem>>, vector<1x8xf32>,
      %cst_8 = arith.constant 0.000000e+00 : f32
      %14 = vector.broadcast %cst_8 : f32 to vector<1x8xf32>
      %c0_9 = arith.constant 0 : index
      %c0_10 = arith.constant 0 : index
      %15 = vector.load %arg8[%c0_9, %c0_10] : memref<1x8xf32, #tpu.memory_space<vmem>>, vector<1x8xf32>
      tpu.vector_store %arg8[%c0_9, %c0_10], %14 {strides = array<i32>} : memref<1x8xf32, #tpu.memory_space<vmem>>, vector<1x8xf32>,
    } else {
    }
    %c0 = arith.constant 0 : index
    %c0_2 = arith.constant 0 : index
    %5 = vector.load %arg3[%c0, %c0_2] : memref<32x8xbf16, #tpu.memory_space<vmem>>, vector<32x8xbf16>
    %c0_i32_3 = arith.constant 0 : i32
    %6 = arith.cmpi eq, %arg0, %c0_i32_3 : i32
    %7 = arith.extui %6 : i1 to i32
    %c0_i32_4 = arith.constant 0 : i32
    %8 = arith.cmpi ne, %7, %c0_i32_4 : i32
    scf.if %8 {
      %cst = arith.constant 0.000000e+00 : f32
      %12 = vector.broadcast %cst : f32 to vector<1x8xf32>
      %cst_6 = arith.constant 0.000000e+00 : f32
      %13 = vector.broadcast %cst_6 : f32 to vector<1x8xf32>
      %c0_7 = arith.constant 0 : index
      %c0_8 = arith.constant 0 : index
      %c0_9 = arith.constant 0 : index
      %c0_10 = arith.constant 0 : index
      %14 = vector.load %arg2[%c0_7, %c0_8, %c0_9, %c0_10] : memref<1x4x196x32xbf16, #tpu.memory_space<vmem>>, vector<1x1x196x32xbf16>
      %15 = vector.shape_cast %14 : vector<1x1x196x32xbf16> to vector<196x32xbf16>
      %cst_11 = arith.constant dense<0.000000e+00> : vector<196x8xf32>
      %16 = tpu.matmul %15, %5, %cst_11 {dimension_numbers = #tpu.dot_dimension_numbers<[1], [0], [0], [1], [0, 0, 1, 1], [], []>} : vector<196x32xbf16>, vector<32x8xbf16>, vector<196x8xf32> -> vector<196x8xf32>
      %cst_12 = arith.constant dense<0.000000e+00> : vector<8xf32>
      %17 = vector.multi_reduction <add>, %16, %cst_12 [0] : vector<196x8xf32> to vector<8xf32>
      %18 = vector.shape_cast %17 : vector<8xf32> to vector<1x8xf32>
      %19 = arith.addf %12, %18 : vector<1x8xf32>
      %20 = arith.mulf %16, %16 : vector<196x8xf32>
      %cst_13 = arith.constant dense<0.000000e+00> : vector<8xf32>
      %21 = vector.multi_reduction <add>, %20, %cst_13 [0] : vector<196x8xf32> to vector<8xf32>
      %22 = vector.shape_cast %21 : vector<8xf32> to vector<1x8xf32>
      %23 = arith.addf %13, %22 : vector<1x8xf32>
      %c0_14 = arith.constant 0 : index
      %c1 = arith.constant 1 : index
      %c0_15 = arith.constant 0 : index
      %c0_16 = arith.constant 0 : index
      %24 = vector.load %arg2[%c0_14, %c1, %c0_15, %c0_16] : memref<1x4x196x32xbf16, #tpu.memory_space<vmem>>, vector<1x1x196x32xbf16>
      %25 = vector.shape_cast %24 : vector<1x1x196x32xbf16> to vector<196x32xbf16>
      %cst_17 = arith.constant dense<0.000000e+00> : vector<196x8xf32>
      %26 = tpu.matmul %25, %5, %cst_17 {dimension_numbers = #tpu.dot_dimension_numbers<[1], [0], [0], [1], [0, 0, 1, 1], [], []>} : vector<196x32xbf16>, vector<32x8xbf16>, vector<196x8xf32> -> vector<196x8xf32>
      %cst_18 = arith.constant dense<0.000000e+00> : vector<8xf32>
      %27 = vector.multi_reduction <add>, %26, %cst_18 [0] : vector<196x8xf32> to vector<8xf32>
      %28 = vector.shape_cast %27 : vector<8xf32> to vector<1x8xf32>
      %29 = arith.addf %19, %28 : vector<1x8xf32>
      %30 = arith.mulf %26, %26 : vector<196x8xf32>
      %cst_19 = arith.constant dense<0.000000e+00> : vector<8xf32>
      %31 = vector.multi_reduction <add>, %30, %cst_19 [0] : vector<196x8xf32> to vector<8xf32>
      %32 = vector.shape_cast %31 : vector<8xf32> to vector<1x8xf32>
      %33 = arith.addf %23, %32 : vector<1x8xf32>
      %c0_20 = arith.constant 0 : index
      %c2 = arith.constant 2 : index
      %c0_21 = arith.constant 0 : index
      %c0_22 = arith.constant 0 : index
      %34 = vector.load %arg2[%c0_20, %c2, %c0_21, %c0_22] : memref<1x4x196x32xbf16, #tpu.memory_space<vmem>>, vector<1x1x196x32xbf16>
      %35 = vector.shape_cast %34 : vector<1x1x196x32xbf16> to vector<196x32xbf16>
      %cst_23 = arith.constant dense<0.000000e+00> : vector<196x8xf32>
      %36 = tpu.matmul %35, %5, %cst_23 {dimension_numbers = #tpu.dot_dimension_numbers<[1], [0], [0], [1], [0, 0, 1, 1], [], []>} : vector<196x32xbf16>, vector<32x8xbf16>, vector<196x8xf32> -> vector<196x8xf32>
      %cst_24 = arith.constant dense<0.000000e+00> : vector<8xf32>
      %37 = vector.multi_reduction <add>, %36, %cst_24 [0] : vector<196x8xf32> to vector<8xf32>
      %38 = vector.shape_cast %37 : vector<8xf32> to vector<1x8xf32>
      %39 = arith.addf %29, %38 : vector<1x8xf32>
      %40 = arith.mulf %36, %36 : vector<196x8xf32>
      %cst_25 = arith.constant dense<0.000000e+00> : vector<8xf32>
      %41 = vector.multi_reduction <add>, %40, %cst_25 [0] : vector<196x8xf32> to vector<8xf32>
      %42 = vector.shape_cast %41 : vector<8xf32> to vector<1x8xf32>
      %43 = arith.addf %33, %42 : vector<1x8xf32>
      %c0_26 = arith.constant 0 : index
      %c3 = arith.constant 3 : index
      %c0_27 = arith.constant 0 : index
      %c0_28 = arith.constant 0 : index
      %44 = vector.load %arg2[%c0_26, %c3, %c0_27, %c0_28] : memref<1x4x196x32xbf16, #tpu.memory_space<vmem>>, vector<1x1x196x32xbf16>
      %45 = vector.shape_cast %44 : vector<1x1x196x32xbf16> to vector<196x32xbf16>
      %cst_29 = arith.constant dense<0.000000e+00> : vector<196x8xf32>
      %46 = tpu.matmul %45, %5, %cst_29 {dimension_numbers = #tpu.dot_dimension_numbers<[1], [0], [0], [1], [0, 0, 1, 1], [], []>} : vector<196x32xbf16>, vector<32x8xbf16>, vector<196x8xf32> -> vector<196x8xf32>
      %cst_30 = arith.constant dense<0.000000e+00> : vector<8xf32>
      %47 = vector.multi_reduction <add>, %46, %cst_30 [0] : vector<196x8xf32> to vector<8xf32>
      %48 = vector.shape_cast %47 : vector<8xf32> to vector<1x8xf32>
      %49 = arith.addf %39, %48 : vector<1x8xf32>
      %50 = arith.mulf %46, %46 : vector<196x8xf32>
      %cst_31 = arith.constant dense<0.000000e+00> : vector<8xf32>
      %51 = vector.multi_reduction <add>, %50, %cst_31 [0] : vector<196x8xf32> to vector<8xf32>
      %52 = vector.shape_cast %51 : vector<8xf32> to vector<1x8xf32>
      %53 = arith.addf %43, %52 : vector<1x8xf32>
      %c0_32 = arith.constant 0 : index
      %c0_33 = arith.constant 0 : index
      %54 = vector.load %arg7[%c0_32, %c0_33] : memref<1x8xf32, #tpu.memory_space<vmem>>, vector<1x8xf32>
      %55 = arith.addf %54, %49 : vector<1x8xf32>
      %c0_34 = arith.constant 0 : index
      %c0_35 = arith.constant 0 : index
      %56 = vector.load %arg7[%c0_34, %c0_35] : memref<1x8xf32, #tpu.memory_space<vmem>>, vector<1x8xf32>
      tpu.vector_store %arg7[%c0_34, %c0_35], %55 {strides = array<i32>} : memref<1x8xf32, #tpu.memory_space<vmem>>, vector<1x8xf32>,
      %c0_36 = arith.constant 0 : index
      %c0_37 = arith.constant 0 : index
      %57 = vector.load %arg8[%c0_36, %c0_37] : memref<1x8xf32, #tpu.memory_space<vmem>>, vector<1x8xf32>
      %58 = arith.addf %57, %53 : vector<1x8xf32>
      %c0_38 = arith.constant 0 : index
      %c0_39 = arith.constant 0 : index
      %59 = vector.load %arg8[%c0_38, %c0_39] : memref<1x8xf32, #tpu.memory_space<vmem>>, vector<1x8xf32>
      tpu.vector_store %arg8[%c0_38, %c0_39], %58 {strides = array<i32>} : memref<1x8xf32, #tpu.memory_space<vmem>>, vector<1x8xf32>,
      %cst_40 = arith.constant 0.000000e+00 : bf16
      %60 = vector.broadcast %cst_40 : bf16 to vector<196x8xbf16>
      %c0_41 = arith.constant 0 : index
      %c0_42 = arith.constant 0 : index
      %c0_43 = arith.constant 0 : index
      %61 = vector.load %arg6[%c0_41, %c0_42, %c0_43] : memref<1x196x8xbf16, #tpu.memory_space<vmem>>, vector<1x196x8xbf16>
      %62 = vector.shape_cast %61 : vector<1x196x8xbf16> to vector<196x8xbf16>
      %63 = vector.shape_cast %60 : vector<196x8xbf16> to vector<1x196x8xbf16>
      tpu.vector_store %arg6[%c0_41, %c0_42, %c0_43], %63 {strides = array<i32>} : memref<1x196x8xbf16, #tpu.memory_space<vmem>>, vector<1x196x8xbf16>,
    } else {
    }
    %c1_i32 = arith.constant 1 : i32
    %9 = arith.cmpi eq, %arg0, %c1_i32 : i32
    %10 = arith.extui %9 : i1 to i32
    %c0_i32_5 = arith.constant 0 : i32
    %11 = arith.cmpi ne, %10, %c0_i32_5 : i32
    scf.if %11 {
      %c0_6 = arith.constant 0 : index
      %c0_7 = arith.constant 0 : index
      %12 = vector.load %arg7[%c0_6, %c0_7] : memref<1x8xf32, #tpu.memory_space<vmem>>, vector<1x8xf32>
      %cst = arith.constant 6.37755089E-4 : f32
      %13 = vector.broadcast %cst : f32 to vector<1x8xf32>
      %14 = arith.mulf %12, %13 : vector<1x8xf32>
      %c0_8 = arith.constant 0 : index
      %c0_9 = arith.constant 0 : index
      %15 = vector.load %arg8[%c0_8, %c0_9] : memref<1x8xf32, #tpu.memory_space<vmem>>, vector<1x8xf32>
      %cst_10 = arith.constant 6.37755089E-4 : f32
      %16 = vector.broadcast %cst_10 : f32 to vector<1x8xf32>
      %17 = arith.mulf %15, %16 : vector<1x8xf32>
      %18 = arith.mulf %14, %14 : vector<1x8xf32>
      %19 = arith.subf %17, %18 : vector<1x8xf32>
      %cst_11 = arith.constant 9.99999974E-6 : f32
      %20 = vector.broadcast %cst_11 : f32 to vector<1x8xf32>
      %21 = arith.addf %19, %20 : vector<1x8xf32>
      %22 = math.rsqrt %21 : vector<1x8xf32>
      %c0_12 = arith.constant 0 : index
      %c0_13 = arith.constant 0 : index
      %23 = vector.load %arg4[%c0_12, %c0_13] : memref<1x8xf32, #tpu.memory_space<vmem>>, vector<1x8xf32>
      %24 = arith.mulf %22, %23 : vector<1x8xf32>
      %c0_14 = arith.constant 0 : index
      %c0_15 = arith.constant 0 : index
      %25 = vector.load %arg5[%c0_14, %c0_15] : memref<1x8xf32, #tpu.memory_space<vmem>>, vector<1x8xf32>
      %26 = arith.mulf %14, %24 : vector<1x8xf32>
      %27 = arith.subf %25, %26 : vector<1x8xf32>
      %c0_16 = arith.constant 0 : index
      %c0_17 = arith.constant 0 : index
      %c0_18 = arith.constant 0 : index
      %c0_19 = arith.constant 0 : index
      %28 = vector.load %arg2[%c0_16, %c0_17, %c0_18, %c0_19] : memref<1x4x196x32xbf16, #tpu.memory_space<vmem>>, vector<1x1x196x32xbf16>
      %29 = vector.shape_cast %28 : vector<1x1x196x32xbf16> to vector<196x32xbf16>
      %cst_20 = arith.constant dense<0.000000e+00> : vector<196x8xf32>
      %30 = tpu.matmul %29, %5, %cst_20 {dimension_numbers = #tpu.dot_dimension_numbers<[1], [0], [0], [1], [0, 0, 1, 1], [], []>} : vector<196x32xbf16>, vector<32x8xbf16>, vector<196x8xf32> -> vector<196x8xf32>
      %31 = vector.broadcast %24 : vector<1x8xf32> to vector<196x8xf32>
      %32 = arith.mulf %30, %31 : vector<196x8xf32>
      %33 = vector.broadcast %27 : vector<1x8xf32> to vector<196x8xf32>
      %34 = arith.addf %32, %33 : vector<196x8xf32>
      %c0_21 = arith.constant 0 : index
      %c1 = arith.constant 1 : index
      %c0_22 = arith.constant 0 : index
      %c0_23 = arith.constant 0 : index
      %35 = vector.load %arg2[%c0_21, %c1, %c0_22, %c0_23] : memref<1x4x196x32xbf16, #tpu.memory_space<vmem>>, vector<1x1x196x32xbf16>
      %36 = vector.shape_cast %35 : vector<1x1x196x32xbf16> to vector<196x32xbf16>
      %cst_24 = arith.constant dense<0.000000e+00> : vector<196x8xf32>
      %37 = tpu.matmul %36, %5, %cst_24 {dimension_numbers = #tpu.dot_dimension_numbers<[1], [0], [0], [1], [0, 0, 1, 1], [], []>} : vector<196x32xbf16>, vector<32x8xbf16>, vector<196x8xf32> -> vector<196x8xf32>
      %38 = vector.broadcast %24 : vector<1x8xf32> to vector<196x8xf32>
      %39 = arith.mulf %37, %38 : vector<196x8xf32>
      %40 = vector.broadcast %27 : vector<1x8xf32> to vector<196x8xf32>
      %41 = arith.addf %39, %40 : vector<196x8xf32>
      %42 = arith.maximumf %34, %41 : vector<196x8xf32>
      %c0_25 = arith.constant 0 : index
      %c2 = arith.constant 2 : index
      %c0_26 = arith.constant 0 : index
      %c0_27 = arith.constant 0 : index
      %43 = vector.load %arg2[%c0_25, %c2, %c0_26, %c0_27] : memref<1x4x196x32xbf16, #tpu.memory_space<vmem>>, vector<1x1x196x32xbf16>
      %44 = vector.shape_cast %43 : vector<1x1x196x32xbf16> to vector<196x32xbf16>
      %cst_28 = arith.constant dense<0.000000e+00> : vector<196x8xf32>
      %45 = tpu.matmul %44, %5, %cst_28 {dimension_numbers = #tpu.dot_dimension_numbers<[1], [0], [0], [1], [0, 0, 1, 1], [], []>} : vector<196x32xbf16>, vector<32x8xbf16>, vector<196x8xf32> -> vector<196x8xf32>
      %46 = vector.broadcast %24 : vector<1x8xf32> to vector<196x8xf32>
      %47 = arith.mulf %45, %46 : vector<196x8xf32>
      %48 = vector.broadcast %27 : vector<1x8xf32> to vector<196x8xf32>
      %49 = arith.addf %47, %48 : vector<196x8xf32>
      %50 = arith.maximumf %42, %49 : vector<196x8xf32>
      %c0_29 = arith.constant 0 : index
      %c3 = arith.constant 3 : index
      %c0_30 = arith.constant 0 : index
      %c0_31 = arith.constant 0 : index
      %51 = vector.load %arg2[%c0_29, %c3, %c0_30, %c0_31] : memref<1x4x196x32xbf16, #tpu.memory_space<vmem>>, vector<1x1x196x32xbf16>
      %52 = vector.shape_cast %51 : vector<1x1x196x32xbf16> to vector<196x32xbf16>
      %cst_32 = arith.constant dense<0.000000e+00> : vector<196x8xf32>
      %53 = tpu.matmul %52, %5, %cst_32 {dimension_numbers = #tpu.dot_dimension_numbers<[1], [0], [0], [1], [0, 0, 1, 1], [], []>} : vector<196x32xbf16>, vector<32x8xbf16>, vector<196x8xf32> -> vector<196x8xf32>
      %54 = vector.broadcast %24 : vector<1x8xf32> to vector<196x8xf32>
      %55 = arith.mulf %53, %54 : vector<196x8xf32>
      %56 = vector.broadcast %27 : vector<1x8xf32> to vector<196x8xf32>
      %57 = arith.addf %55, %56 : vector<196x8xf32>
      %58 = arith.maximumf %50, %57 : vector<196x8xf32>
      %cst_33 = arith.constant 0.000000e+00 : f32
      %59 = vector.broadcast %cst_33 : f32 to vector<196x8xf32>
      %60 = arith.maximumf %58, %59 : vector<196x8xf32>
      %61 = arith.truncf %60 : vector<196x8xf32> to vector<196x8xbf16>
      %c0_34 = arith.constant 0 : index
      %c0_35 = arith.constant 0 : index
      %c0_36 = arith.constant 0 : index
      %62 = vector.load %arg6[%c0_34, %c0_35, %c0_36] : memref<1x196x8xbf16, #tpu.memory_space<vmem>>, vector<1x196x8xbf16>
      %63 = vector.shape_cast %62 : vector<1x196x8xbf16> to vector<196x8xbf16>
      %64 = vector.shape_cast %61 : vector<196x8xbf16> to vector<1x196x8xbf16>
      tpu.vector_store %arg6[%c0_34, %c0_35, %c0_36], %64 {strides = array<i32>} : memref<1x196x8xbf16, #tpu.memory_space<vmem>>, vector<1x196x8xbf16>,
    } else {
    }
    return
  }
  func.func @transform_0(%arg0: i32, %arg1: i32) -> (i32, i32, i32, i32) {
    %c0_i32 = arith.constant 0 : i32
    %c0_i32_0 = arith.constant 0 : i32
    %c0_i32_1 = arith.constant 0 : i32
    %c0_i32_2 = arith.constant 0 : i32
    return %arg1, %c0_i32, %c0_i32_0, %c0_i32_1 : i32, i32, i32, i32
  }
  func.func @transform_1(%arg0: i32, %arg1: i32) -> (i32, i32) {
    %c0_i32 = arith.constant 0 : i32
    %c0_i32_0 = arith.constant 0 : i32
    %c0_i32_1 = arith.constant 0 : i32
    return %c0_i32, %c0_i32_0 : i32, i32
  }
  func.func @transform_2(%arg0: i32, %arg1: i32) -> (i32, i32) {
    %c0_i32 = arith.constant 0 : i32
    %c0_i32_0 = arith.constant 0 : i32
    %c0_i32_1 = arith.constant 0 : i32
    return %c0_i32, %c0_i32_0 : i32, i32
  }
  func.func @transform_3(%arg0: i32, %arg1: i32) -> (i32, i32) {
    %c0_i32 = arith.constant 0 : i32
    %c0_i32_0 = arith.constant 0 : i32
    %c0_i32_1 = arith.constant 0 : i32
    return %c0_i32, %c0_i32_0 : i32, i32
  }
  func.func @transform_4(%arg0: i32, %arg1: i32) -> (i32, i32, i32) {
    %c0_i32 = arith.constant 0 : i32
    %c0_i32_0 = arith.constant 0 : i32
    %c0_i32_1 = arith.constant 0 : i32
    return %arg1, %c0_i32, %c0_i32_0 : i32, i32, i32
  }
}

module attributes {stable_mosaic.version = 11 : i64} {
  func.func @conv_bn_relu_pool_kernel(%arg0: i32, %arg1: i32, %arg2: memref<1x4x25x160xbf16, #tpu.memory_space<vmem>>, %arg3: memref<160x16xbf16, #tpu.memory_space<vmem>>, %arg4: memref<1x16xf32, #tpu.memory_space<vmem>>, %arg5: memref<1x16xf32, #tpu.memory_space<vmem>>, %arg6: memref<1x25x16xbf16, #tpu.memory_space<vmem>>, %arg7: memref<1x16xf32, #tpu.memory_space<vmem>>, %arg8: memref<1x16xf32, #tpu.memory_space<vmem>>) attributes {dimension_semantics = [#tpu.dimension_semantics<arbitrary>, #tpu.dimension_semantics<arbitrary>], iteration_bounds = array<i64: 2, 2>, scalar_prefetch = 0 : i64, scratch_operands = 2 : i64, tpu.core_type = #tpu.core_type<tc>, window_params = [{transform_indices = @transform_0, window_bounds = array<i64: 1, 4, 25, 160>}, {pipeline_mode = #tpu.pipeline_mode<synchronous>, transform_indices = @transform_1, window_bounds = array<i64: 160, 16>}, {pipeline_mode = #tpu.pipeline_mode<synchronous>, transform_indices = @transform_2, window_bounds = array<i64: 1, 16>}, {pipeline_mode = #tpu.pipeline_mode<synchronous>, transform_indices = @transform_3, window_bounds = array<i64: 1, 16>}, {transform_indices = @transform_4, window_bounds = array<i64: 1, 25, 16>}]} {
    %c0_i32 = arith.constant 0 : i32
    %0 = arith.cmpi eq, %arg0, %c0_i32 : i32
    %c0_i32_0 = arith.constant 0 : i32
    %1 = arith.cmpi eq, %arg1, %c0_i32_0 : i32
    %2 = arith.andi %0, %1 : i1
    %3 = arith.extui %2 : i1 to i32
    %c0_i32_1 = arith.constant 0 : i32
    %4 = arith.cmpi ne, %3, %c0_i32_1 : i32
    scf.if %4 {
      %cst = arith.constant 0.000000e+00 : f32
      %12 = vector.broadcast %cst : f32 to vector<1x16xf32>
      %c0_6 = arith.constant 0 : index
      %c0_7 = arith.constant 0 : index
      %13 = vector.load %arg7[%c0_6, %c0_7] : memref<1x16xf32, #tpu.memory_space<vmem>>, vector<1x16xf32>
      tpu.vector_store %arg7[%c0_6, %c0_7], %12 {strides = array<i32>} : memref<1x16xf32, #tpu.memory_space<vmem>>, vector<1x16xf32>,
      %cst_8 = arith.constant 0.000000e+00 : f32
      %14 = vector.broadcast %cst_8 : f32 to vector<1x16xf32>
      %c0_9 = arith.constant 0 : index
      %c0_10 = arith.constant 0 : index
      %15 = vector.load %arg8[%c0_9, %c0_10] : memref<1x16xf32, #tpu.memory_space<vmem>>, vector<1x16xf32>
      tpu.vector_store %arg8[%c0_9, %c0_10], %14 {strides = array<i32>} : memref<1x16xf32, #tpu.memory_space<vmem>>, vector<1x16xf32>,
    } else {
    }
    %c0 = arith.constant 0 : index
    %c0_2 = arith.constant 0 : index
    %5 = vector.load %arg3[%c0, %c0_2] : memref<160x16xbf16, #tpu.memory_space<vmem>>, vector<160x16xbf16>
    %c0_i32_3 = arith.constant 0 : i32
    %6 = arith.cmpi eq, %arg0, %c0_i32_3 : i32
    %7 = arith.extui %6 : i1 to i32
    %c0_i32_4 = arith.constant 0 : i32
    %8 = arith.cmpi ne, %7, %c0_i32_4 : i32
    scf.if %8 {
      %cst = arith.constant 0.000000e+00 : f32
      %12 = vector.broadcast %cst : f32 to vector<1x16xf32>
      %cst_6 = arith.constant 0.000000e+00 : f32
      %13 = vector.broadcast %cst_6 : f32 to vector<1x16xf32>
      %c0_7 = arith.constant 0 : index
      %c0_8 = arith.constant 0 : index
      %c0_9 = arith.constant 0 : index
      %c0_10 = arith.constant 0 : index
      %14 = vector.load %arg2[%c0_7, %c0_8, %c0_9, %c0_10] : memref<1x4x25x160xbf16, #tpu.memory_space<vmem>>, vector<1x1x25x160xbf16>
      %15 = vector.shape_cast %14 : vector<1x1x25x160xbf16> to vector<25x160xbf16>
      %cst_11 = arith.constant dense<0.000000e+00> : vector<25x16xf32>
      %16 = tpu.matmul %15, %5, %cst_11 {dimension_numbers = #tpu.dot_dimension_numbers<[1], [0], [0], [1], [0, 0, 1, 1], [], []>} : vector<25x160xbf16>, vector<160x16xbf16>, vector<25x16xf32> -> vector<25x16xf32>
      %cst_12 = arith.constant dense<0.000000e+00> : vector<16xf32>
      %17 = vector.multi_reduction <add>, %16, %cst_12 [0] : vector<25x16xf32> to vector<16xf32>
      %18 = vector.shape_cast %17 : vector<16xf32> to vector<1x16xf32>
      %19 = arith.addf %12, %18 : vector<1x16xf32>
      %20 = arith.mulf %16, %16 : vector<25x16xf32>
      %cst_13 = arith.constant dense<0.000000e+00> : vector<16xf32>
      %21 = vector.multi_reduction <add>, %20, %cst_13 [0] : vector<25x16xf32> to vector<16xf32>
      %22 = vector.shape_cast %21 : vector<16xf32> to vector<1x16xf32>
      %23 = arith.addf %13, %22 : vector<1x16xf32>
      %c0_14 = arith.constant 0 : index
      %c1 = arith.constant 1 : index
      %c0_15 = arith.constant 0 : index
      %c0_16 = arith.constant 0 : index
      %24 = vector.load %arg2[%c0_14, %c1, %c0_15, %c0_16] : memref<1x4x25x160xbf16, #tpu.memory_space<vmem>>, vector<1x1x25x160xbf16>
      %25 = vector.shape_cast %24 : vector<1x1x25x160xbf16> to vector<25x160xbf16>
      %cst_17 = arith.constant dense<0.000000e+00> : vector<25x16xf32>
      %26 = tpu.matmul %25, %5, %cst_17 {dimension_numbers = #tpu.dot_dimension_numbers<[1], [0], [0], [1], [0, 0, 1, 1], [], []>} : vector<25x160xbf16>, vector<160x16xbf16>, vector<25x16xf32> -> vector<25x16xf32>
      %cst_18 = arith.constant dense<0.000000e+00> : vector<16xf32>
      %27 = vector.multi_reduction <add>, %26, %cst_18 [0] : vector<25x16xf32> to vector<16xf32>
      %28 = vector.shape_cast %27 : vector<16xf32> to vector<1x16xf32>
      %29 = arith.addf %19, %28 : vector<1x16xf32>
      %30 = arith.mulf %26, %26 : vector<25x16xf32>
      %cst_19 = arith.constant dense<0.000000e+00> : vector<16xf32>
      %31 = vector.multi_reduction <add>, %30, %cst_19 [0] : vector<25x16xf32> to vector<16xf32>
      %32 = vector.shape_cast %31 : vector<16xf32> to vector<1x16xf32>
      %33 = arith.addf %23, %32 : vector<1x16xf32>
      %c0_20 = arith.constant 0 : index
      %c2 = arith.constant 2 : index
      %c0_21 = arith.constant 0 : index
      %c0_22 = arith.constant 0 : index
      %34 = vector.load %arg2[%c0_20, %c2, %c0_21, %c0_22] : memref<1x4x25x160xbf16, #tpu.memory_space<vmem>>, vector<1x1x25x160xbf16>
      %35 = vector.shape_cast %34 : vector<1x1x25x160xbf16> to vector<25x160xbf16>
      %cst_23 = arith.constant dense<0.000000e+00> : vector<25x16xf32>
      %36 = tpu.matmul %35, %5, %cst_23 {dimension_numbers = #tpu.dot_dimension_numbers<[1], [0], [0], [1], [0, 0, 1, 1], [], []>} : vector<25x160xbf16>, vector<160x16xbf16>, vector<25x16xf32> -> vector<25x16xf32>
      %cst_24 = arith.constant dense<0.000000e+00> : vector<16xf32>
      %37 = vector.multi_reduction <add>, %36, %cst_24 [0] : vector<25x16xf32> to vector<16xf32>
      %38 = vector.shape_cast %37 : vector<16xf32> to vector<1x16xf32>
      %39 = arith.addf %29, %38 : vector<1x16xf32>
      %40 = arith.mulf %36, %36 : vector<25x16xf32>
      %cst_25 = arith.constant dense<0.000000e+00> : vector<16xf32>
      %41 = vector.multi_reduction <add>, %40, %cst_25 [0] : vector<25x16xf32> to vector<16xf32>
      %42 = vector.shape_cast %41 : vector<16xf32> to vector<1x16xf32>
      %43 = arith.addf %33, %42 : vector<1x16xf32>
      %c0_26 = arith.constant 0 : index
      %c3 = arith.constant 3 : index
      %c0_27 = arith.constant 0 : index
      %c0_28 = arith.constant 0 : index
      %44 = vector.load %arg2[%c0_26, %c3, %c0_27, %c0_28] : memref<1x4x25x160xbf16, #tpu.memory_space<vmem>>, vector<1x1x25x160xbf16>
      %45 = vector.shape_cast %44 : vector<1x1x25x160xbf16> to vector<25x160xbf16>
      %cst_29 = arith.constant dense<0.000000e+00> : vector<25x16xf32>
      %46 = tpu.matmul %45, %5, %cst_29 {dimension_numbers = #tpu.dot_dimension_numbers<[1], [0], [0], [1], [0, 0, 1, 1], [], []>} : vector<25x160xbf16>, vector<160x16xbf16>, vector<25x16xf32> -> vector<25x16xf32>
      %cst_30 = arith.constant dense<0.000000e+00> : vector<16xf32>
      %47 = vector.multi_reduction <add>, %46, %cst_30 [0] : vector<25x16xf32> to vector<16xf32>
      %48 = vector.shape_cast %47 : vector<16xf32> to vector<1x16xf32>
      %49 = arith.addf %39, %48 : vector<1x16xf32>
      %50 = arith.mulf %46, %46 : vector<25x16xf32>
      %cst_31 = arith.constant dense<0.000000e+00> : vector<16xf32>
      %51 = vector.multi_reduction <add>, %50, %cst_31 [0] : vector<25x16xf32> to vector<16xf32>
      %52 = vector.shape_cast %51 : vector<16xf32> to vector<1x16xf32>
      %53 = arith.addf %43, %52 : vector<1x16xf32>
      %c0_32 = arith.constant 0 : index
      %c0_33 = arith.constant 0 : index
      %54 = vector.load %arg7[%c0_32, %c0_33] : memref<1x16xf32, #tpu.memory_space<vmem>>, vector<1x16xf32>
      %55 = arith.addf %54, %49 : vector<1x16xf32>
      %c0_34 = arith.constant 0 : index
      %c0_35 = arith.constant 0 : index
      %56 = vector.load %arg7[%c0_34, %c0_35] : memref<1x16xf32, #tpu.memory_space<vmem>>, vector<1x16xf32>
      tpu.vector_store %arg7[%c0_34, %c0_35], %55 {strides = array<i32>} : memref<1x16xf32, #tpu.memory_space<vmem>>, vector<1x16xf32>,
      %c0_36 = arith.constant 0 : index
      %c0_37 = arith.constant 0 : index
      %57 = vector.load %arg8[%c0_36, %c0_37] : memref<1x16xf32, #tpu.memory_space<vmem>>, vector<1x16xf32>
      %58 = arith.addf %57, %53 : vector<1x16xf32>
      %c0_38 = arith.constant 0 : index
      %c0_39 = arith.constant 0 : index
      %59 = vector.load %arg8[%c0_38, %c0_39] : memref<1x16xf32, #tpu.memory_space<vmem>>, vector<1x16xf32>
      tpu.vector_store %arg8[%c0_38, %c0_39], %58 {strides = array<i32>} : memref<1x16xf32, #tpu.memory_space<vmem>>, vector<1x16xf32>,
      %cst_40 = arith.constant 0.000000e+00 : bf16
      %60 = vector.broadcast %cst_40 : bf16 to vector<25x16xbf16>
      %c0_41 = arith.constant 0 : index
      %c0_42 = arith.constant 0 : index
      %c0_43 = arith.constant 0 : index
      %61 = vector.load %arg6[%c0_41, %c0_42, %c0_43] : memref<1x25x16xbf16, #tpu.memory_space<vmem>>, vector<1x25x16xbf16>
      %62 = vector.shape_cast %61 : vector<1x25x16xbf16> to vector<25x16xbf16>
      %63 = vector.shape_cast %60 : vector<25x16xbf16> to vector<1x25x16xbf16>
      tpu.vector_store %arg6[%c0_41, %c0_42, %c0_43], %63 {strides = array<i32>} : memref<1x25x16xbf16, #tpu.memory_space<vmem>>, vector<1x25x16xbf16>,
    } else {
    }
    %c1_i32 = arith.constant 1 : i32
    %9 = arith.cmpi eq, %arg0, %c1_i32 : i32
    %10 = arith.extui %9 : i1 to i32
    %c0_i32_5 = arith.constant 0 : i32
    %11 = arith.cmpi ne, %10, %c0_i32_5 : i32
    scf.if %11 {
      %c0_6 = arith.constant 0 : index
      %c0_7 = arith.constant 0 : index
      %12 = vector.load %arg7[%c0_6, %c0_7] : memref<1x16xf32, #tpu.memory_space<vmem>>, vector<1x16xf32>
      %cst = arith.constant 5.000000e-03 : f32
      %13 = vector.broadcast %cst : f32 to vector<1x16xf32>
      %14 = arith.mulf %12, %13 : vector<1x16xf32>
      %c0_8 = arith.constant 0 : index
      %c0_9 = arith.constant 0 : index
      %15 = vector.load %arg8[%c0_8, %c0_9] : memref<1x16xf32, #tpu.memory_space<vmem>>, vector<1x16xf32>
      %cst_10 = arith.constant 5.000000e-03 : f32
      %16 = vector.broadcast %cst_10 : f32 to vector<1x16xf32>
      %17 = arith.mulf %15, %16 : vector<1x16xf32>
      %18 = arith.mulf %14, %14 : vector<1x16xf32>
      %19 = arith.subf %17, %18 : vector<1x16xf32>
      %cst_11 = arith.constant 9.99999974E-6 : f32
      %20 = vector.broadcast %cst_11 : f32 to vector<1x16xf32>
      %21 = arith.addf %19, %20 : vector<1x16xf32>
      %22 = math.rsqrt %21 : vector<1x16xf32>
      %c0_12 = arith.constant 0 : index
      %c0_13 = arith.constant 0 : index
      %23 = vector.load %arg4[%c0_12, %c0_13] : memref<1x16xf32, #tpu.memory_space<vmem>>, vector<1x16xf32>
      %24 = arith.mulf %22, %23 : vector<1x16xf32>
      %c0_14 = arith.constant 0 : index
      %c0_15 = arith.constant 0 : index
      %25 = vector.load %arg5[%c0_14, %c0_15] : memref<1x16xf32, #tpu.memory_space<vmem>>, vector<1x16xf32>
      %26 = arith.mulf %14, %24 : vector<1x16xf32>
      %27 = arith.subf %25, %26 : vector<1x16xf32>
      %c0_16 = arith.constant 0 : index
      %c0_17 = arith.constant 0 : index
      %c0_18 = arith.constant 0 : index
      %c0_19 = arith.constant 0 : index
      %28 = vector.load %arg2[%c0_16, %c0_17, %c0_18, %c0_19] : memref<1x4x25x160xbf16, #tpu.memory_space<vmem>>, vector<1x1x25x160xbf16>
      %29 = vector.shape_cast %28 : vector<1x1x25x160xbf16> to vector<25x160xbf16>
      %cst_20 = arith.constant dense<0.000000e+00> : vector<25x16xf32>
      %30 = tpu.matmul %29, %5, %cst_20 {dimension_numbers = #tpu.dot_dimension_numbers<[1], [0], [0], [1], [0, 0, 1, 1], [], []>} : vector<25x160xbf16>, vector<160x16xbf16>, vector<25x16xf32> -> vector<25x16xf32>
      %31 = vector.broadcast %24 : vector<1x16xf32> to vector<25x16xf32>
      %32 = arith.mulf %30, %31 : vector<25x16xf32>
      %33 = vector.broadcast %27 : vector<1x16xf32> to vector<25x16xf32>
      %34 = arith.addf %32, %33 : vector<25x16xf32>
      %c0_21 = arith.constant 0 : index
      %c1 = arith.constant 1 : index
      %c0_22 = arith.constant 0 : index
      %c0_23 = arith.constant 0 : index
      %35 = vector.load %arg2[%c0_21, %c1, %c0_22, %c0_23] : memref<1x4x25x160xbf16, #tpu.memory_space<vmem>>, vector<1x1x25x160xbf16>
      %36 = vector.shape_cast %35 : vector<1x1x25x160xbf16> to vector<25x160xbf16>
      %cst_24 = arith.constant dense<0.000000e+00> : vector<25x16xf32>
      %37 = tpu.matmul %36, %5, %cst_24 {dimension_numbers = #tpu.dot_dimension_numbers<[1], [0], [0], [1], [0, 0, 1, 1], [], []>} : vector<25x160xbf16>, vector<160x16xbf16>, vector<25x16xf32> -> vector<25x16xf32>
      %38 = vector.broadcast %24 : vector<1x16xf32> to vector<25x16xf32>
      %39 = arith.mulf %37, %38 : vector<25x16xf32>
      %40 = vector.broadcast %27 : vector<1x16xf32> to vector<25x16xf32>
      %41 = arith.addf %39, %40 : vector<25x16xf32>
      %42 = arith.maximumf %34, %41 : vector<25x16xf32>
      %c0_25 = arith.constant 0 : index
      %c2 = arith.constant 2 : index
      %c0_26 = arith.constant 0 : index
      %c0_27 = arith.constant 0 : index
      %43 = vector.load %arg2[%c0_25, %c2, %c0_26, %c0_27] : memref<1x4x25x160xbf16, #tpu.memory_space<vmem>>, vector<1x1x25x160xbf16>
      %44 = vector.shape_cast %43 : vector<1x1x25x160xbf16> to vector<25x160xbf16>
      %cst_28 = arith.constant dense<0.000000e+00> : vector<25x16xf32>
      %45 = tpu.matmul %44, %5, %cst_28 {dimension_numbers = #tpu.dot_dimension_numbers<[1], [0], [0], [1], [0, 0, 1, 1], [], []>} : vector<25x160xbf16>, vector<160x16xbf16>, vector<25x16xf32> -> vector<25x16xf32>
      %46 = vector.broadcast %24 : vector<1x16xf32> to vector<25x16xf32>
      %47 = arith.mulf %45, %46 : vector<25x16xf32>
      %48 = vector.broadcast %27 : vector<1x16xf32> to vector<25x16xf32>
      %49 = arith.addf %47, %48 : vector<25x16xf32>
      %50 = arith.maximumf %42, %49 : vector<25x16xf32>
      %c0_29 = arith.constant 0 : index
      %c3 = arith.constant 3 : index
      %c0_30 = arith.constant 0 : index
      %c0_31 = arith.constant 0 : index
      %51 = vector.load %arg2[%c0_29, %c3, %c0_30, %c0_31] : memref<1x4x25x160xbf16, #tpu.memory_space<vmem>>, vector<1x1x25x160xbf16>
      %52 = vector.shape_cast %51 : vector<1x1x25x160xbf16> to vector<25x160xbf16>
      %cst_32 = arith.constant dense<0.000000e+00> : vector<25x16xf32>
      %53 = tpu.matmul %52, %5, %cst_32 {dimension_numbers = #tpu.dot_dimension_numbers<[1], [0], [0], [1], [0, 0, 1, 1], [], []>} : vector<25x160xbf16>, vector<160x16xbf16>, vector<25x16xf32> -> vector<25x16xf32>
      %54 = vector.broadcast %24 : vector<1x16xf32> to vector<25x16xf32>
      %55 = arith.mulf %53, %54 : vector<25x16xf32>
      %56 = vector.broadcast %27 : vector<1x16xf32> to vector<25x16xf32>
      %57 = arith.addf %55, %56 : vector<25x16xf32>
      %58 = arith.maximumf %50, %57 : vector<25x16xf32>
      %cst_33 = arith.constant 0.000000e+00 : f32
      %59 = vector.broadcast %cst_33 : f32 to vector<25x16xf32>
      %60 = arith.maximumf %58, %59 : vector<25x16xf32>
      %61 = arith.truncf %60 : vector<25x16xf32> to vector<25x16xbf16>
      %c0_34 = arith.constant 0 : index
      %c0_35 = arith.constant 0 : index
      %c0_36 = arith.constant 0 : index
      %62 = vector.load %arg6[%c0_34, %c0_35, %c0_36] : memref<1x25x16xbf16, #tpu.memory_space<vmem>>, vector<1x25x16xbf16>
      %63 = vector.shape_cast %62 : vector<1x25x16xbf16> to vector<25x16xbf16>
      %64 = vector.shape_cast %61 : vector<25x16xbf16> to vector<1x25x16xbf16>
      tpu.vector_store %arg6[%c0_34, %c0_35, %c0_36], %64 {strides = array<i32>} : memref<1x25x16xbf16, #tpu.memory_space<vmem>>, vector<1x25x16xbf16>,
    } else {
    }
    return
  }
  func.func @transform_0(%arg0: i32, %arg1: i32) -> (i32, i32, i32, i32) {
    %c0_i32 = arith.constant 0 : i32
    %c0_i32_0 = arith.constant 0 : i32
    %c0_i32_1 = arith.constant 0 : i32
    %c0_i32_2 = arith.constant 0 : i32
    return %arg1, %c0_i32, %c0_i32_0, %c0_i32_1 : i32, i32, i32, i32
  }
  func.func @transform_1(%arg0: i32, %arg1: i32) -> (i32, i32) {
    %c0_i32 = arith.constant 0 : i32
    %c0_i32_0 = arith.constant 0 : i32
    %c0_i32_1 = arith.constant 0 : i32
    return %c0_i32, %c0_i32_0 : i32, i32
  }
  func.func @transform_2(%arg0: i32, %arg1: i32) -> (i32, i32) {
    %c0_i32 = arith.constant 0 : i32
    %c0_i32_0 = arith.constant 0 : i32
    %c0_i32_1 = arith.constant 0 : i32
    return %c0_i32, %c0_i32_0 : i32, i32
  }
  func.func @transform_3(%arg0: i32, %arg1: i32) -> (i32, i32) {
    %c0_i32 = arith.constant 0 : i32
    %c0_i32_0 = arith.constant 0 : i32
    %c0_i32_1 = arith.constant 0 : i32
    return %c0_i32, %c0_i32_0 : i32, i32
  }
  func.func @transform_4(%arg0: i32, %arg1: i32) -> (i32, i32, i32) {
    %c0_i32 = arith.constant 0 : i32
    %c0_i32_0 = arith.constant 0 : i32
    %c0_i32_1 = arith.constant 0 : i32
    return %arg1, %c0_i32, %c0_i32_0 : i32, i32, i32
  }
}

module attributes {stable_mosaic.version = 11 : i64} {
  func.func @head_kernel(%arg0: memref<2x400xbf16, #tpu.memory_space<vmem>>, %arg1: memref<400x128xbf16, #tpu.memory_space<vmem>>, %arg2: memref<128x128xbf16, #tpu.memory_space<vmem>>, %arg3: memref<128x128xbf16, #tpu.memory_space<vmem>>, %arg4: memref<3x128xf32, #tpu.memory_space<vmem>>, %arg5: memref<3x128xf32, #tpu.memory_space<vmem>>, %arg6: memref<2x128xf32, #tpu.memory_space<vmem>>) attributes {dimension_semantics = [], scalar_prefetch = 0 : i64, scratch_operands = 0 : i64, tpu.core_type = #tpu.core_type<tc>} {
    %c0 = arith.constant 0 : index
    %c0_0 = arith.constant 0 : index
    %0 = vector.load %arg0[%c0, %c0_0] : memref<2x400xbf16, #tpu.memory_space<vmem>>, vector<2x400xbf16>
    %c0_1 = arith.constant 0 : index
    %c0_2 = arith.constant 0 : index
    %1 = vector.load %arg1[%c0_1, %c0_2] : memref<400x128xbf16, #tpu.memory_space<vmem>>, vector<400x128xbf16>
    %cst = arith.constant dense<0.000000e+00> : vector<2x128xf32>
    %2 = tpu.matmul %0, %1, %cst {dimension_numbers = #tpu.dot_dimension_numbers<[1], [0], [0], [1], [0, 0, 1, 1], [], []>} : vector<2x400xbf16>, vector<400x128xbf16>, vector<2x128xf32> -> vector<2x128xf32>
    %cst_3 = arith.constant dense<0.000000e+00> : vector<128xf32>
    %3 = vector.multi_reduction <add>, %2, %cst_3 [0] : vector<2x128xf32> to vector<128xf32>
    %4 = vector.shape_cast %3 : vector<128xf32> to vector<1x128xf32>
    %cst_4 = arith.constant 5.000000e-01 : f32
    %5 = vector.broadcast %cst_4 : f32 to vector<1x128xf32>
    %6 = arith.mulf %4, %5 : vector<1x128xf32>
    %7 = arith.mulf %2, %2 : vector<2x128xf32>
    %cst_5 = arith.constant dense<0.000000e+00> : vector<128xf32>
    %8 = vector.multi_reduction <add>, %7, %cst_5 [0] : vector<2x128xf32> to vector<128xf32>
    %9 = vector.shape_cast %8 : vector<128xf32> to vector<1x128xf32>
    %cst_6 = arith.constant 5.000000e-01 : f32
    %10 = vector.broadcast %cst_6 : f32 to vector<1x128xf32>
    %11 = arith.mulf %9, %10 : vector<1x128xf32>
    %12 = arith.mulf %6, %6 : vector<1x128xf32>
    %13 = arith.subf %11, %12 : vector<1x128xf32>
    %cst_7 = arith.constant 9.99999974E-6 : f32
    %14 = vector.broadcast %cst_7 : f32 to vector<1x128xf32>
    %15 = arith.addf %13, %14 : vector<1x128xf32>
    %16 = math.rsqrt %15 : vector<1x128xf32>
    %c0_8 = arith.constant 0 : index
    %c0_9 = arith.constant 0 : index
    %17 = vector.load %arg4[%c0_8, %c0_9] : memref<3x128xf32, #tpu.memory_space<vmem>>, vector<1x128xf32>
    %18 = arith.mulf %16, %17 : vector<1x128xf32>
    %c0_10 = arith.constant 0 : index
    %c0_11 = arith.constant 0 : index
    %19 = vector.load %arg5[%c0_10, %c0_11] : memref<3x128xf32, #tpu.memory_space<vmem>>, vector<1x128xf32>
    %20 = arith.mulf %6, %18 : vector<1x128xf32>
    %21 = arith.subf %19, %20 : vector<1x128xf32>
    %22 = vector.broadcast %18 : vector<1x128xf32> to vector<2x128xf32>
    %23 = arith.mulf %2, %22 : vector<2x128xf32>
    %24 = vector.broadcast %21 : vector<1x128xf32> to vector<2x128xf32>
    %25 = arith.addf %23, %24 : vector<2x128xf32>
    %cst_12 = arith.constant 0.000000e+00 : f32
    %26 = vector.broadcast %cst_12 : f32 to vector<2x128xf32>
    %27 = arith.maximumf %25, %26 : vector<2x128xf32>
    %28 = arith.truncf %27 : vector<2x128xf32> to vector<2x128xbf16>
    %c0_13 = arith.constant 0 : index
    %c0_14 = arith.constant 0 : index
    %29 = vector.load %arg2[%c0_13, %c0_14] : memref<128x128xbf16, #tpu.memory_space<vmem>>, vector<128x128xbf16>
    %cst_15 = arith.constant dense<0.000000e+00> : vector<2x128xf32>
    %30 = tpu.matmul %28, %29, %cst_15 {dimension_numbers = #tpu.dot_dimension_numbers<[1], [0], [0], [1], [0, 0, 1, 1], [], []>} : vector<2x128xbf16>, vector<128x128xbf16>, vector<2x128xf32> -> vector<2x128xf32>
    %cst_16 = arith.constant dense<0.000000e+00> : vector<128xf32>
    %31 = vector.multi_reduction <add>, %30, %cst_16 [0] : vector<2x128xf32> to vector<128xf32>
    %32 = vector.shape_cast %31 : vector<128xf32> to vector<1x128xf32>
    %cst_17 = arith.constant 5.000000e-01 : f32
    %33 = vector.broadcast %cst_17 : f32 to vector<1x128xf32>
    %34 = arith.mulf %32, %33 : vector<1x128xf32>
    %35 = arith.mulf %30, %30 : vector<2x128xf32>
    %cst_18 = arith.constant dense<0.000000e+00> : vector<128xf32>
    %36 = vector.multi_reduction <add>, %35, %cst_18 [0] : vector<2x128xf32> to vector<128xf32>
    %37 = vector.shape_cast %36 : vector<128xf32> to vector<1x128xf32>
    %cst_19 = arith.constant 5.000000e-01 : f32
    %38 = vector.broadcast %cst_19 : f32 to vector<1x128xf32>
    %39 = arith.mulf %37, %38 : vector<1x128xf32>
    %40 = arith.mulf %34, %34 : vector<1x128xf32>
    %41 = arith.subf %39, %40 : vector<1x128xf32>
    %cst_20 = arith.constant 9.99999974E-6 : f32
    %42 = vector.broadcast %cst_20 : f32 to vector<1x128xf32>
    %43 = arith.addf %41, %42 : vector<1x128xf32>
    %44 = math.rsqrt %43 : vector<1x128xf32>
    %c1 = arith.constant 1 : index
    %c0_21 = arith.constant 0 : index
    %45 = vector.load %arg4[%c1, %c0_21] : memref<3x128xf32, #tpu.memory_space<vmem>>, vector<1x128xf32>
    %46 = arith.mulf %44, %45 : vector<1x128xf32>
    %c1_22 = arith.constant 1 : index
    %c0_23 = arith.constant 0 : index
    %47 = vector.load %arg5[%c1_22, %c0_23] : memref<3x128xf32, #tpu.memory_space<vmem>>, vector<1x128xf32>
    %48 = arith.mulf %34, %46 : vector<1x128xf32>
    %49 = arith.subf %47, %48 : vector<1x128xf32>
    %50 = vector.broadcast %46 : vector<1x128xf32> to vector<2x128xf32>
    %51 = arith.mulf %30, %50 : vector<2x128xf32>
    %52 = vector.broadcast %49 : vector<1x128xf32> to vector<2x128xf32>
    %53 = arith.addf %51, %52 : vector<2x128xf32>
    %54 = math.tanh %53 : vector<2x128xf32>
    %55 = arith.truncf %54 : vector<2x128xf32> to vector<2x128xbf16>
    %c0_24 = arith.constant 0 : index
    %c0_25 = arith.constant 0 : index
    %56 = vector.load %arg3[%c0_24, %c0_25] : memref<128x128xbf16, #tpu.memory_space<vmem>>, vector<128x128xbf16>
    %cst_26 = arith.constant dense<0.000000e+00> : vector<2x128xf32>
    %57 = tpu.matmul %55, %56, %cst_26 {dimension_numbers = #tpu.dot_dimension_numbers<[1], [0], [0], [1], [0, 0, 1, 1], [], []>} : vector<2x128xbf16>, vector<128x128xbf16>, vector<2x128xf32> -> vector<2x128xf32>
    %cst_27 = arith.constant dense<0.000000e+00> : vector<128xf32>
    %58 = vector.multi_reduction <add>, %57, %cst_27 [0] : vector<2x128xf32> to vector<128xf32>
    %59 = vector.shape_cast %58 : vector<128xf32> to vector<1x128xf32>
    %cst_28 = arith.constant 5.000000e-01 : f32
    %60 = vector.broadcast %cst_28 : f32 to vector<1x128xf32>
    %61 = arith.mulf %59, %60 : vector<1x128xf32>
    %62 = arith.mulf %57, %57 : vector<2x128xf32>
    %cst_29 = arith.constant dense<0.000000e+00> : vector<128xf32>
    %63 = vector.multi_reduction <add>, %62, %cst_29 [0] : vector<2x128xf32> to vector<128xf32>
    %64 = vector.shape_cast %63 : vector<128xf32> to vector<1x128xf32>
    %cst_30 = arith.constant 5.000000e-01 : f32
    %65 = vector.broadcast %cst_30 : f32 to vector<1x128xf32>
    %66 = arith.mulf %64, %65 : vector<1x128xf32>
    %67 = arith.mulf %61, %61 : vector<1x128xf32>
    %68 = arith.subf %66, %67 : vector<1x128xf32>
    %cst_31 = arith.constant 9.99999974E-6 : f32
    %69 = vector.broadcast %cst_31 : f32 to vector<1x128xf32>
    %70 = arith.addf %68, %69 : vector<1x128xf32>
    %71 = math.rsqrt %70 : vector<1x128xf32>
    %c2 = arith.constant 2 : index
    %c0_32 = arith.constant 0 : index
    %72 = vector.load %arg4[%c2, %c0_32] : memref<3x128xf32, #tpu.memory_space<vmem>>, vector<1x128xf32>
    %73 = arith.mulf %71, %72 : vector<1x128xf32>
    %c2_33 = arith.constant 2 : index
    %c0_34 = arith.constant 0 : index
    %74 = vector.load %arg5[%c2_33, %c0_34] : memref<3x128xf32, #tpu.memory_space<vmem>>, vector<1x128xf32>
    %75 = arith.mulf %61, %73 : vector<1x128xf32>
    %76 = arith.subf %74, %75 : vector<1x128xf32>
    %77 = vector.broadcast %73 : vector<1x128xf32> to vector<2x128xf32>
    %78 = arith.mulf %57, %77 : vector<2x128xf32>
    %79 = vector.broadcast %76 : vector<1x128xf32> to vector<2x128xf32>
    %80 = arith.addf %78, %79 : vector<2x128xf32>
    %81 = tpu.iota {dimensions = array<i32: 1>} : vector<2x128xi32>
    %c10_i32 = arith.constant 10 : i32
    %82 = vector.broadcast %c10_i32 : i32 to vector<2x128xi32>
    %83 = arith.cmpi slt, %81, %82 : vector<2x128xi32>
    %cst_35 = arith.constant -1.000000e+30 : f32
    %84 = vector.broadcast %cst_35 : f32 to vector<2x128xf32>
    %85 = arith.select %83, %80, %84 : vector<2x128xi1>, vector<2x128xf32>
    %cst_36 = arith.constant dense<0xFF800000> : vector<2xf32>
    %86 = vector.multi_reduction <maximumf>, %85, %cst_36 [1] : vector<2x128xf32> to vector<2xf32>
    %87 = vector.shape_cast %86 : vector<2xf32> to vector<2x1xf32>
    %88 = vector.broadcast %87 : vector<2x1xf32> to vector<2x128xf32>
    %89 = arith.subf %85, %88 : vector<2x128xf32>
    %90 = math.exp %89 : vector<2x128xf32>
    %cst_37 = arith.constant dense<0.000000e+00> : vector<2xf32>
    %91 = vector.multi_reduction <add>, %90, %cst_37 [1] : vector<2x128xf32> to vector<2xf32>
    %92 = vector.shape_cast %91 : vector<2xf32> to vector<2x1xf32>
    %93 = tpu.reciprocal %92 : vector<2x1xf32> -> vector<2x1xf32>
    %94 = vector.broadcast %93 : vector<2x1xf32> to vector<2x128xf32>
    %95 = arith.mulf %90, %94 : vector<2x128xf32>
    %c0_38 = arith.constant 0 : index
    %c0_39 = arith.constant 0 : index
    %96 = vector.load %arg6[%c0_38, %c0_39] : memref<2x128xf32, #tpu.memory_space<vmem>>, vector<2x128xf32>
    tpu.vector_store %arg6[%c0_38, %c0_39], %95 {strides = array<i32>} : memref<2x128xf32, #tpu.memory_space<vmem>>, vector<2x128xf32>,
    return
  }
}

</mosaic_0001>

<bundles_post_ra>
// kernel: lenet5_forward.3
= control target key start
LH: loop header
LB: loop body
LE: loop exit
PB: predicated region body
PF: predicated region fallthrough
CT: control target
= control target key end

     0   :  { %s4685_s15 = smov 0   ;;  %s4687_s16 = smov 0   ;;  %s6065_s0 = inlined_call_operand.vmem [shape: bf16[2,4,196,32], index: 0, kind: input, shape index: {}]   ;;  %s6066_s1 = inlined_call_operand.vmem [shape: bf16[32,8], index: 1, kind: input, shape index: {}]   ;;  %s6067_s2 = inlined_call_operand.vmem [shape: f32[1,8], index: 2, kind: input, shape index: {}]   ;;  %s6068_s3 = inlined_call_operand.vmem [shape: f32[1,8], index: 3, kind: input, shape index: {}]   ;;  %s6069_s4 = inlined_call_operand.vmem [shape: bf16[2,196,8], index: 4, kind: output, shape index: {}]  }
   0x1   :  { %s4689_s17 = smov 0   ;;  %s4691_s18 = smov 0  }
   0x2   :  { %s4693_s19 = smov 0  }
   0x3 LB: > { %s23_s20 = sadd.s32 1, %s4644_s17  ;;  %s26_s21 = sadd.s32 1, %s4648_s18  ;;  %s4652_s19 = sphi %s4693_s19, %s14_s19   ;;  %s4648_s18 = sphi %s4691_s18, %s6113_s18   ;;  %s4644_s17 = sphi %s4689_s17, %s6112_s17   ;;  %s4640_s16 = sphi %s4687_s16, %s6111_s16   ;;  %s4636_s15 = sphi %s4685_s15, %s6110_s15  }
   0x4   : > { %p24_p0 = scmp.ge.s32.totalorder %s23_s20, 2  ;;  %p3473_p1 = scmp.ge.s32.totalorder %s4652_s19, 1 }
   0x5   : > { %p174_p2 = scmp.lt.s32.totalorder %s4652_s19, 5 }
   0x6   : > { %s6115_s20 = smov (%p24_p0, %s23_s20), 0  ;;  %s6117_s21 = smov (!%p24_p0, %s26_s21), %s4648_s18 }
   0x7   : > { %p175_p3 = pnand %p3473_p1, %p174_p2  ;;  %p28_p4 = scmp.ge.s32.totalorder %s6117_s21, 2 }
   0x8   : > { %p200_p5 = scmp.lt.s32.totalorder (!%p175_p3), %s4636_s15, 1  ;;  %p211_p6 = scmp.eq.s32.totalorder (!%p175_p3), %s4640_s16, 0 }
   0x9   : > { %s6119_s21 = smov (%p28_p4, %s6117_s21), 0  ;;  %178 = sbr.rel (%p175_p3) target bundleno = 877 (0x36d), region = 36 }
   0xa   : > { %p212_p7 = scmp.eq.s32.totalorder (!%p175_p3), %s4636_s15, 0 }
   0xc   : > { %p213_p8 = pnand (!%p175_p3), %p212_p7, %p211_p6 }
   0xe   : > { %s6121_s15 = smov (!%p200_p5, %s4636_s15), 1  ;;  %216 = sbr.rel (%p213_p8) target bundleno = 21 (0x15), region = 40 }
   0xf   : > { %s4460_s22 = smul.u32 400, %s6121_s15 }
  0x10   : > { %s4461_s23 = smul.u32 100, %s6121_s15 }
  0x11   : > { %s4721_s26 = scalar_lea.vmem %s6065_s0, %s4460_s22 }
  0x12   : > { %s4726_s29 = scalar_lea.vmem %s6069_s4, %s4461_s23 }
  0x13   : > { %vm217_vm0 = vcmask 57344   ;;  %v4654_v0 = vmov 0.0  }
  0x14   : > { %218 = vst.msk [vmem:[#allocation2] sm:$0x1] %vm217_vm0, %v4654_v0  ;;  %219 = vst.msk [vmem:[#allocation3] sm:$0x1] %vm217_vm0, %v4654_v0 }
  0x15 PF: > { %v4731_v1 = vld [vmem:[%s6066_s1] sm:$0xf]  ;;  %v4736_v2 = vld [vmem:[%s6066_s1 + $0x4] sm:$0xf]  ;;  %v4741_v3 = vld [vmem:[%s6066_s1 + $0x8] sm:$0xf] }
  0x16   : > { %v4746_v4 = vld [vmem:[%s6066_s1 + $0xc] sm:$0xf]  ;;  %p3476_p9 = scmp.ne.s32.totalorder %s4640_s16, 0 }
  0x18   : > { %226 = sbr.rel (%p3476_p9) target bundleno = 455 (0x1c7), region = 44 }
  0x1d   : > { %v3491_v5 = vcombine.low %v4741_v3, %v4746_v4  ;;  %v4655_v6 = vmov 0.0   ;;  %v3490_v7 = vcombine.low %v4731_v1, %v4736_v2  ;;  %vm4656_vm1 = vmmov 0   ;;  %v4508_v8 = vld [vmem:[%s4721_s26] sm:$0xff]   ;;  %v4510_v10 = vld [vmem:[%s4721_s26 + $0x8] sm:$0xff]   ;;  %v4512_v12 = vld [vmem:[%s4721_s26 + $0x10] sm:$0xff]  }
  0x1e   : > { %4012 = vmatprep.subr.bf16.mxu0 %v4655_v6  ;;  %4068 = vmatprep.subr.bf16.mxu1 %v4655_v6  ;;  %v4509_v9 = vld [vmem:[%s4721_s26 + $0x64] sm:$0xff]   ;;  %vm327_vm2 = vcmask 261120   ;;  %v4511_v11 = vld [vmem:[%s4721_s26 + $0x6c] sm:$0xff]   ;;  %v4513_v13 = vld [vmem:[%s4721_s26 + $0x74] sm:$0xff]   ;;  %vm551_vm3 = vcmask 60416   ;;  %vm1876_vm4 = vcmask 58368  }
  0x1f   : > { %4013 = vmatpush3.bf16.msra.mxu0 %v3491_v5  ;;  %4069 = vmatpush3.bf16.msra.mxu1 %v3491_v5  ;;  %v4514_v14 = vld [vmem:[%s4721_s26 + $0x18] sm:$0xff]   ;;  %v4516_v16 = vld [vmem:[%s4721_s26 + $0x20] sm:$0xff]   ;;  %v4518_v18 = vld [vmem:[%s4721_s26 + $0x28] sm:$0xff]   ;;  %v4657_v54 = vmov 0   ;;  %vm503_vm5 = vcmask 64512   ;;  %vm1847_vm6 = vcmask 57344  }
  0x20   : > { %4014 = vmatprep.subr.bf16.mxu0 %v4655_v6  ;;  %4070 = vmatprep.subr.bf16.mxu1 %v4655_v6  ;;  %v4515_v15 = vld [vmem:[%s4721_s26 + $0x7c] sm:$0xff]   ;;  %v4517_v17 = vld [vmem:[%s4721_s26 + $0x84] sm:$0xff]   ;;  %v4519_v19 = vld [vmem:[%s4721_s26 + $0x8c] sm:$0xff]   ;;  %1852 = vst.msk [vmem:[%s4726_s29] sm:$0xf] %vm551_vm3, %v4657_v54 }
  0x21   : > { %4016 = vmatprep.mubr.msk.bf16.mxu0 %vm4656_vm1, %v4655_v6  ;;  %4072 = vmatprep.mubr.msk.bf16.mxu1 %vm4656_vm1, %v4655_v6  ;;  %v4520_v20 = vld [vmem:[%s4721_s26 + $0x30] sm:$0xff]   ;;  %v4522_v22 = vld [vmem:[%s4721_s26 + $0x38] sm:$0xff]   ;;  %v4524_v24 = vld [vmem:[%s4721_s26 + $0x40] sm:$0xff]   ;;  %1853 = vst.msk [vmem:[%s4726_s29 + $0x4] sm:$0xf] %vm551_vm3, %v4657_v54 }
  0x22   : > { %v4521_v21 = vld [vmem:[%s4721_s26 + $0x94] sm:$0xff]   ;;  %v4523_v23 = vld [vmem:[%s4721_s26 + $0x9c] sm:$0xff]   ;;  %v4525_v25 = vld [vmem:[%s4721_s26 + $0xa4] sm:$0xff]   ;;  %1854 = vst.msk [vmem:[%s4726_s29 + $0x8] sm:$0xf] %vm551_vm3, %v4657_v54 }
  0x23   : > { %4015 = vmatpush3.bf16.msra.mxu0 %v3490_v7  ;;  %4071 = vmatpush3.bf16.msra.mxu1 %v3490_v7  ;;  %v4526_v26 = vld [vmem:[%s4721_s26 + $0x48] sm:$0xff]   ;;  %v4528_v28 = vld [vmem:[%s4721_s26 + $0x50] sm:$0xff]   ;;  %v4530_v30 = vld [vmem:[%s4721_s26 + $0x58] sm:$0xff]   ;;  %1855 = vst.msk [vmem:[%s4726_s29 + $0xc] sm:$0xf] %vm551_vm3, %v4657_v54 }
  0x24   : > { %4124 = vmatprep.subr.bf16.mxu0 %v4655_v6  ;;  %4180 = vmatprep.subr.bf16.mxu1 %v4655_v6  ;;  %v4527_v27 = vld [vmem:[%s4721_s26 + $0xac] sm:$0xff]   ;;  %v4529_v29 = vld [vmem:[%s4721_s26 + $0xb4] sm:$0xff]   ;;  %v4531_v31 = vld [vmem:[%s4721_s26 + $0xbc] sm:$0xff]   ;;  %1856 = vst.msk [vmem:[%s4726_s29 + $0x10] sm:$0xf] %vm551_vm3, %v4657_v54 }
  0x25   : > { %v4532_v32 = vld [vmem:[%s4721_s26 + $0x60] ss:$0 sps:$4 sm:$0x33]   ;;  %v4533_v33 = vld [vmem:[%s4721_s26 + $0xc4] ss:$0 sps:$4 sm:$0x33]  }
  0x26   : > { %4017 = vmatmul.mubr.msk.bf16.vlgmr.msra.gmra.mxu0 %vm327_vm2, %v4508_v8  ;;  %4073 = vmatmul.mubr.msk.bf16.vlgmr.msra.gmra.mxu1 %vm327_vm2, %v4509_v9  ;;  %v4534_v34 = vld [vmem:[%s4721_s26 + $0xc8] sm:$0xff]   ;;  %v4536_v36 = vld [vmem:[%s4721_s26 + $0xd0] sm:$0xff]   ;;  %v4538_v38 = vld [vmem:[%s4721_s26 + $0xd8] sm:$0xff]   ;;  %1857 = vst.msk [vmem:[%s4726_s29 + $0x14] sm:$0xf] %vm551_vm3, %v4657_v54 }
  0x27   : > { %4125 = vmatpush3.bf16.msra.mxu0 %v3491_v5  ;;  %4181 = vmatpush3.bf16.msra.mxu1 %v3491_v5  ;;  %v4535_v35 = vld [vmem:[%s4721_s26 + $0x12c] sm:$0xff]   ;;  %v4537_v37 = vld [vmem:[%s4721_s26 + $0x134] sm:$0xff]   ;;  %v4539_v39 = vld [vmem:[%s4721_s26 + $0x13c] sm:$0xff]   ;;  %1858 = vst.msk [vmem:[%s4726_s29 + $0x18] sm:$0xf] %vm551_vm3, %v4657_v54 }
  0x28   : > { %4020 = vmatprep.mubr.msk.bf16.mxu0 %vm4656_vm1, %v4655_v6  ;;  %4076 = vmatprep.mubr.msk.bf16.mxu1 %vm4656_vm1, %v4655_v6  ;;  %v4540_v40 = vld [vmem:[%s4721_s26 + $0xe0] sm:$0xff]   ;;  %v4542_v42 = vld [vmem:[%s4721_s26 + $0xe8] sm:$0xff]   ;;  %v4544_v44 = vld [vmem:[%s4721_s26 + $0xf0] sm:$0xff]   ;;  %1859 = vst.msk [vmem:[%s4726_s29 + $0x1c] sm:$0xf] %vm551_vm3, %v4657_v54 }
  0x29   : > { %4126 = vmatprep.subr.bf16.mxu0 %v4655_v6  ;;  %4182 = vmatprep.subr.bf16.mxu1 %v4655_v6  ;;  %v4541_v41 = vld [vmem:[%s4721_s26 + $0x144] sm:$0xff]   ;;  %v4543_v43 = vld [vmem:[%s4721_s26 + $0x14c] sm:$0xff]   ;;  %v4545_v45 = vld [vmem:[%s4721_s26 + $0x154] sm:$0xff]   ;;  %1860 = vst.msk [vmem:[%s4726_s29 + $0x20] sm:$0xf] %vm551_vm3, %v4657_v54 }
  0x2a   : > { %v4546_v46 = vld [vmem:[%s4721_s26 + $0xf8] sm:$0xff]   ;;  %v4548_v48 = vld [vmem:[%s4721_s26 + $0x100] sm:$0xff]   ;;  %v4550_v50 = vld [vmem:[%s4721_s26 + $0x108] sm:$0xff]   ;;  %1861 = vst.msk [vmem:[%s4726_s29 + $0x24] sm:$0xf] %vm551_vm3, %v4657_v54 }
  0x2b   : > { %4127 = vmatpush3.bf16.msra.mxu0 %v3490_v7  ;;  %4183 = vmatpush3.bf16.msra.mxu1 %v3490_v7  ;;  %v4547_v47 = vld [vmem:[%s4721_s26 + $0x15c] sm:$0xff]   ;;  %v4549_v49 = vld [vmem:[%s4721_s26 + $0x164] sm:$0xff]   ;;  %v4551_v51 = vld [vmem:[%s4721_s26 + $0x16c] sm:$0xff]   ;;  %1862 = vst.msk [vmem:[%s4726_s29 + $0x28] sm:$0xf] %vm551_vm3, %v4657_v54 }
  0x2c   : > { %v4552_v52 = vld [vmem:[%s4721_s26 + $0x110] sm:$0xff]   ;;  %1863 = vst.msk [vmem:[%s4726_s29 + $0x2c] sm:$0xf] %vm551_vm3, %v4657_v54  ;;  %1864 = vst.msk [vmem:[%s4726_s29 + $0x30] sm:$0xf] %vm551_vm3, %v4657_v54  ;;  %v4554_v55 = vld [vmem:[%s4721_s26 + $0x118] sm:$0xff]  }
  0x2d   : > { %v4553_v53 = vld [vmem:[%s4721_s26 + $0x174] sm:$0xff]   ;;  %1865 = vst.msk [vmem:[%s4726_s29 + $0x34] sm:$0xf] %vm551_vm3, %v4657_v54  ;;  %1866 = vst.msk [vmem:[%s4726_s29 + $0x38] sm:$0xf] %vm551_vm3, %v4657_v54  ;;  %v4555_v56 = vld [vmem:[%s4721_s26 + $0x17c] sm:$0xff]  }
  0x2e   : > { %4021 = vmatmul.mubr.msk.bf16.gmra.mxu0 %vm327_vm2, %v4510_v10  ;;  %4077 = vmatmul.mubr.msk.bf16.gmra.mxu1 %vm327_vm2, %v4511_v11  ;;  %1867 = vst.msk [vmem:[%s4726_s29 + $0x3c] sm:$0xf] %vm551_vm3, %v4657_v54  ;;  %1868 = vst.msk [vmem:[%s4726_s29 + $0x40] sm:$0xf] %vm551_vm3, %v4657_v54  ;;  %v4556_v57 = vld [vmem:[%s4721_s26 + $0x120] sm:$0xff]  }
  0x2f   : > { %4024 = vmatprep.mubr.msk.bf16.mxu0 %vm4656_vm1, %v4655_v6  ;;  %4080 = vmatprep.mubr.msk.bf16.mxu1 %vm4656_vm1, %v4655_v6  ;;  %1869 = vst.msk [vmem:[%s4726_s29 + $0x44] sm:$0xf] %vm551_vm3, %v4657_v54  ;;  %1870 = vst.msk [vmem:[%s4726_s29 + $0x48] sm:$0xf] %vm551_vm3, %v4657_v54  ;;  %v4557_v58 = vld [vmem:[%s4721_s26 + $0x184] sm:$0xff]  }
  0x30   : > { %1871 = vst.msk [vmem:[%s4726_s29 + $0x4c] sm:$0xf] %vm551_vm3, %v4657_v54  ;;  %1872 = vst.msk [vmem:[%s4726_s29 + $0x50] sm:$0xf] %vm551_vm3, %v4657_v54 }
  0x31   : > { %1873 = vst.msk [vmem:[%s4726_s29 + $0x54] sm:$0xf] %vm551_vm3, %v4657_v54  ;;  %1874 = vst.msk [vmem:[%s4726_s29 + $0x58] sm:$0xf] %vm551_vm3, %v4657_v54 }
  0x32   : > { %1875 = vst.msk [vmem:[%s4726_s29 + $0x5c] sm:$0xf] %vm551_vm3, %v4657_v54  ;;  %v4558_v5 = vld [vmem:[%s4721_s26 + $0x128] ss:$0 sps:$4 sm:$0x33]  }
  0x33   : > { %1877 = vst.msk [vmem:[%s4726_s29 + $0x60] sm:$0x3] %vm1876_vm4, %v4657_v54  ;;  %v4559_v11 = vld [vmem:[%s4721_s26 + $0x18c] ss:$0 sps:$4 sm:$0x33]  }
  0x36   : > { %4025 = vmatmul.mubr.msk.bf16.gmra.mxu0 %vm327_vm2, %v4512_v12  ;;  %4081 = vmatmul.mubr.msk.bf16.gmra.mxu1 %vm327_vm2, %v4513_v13 }
  0x37   : > { %4028 = vmatprep.mubr.msk.bf16.mxu0 %vm4656_vm1, %v4655_v6  ;;  %4084 = vmatprep.mubr.msk.bf16.mxu1 %vm4656_vm1, %v4655_v6 }
  0x3e   : > { %4029 = vmatmul.mubr.msk.bf16.gmra.mxu0 %vm327_vm2, %v4514_v14  ;;  %4085 = vmatmul.mubr.msk.bf16.gmra.mxu1 %vm327_vm2, %v4515_v15 }
  0x3f   : > { %4032 = vmatprep.mubr.msk.bf16.mxu0 %vm4656_vm1, %v4655_v6  ;;  %4088 = vmatprep.mubr.msk.bf16.mxu1 %vm4656_vm1, %v4655_v6 }
  0x46   : > { %4033 = vmatmul.mubr.msk.bf16.gmra.mxu0 %vm327_vm2, %v4516_v16  ;;  %4089 = vmatmul.mubr.msk.bf16.gmra.mxu1 %vm327_vm2, %v4517_v17 }
  0x47   : > { %4036 = vmatprep.mubr.msk.bf16.mxu0 %vm4656_vm1, %v4655_v6  ;;  %4092 = vmatprep.mubr.msk.bf16.mxu1 %vm4656_vm1, %v4655_v6 }
  0x4e   : > { %4037 = vmatmul.mubr.msk.bf16.gmra.mxu0 %vm327_vm2, %v4518_v18  ;;  %4093 = vmatmul.mubr.msk.bf16.gmra.mxu1 %vm327_vm2, %v4519_v19 }
  0x4f   : > { %4040 = vmatprep.mubr.msk.bf16.mxu0 %vm4656_vm1, %v4655_v6  ;;  %4096 = vmatprep.mubr.msk.bf16.mxu1 %vm4656_vm1, %v4655_v6 }
  0x56   : > { %4041 = vmatmul.mubr.msk.bf16.gmra.mxu0 %vm327_vm2, %v4520_v20  ;;  %4097 = vmatmul.mubr.msk.bf16.gmra.mxu1 %vm327_vm2, %v4521_v21 }
  0x57   : > { %4044 = vmatprep.mubr.msk.bf16.mxu0 %vm4656_vm1, %v4655_v6  ;;  %4100 = vmatprep.mubr.msk.bf16.mxu1 %vm4656_vm1, %v4655_v6 }
  0x5e   : > { %4045 = vmatmul.mubr.msk.bf16.gmra.mxu0 %vm327_vm2, %v4522_v22  ;;  %4101 = vmatmul.mubr.msk.bf16.gmra.mxu1 %vm327_vm2, %v4523_v23 }
  0x5f   : > { %4048 = vmatprep.mubr.msk.bf16.mxu0 %vm4656_vm1, %v4655_v6  ;;  %4104 = vmatprep.mubr.msk.bf16.mxu1 %vm4656_vm1, %v4655_v6 }
  0x66   : > { %4049 = vmatmul.mubr.msk.bf16.gmra.mxu0 %vm327_vm2, %v4524_v24  ;;  %4105 = vmatmul.mubr.msk.bf16.gmra.mxu1 %vm327_vm2, %v4525_v25 }
  0x67   : > { %4052 = vmatprep.mubr.msk.bf16.mxu0 %vm4656_vm1, %v4655_v6  ;;  %4108 = vmatprep.mubr.msk.bf16.mxu1 %vm4656_vm1, %v4655_v6 }
  0x6e   : > { %4053 = vmatmul.mubr.msk.bf16.gmra.mxu0 %vm327_vm2, %v4526_v26  ;;  %4109 = vmatmul.mubr.msk.bf16.gmra.mxu1 %vm327_vm2, %v4527_v27 }
  0x6f   : > { %4056 = vmatprep.mubr.msk.bf16.mxu0 %vm4656_vm1, %v4655_v6  ;;  %4112 = vmatprep.mubr.msk.bf16.mxu1 %vm4656_vm1, %v4655_v6 }
  0x76   : > { %4057 = vmatmul.mubr.msk.bf16.gmra.mxu0 %vm327_vm2, %v4528_v28  ;;  %4113 = vmatmul.mubr.msk.bf16.gmra.mxu1 %vm327_vm2, %v4529_v29 }
  0x77   : > { %4060 = vmatprep.mubr.msk.bf16.mxu0 %vm4656_vm1, %v4655_v6  ;;  %4116 = vmatprep.mubr.msk.bf16.mxu1 %vm4656_vm1, %v4655_v6 }
  0x7e   : > { %4061 = vmatmul.mubr.msk.bf16.gmra.mxu0 %vm327_vm2, %v4530_v30  ;;  %4117 = vmatmul.mubr.msk.bf16.gmra.mxu1 %vm327_vm2, %v4531_v31 }
  0x7f   : > { %4064 = vmatprep.mubr.msk.bf16.mxu0 %vm4656_vm1, %v4655_v6  ;;  %4120 = vmatprep.mubr.msk.bf16.mxu1 %vm4656_vm1, %v4655_v6 }
  0x86   : > { %4065 = vmatmul.mubr.msk.bf16.gmra.mxu0 %vm327_vm2, %v4532_v32  ;;  %4121 = vmatmul.mubr.msk.bf16.gmra.mxu1 %vm327_vm2, %v4533_v33 }
  0x87   : > { %4128 = vmatprep.mubr.msk.bf16.mxu0 %vm4656_vm1, %v4655_v6  ;;  %4184 = vmatprep.mubr.msk.bf16.mxu1 %vm4656_vm1, %v4655_v6 }
  0x8e   : > { %4129 = vmatmul.mubr.msk.bf16.vlgmr.msra.gmra.mxu0 %vm327_vm2, %v4534_v34  ;;  %4185 = vmatmul.mubr.msk.bf16.vlgmr.msra.gmra.mxu1 %vm327_vm2, %v4535_v35 }
  0x8f   : > { %4132 = vmatprep.mubr.msk.bf16.mxu0 %vm4656_vm1, %v4655_v6  ;;  %4188 = vmatprep.mubr.msk.bf16.mxu1 %vm4656_vm1, %v4655_v6 }
  0x96   : > { %4133 = vmatmul.mubr.msk.bf16.gmra.mxu0 %vm327_vm2, %v4536_v36  ;;  %4189 = vmatmul.mubr.msk.bf16.gmra.mxu1 %vm327_vm2, %v4537_v37 }
  0x97   : > { %4136 = vmatprep.mubr.msk.bf16.mxu0 %vm4656_vm1, %v4655_v6  ;;  %4192 = vmatprep.mubr.msk.bf16.mxu1 %vm4656_vm1, %v4655_v6 }
  0x9e   : > { %4137 = vmatmul.mubr.msk.bf16.gmra.mxu0 %vm327_vm2, %v4538_v38  ;;  %4193 = vmatmul.mubr.msk.bf16.gmra.mxu1 %vm327_vm2, %v4539_v39 }
  0x9f   : > { %4140 = vmatprep.mubr.msk.bf16.mxu0 %vm4656_vm1, %v4655_v6  ;;  %4196 = vmatprep.mubr.msk.bf16.mxu1 %vm4656_vm1, %v4655_v6 }
  0xa6   : > { %4141 = vmatmul.mubr.msk.bf16.gmra.mxu0 %vm327_vm2, %v4540_v40  ;;  %4197 = vmatmul.mubr.msk.bf16.gmra.mxu1 %vm327_vm2, %v4541_v41 }
  0xa7   : > { %4144 = vmatprep.mubr.msk.bf16.mxu0 %vm4656_vm1, %v4655_v6  ;;  %4200 = vmatprep.mubr.msk.bf16.mxu1 %vm4656_vm1, %v4655_v6 }
  0xae   : > { %4145 = vmatmul.mubr.msk.bf16.gmra.mxu0 %vm327_vm2, %v4542_v42  ;;  %4201 = vmatmul.mubr.msk.bf16.gmra.mxu1 %vm327_vm2, %v4543_v43 }
  0xaf   : > { %4148 = vmatprep.mubr.msk.bf16.mxu0 %vm4656_vm1, %v4655_v6  ;;  %4204 = vmatprep.mubr.msk.bf16.mxu1 %vm4656_vm1, %v4655_v6 }
  0xb6   : > { %4149 = vmatmul.mubr.msk.bf16.gmra.mxu0 %vm327_vm2, %v4544_v44  ;;  %4205 = vmatmul.mubr.msk.bf16.gmra.mxu1 %vm327_vm2, %v4545_v45 }
  0xb7   : > { %4152 = vmatprep.mubr.msk.bf16.mxu0 %vm4656_vm1, %v4655_v6  ;;  %4208 = vmatprep.mubr.msk.bf16.mxu1 %vm4656_vm1, %v4655_v6 }
  0xbe   : > { %4153 = vmatmul.mubr.msk.bf16.gmra.mxu0 %vm327_vm2, %v4546_v46  ;;  %4209 = vmatmul.mubr.msk.bf16.gmra.mxu1 %vm327_vm2, %v4547_v47 }
  0xbf   : > { %4156 = vmatprep.mubr.msk.bf16.mxu0 %vm4656_vm1, %v4655_v6  ;;  %4212 = vmatprep.mubr.msk.bf16.mxu1 %vm4656_vm1, %v4655_v6 }
  0xc6   : > { %4157 = vmatmul.mubr.msk.bf16.gmra.mxu0 %vm327_vm2, %v4548_v48  ;;  %4213 = vmatmul.mubr.msk.bf16.gmra.mxu1 %vm327_vm2, %v4549_v49 }
  0xc7   : > { %4160 = vmatprep.mubr.msk.bf16.mxu0 %vm4656_vm1, %v4655_v6  ;;  %4216 = vmatprep.mubr.msk.bf16.mxu1 %vm4656_vm1, %v4655_v6 }
  0xce   : > { %4161 = vmatmul.mubr.msk.bf16.gmra.mxu0 %vm327_vm2, %v4550_v50  ;;  %4217 = vmatmul.mubr.msk.bf16.gmra.mxu1 %vm327_vm2, %v4551_v51 }
  0xcf   : > { %4164 = vmatprep.mubr.msk.bf16.mxu0 %vm4656_vm1, %v4655_v6  ;;  %4220 = vmatprep.mubr.msk.bf16.mxu1 %vm4656_vm1, %v4655_v6 }
  0xd6   : > { %4165 = vmatmul.mubr.msk.bf16.gmra.mxu0 %vm327_vm2, %v4552_v52  ;;  %4221 = vmatmul.mubr.msk.bf16.gmra.mxu1 %vm327_vm2, %v4553_v53 }
  0xd7   : > { %4168 = vmatprep.mubr.msk.bf16.mxu0 %vm4656_vm1, %v4655_v6  ;;  %4224 = vmatprep.mubr.msk.bf16.mxu1 %vm4656_vm1, %v4655_v6 }
  0xde   : > { %4169 = vmatmul.mubr.msk.bf16.gmra.mxu0 %vm327_vm2, %v4554_v55  ;;  %4225 = vmatmul.mubr.msk.bf16.gmra.mxu1 %vm327_vm2, %v4555_v56 }
  0xdf   : > { %4172 = vmatprep.mubr.msk.bf16.mxu0 %vm4656_vm1, %v4655_v6  ;;  %4228 = vmatprep.mubr.msk.bf16.mxu1 %vm4656_vm1, %v4655_v6 }
  0xe6   : > { %v401_v59 = vpop.f32.mrf.mxu0  ;;  %v804_v60 = vpop.f32.mrf.mxu1  ;;  %4173 = vmatmul.mubr.msk.bf16.gmra.mxu0 %vm327_vm2, %v4556_v57  ;;  %4229 = vmatmul.mubr.msk.bf16.gmra.mxu1 %vm327_vm2, %v4557_v58 }
  0xe7   : > { %4176 = vmatprep.mubr.msk.bf16.mxu0 %vm4656_vm1, %v4655_v6  ;;  %4232 = vmatprep.mubr.msk.bf16.mxu1 %vm4656_vm1, %v4655_v6  ;;  %v561_v63 = vmul.f32 %v401_v59, %v401_v59  ;;  %v962_v0 = vmul.f32 %v804_v60, %v804_v60  ;;  %v504_v7 = vsel %vm503_vm5, %v401_v59, 0.0  ;;  %v906_v8 = vsel %vm503_vm5, %v804_v60, 0.0 }
  0xe8   : > { %v4018_v61 = vpop.f32.mrf.mxu0  ;;  %v4074_v62 = vpop.f32.mrf.mxu1 }
  0xe9   : > { %v586_v19 = vsel %vm503_vm5, %v561_v63, 0.0  ;;  %v987_v20 = vsel %vm503_vm5, %v962_v0, 0.0 }
  0xea   : > { %v404_v9 = vpop.f32.mrf.mxu0  ;;  %v807_v10 = vpop.f32.mrf.mxu1 }
  0xeb   : > { %v505_v12 = vsel %vm503_vm5, %v404_v9, 0.0  ;;  %v562_v13 = vmul.f32 %v404_v9, %v404_v9  ;;  %v907_v14 = vsel %vm503_vm5, %v807_v10, 0.0  ;;  %v963_v15 = vmul.f32 %v807_v10, %v807_v10 }
  0xec   : > { %v506_v16 = vadd.f32 %v505_v12, %v504_v7  ;;  %v908_v6 = vadd.f32 %v907_v14, %v906_v8  ;;  %v4019_v17 = vpop.f32.mrf.mxu0  ;;  %v4075_v18 = vpop.f32.mrf.mxu1 }
  0xed   : > { %v587_v21 = vsel %vm503_vm5, %v562_v13, 0.0  ;;  %v988_v22 = vsel %vm503_vm5, %v963_v15, 0.0 }
  0xee   : > { %v588_v23 = vadd.f32 %v587_v21, %v586_v19  ;;  %v989_v24 = vadd.f32 %v988_v22, %v987_v20  ;;  %v409_v25 = vpop.f32.mrf.mxu0  ;;  %v812_v26 = vpop.f32.mrf.mxu1  ;;  %4177 = vmatmul.mubr.msk.bf16.gmra.mxu0 %vm327_vm2, %v4558_v5  ;;  %4233 = vmatmul.mubr.msk.bf16.gmra.mxu1 %vm327_vm2, %v4559_v11 }
  0xef   : > { %v507_v27 = vsel %vm503_vm5, %v409_v25, 0.0  ;;  %v563_v28 = vmul.f32 %v409_v25, %v409_v25  ;;  %v909_v29 = vsel %vm503_vm5, %v812_v26, 0.0  ;;  %v964_v30 = vmul.f32 %v812_v26, %v812_v26 }
  0xf0   : > { %v508_v31 = vadd.f32 %v507_v27, %v506_v16  ;;  %v910_v32 = vadd.f32 %v909_v29, %v908_v6  ;;  %v4022_v33 = vpop.f32.mrf.mxu0  ;;  %v4078_v34 = vpop.f32.mrf.mxu1 }
  0xf1   : > { %v589_v35 = vsel %vm503_vm5, %v563_v28, 0.0  ;;  %v990_v36 = vsel %vm503_vm5, %v964_v30, 0.0 }
  0xf2   : > { %v590_v37 = vadd.f32 %v589_v35, %v588_v23  ;;  %v991_v38 = vadd.f32 %v990_v36, %v989_v24  ;;  %v412_v39 = vpop.f32.mrf.mxu0  ;;  %v815_v40 = vpop.f32.mrf.mxu1 }
  0xf3   : > { %v509_v41 = vsel %vm503_vm5, %v412_v39, 0.0  ;;  %v564_v42 = vmul.f32 %v412_v39, %v412_v39  ;;  %v911_v43 = vsel %vm503_vm5, %v815_v40, 0.0  ;;  %v965_v44 = vmul.f32 %v815_v40, %v815_v40 }
  0xf4   : > { %v510_v45 = vadd.f32 %v509_v41, %v508_v31  ;;  %v912_v46 = vadd.f32 %v911_v43, %v910_v32  ;;  %v4023_v47 = vpop.f32.mrf.mxu0  ;;  %v4079_v48 = vpop.f32.mrf.mxu1 }
  0xf5   : > { %v591_v49 = vsel %vm503_vm5, %v564_v42, 0.0  ;;  %v992_v50 = vsel %vm503_vm5, %v965_v44, 0.0 }
  0xf6   : > { %v592_v51 = vadd.f32 %v591_v49, %v590_v37  ;;  %v993_v52 = vadd.f32 %v992_v50, %v991_v38  ;;  %v417_v53 = vpop.f32.mrf.mxu0  ;;  %v820_v54 = vpop.f32.mrf.mxu1 }
  0xf7   : > { %v511_v55 = vsel %vm503_vm5, %v417_v53, 0.0  ;;  %v565_v56 = vmul.f32 %v417_v53, %v417_v53  ;;  %v913_v57 = vsel %vm503_vm5, %v820_v54, 0.0  ;;  %v966_v58 = vmul.f32 %v820_v54, %v820_v54 }
  0xf8   : > { %v512_v59 = vadd.f32 %v511_v55, %v510_v45  ;;  %v914_v60 = vadd.f32 %v913_v57, %v912_v46  ;;  %v4026_v61 = vpop.f32.mrf.mxu0  ;;  %v4082_v62 = vpop.f32.mrf.mxu1 }
  0xf9   : > { %v593_v63 = vsel %vm503_vm5, %v565_v56, 0.0  ;;  %v994_v0 = vsel %vm503_vm5, %v966_v58, 0.0 }
  0xfa   : > { %v594_v5 = vadd.f32 %v593_v63, %v592_v51  ;;  %v995_v7 = vadd.f32 %v994_v0, %v993_v52  ;;  %v420_v8 = vpop.f32.mrf.mxu0  ;;  %v823_v9 = vpop.f32.mrf.mxu1 }
  0xfb   : > { %v513_v10 = vsel %vm503_vm5, %v420_v8, 0.0  ;;  %v566_v11 = vmul.f32 %v420_v8, %v420_v8  ;;  %v915_v12 = vsel %vm503_vm5, %v823_v9, 0.0  ;;  %v967_v13 = vmul.f32 %v823_v9, %v823_v9 }
  0xfc   : > { %v514_v14 = vadd.f32 %v513_v10, %v512_v59  ;;  %v916_v15 = vadd.f32 %v915_v12, %v914_v60  ;;  %v4027_v16 = vpop.f32.mrf.mxu0  ;;  %v4083_v6 = vpop.f32.mrf.mxu1 }
  0xfd   : > { %v595_v17 = vsel %vm503_vm5, %v566_v11, 0.0  ;;  %v996_v18 = vsel %vm503_vm5, %v967_v13, 0.0 }
  0xfe   : > { %v596_v19 = vadd.f32 %v595_v17, %v594_v5  ;;  %v997_v20 = vadd.f32 %v996_v18, %v995_v7  ;;  %v425_v21 = vpop.f32.mrf.mxu0  ;;  %v828_v22 = vpop.f32.mrf.mxu1 }
  0xff   : > { %v515_v23 = vsel %vm503_vm5, %v425_v21, 0.0  ;;  %v567_v24 = vmul.f32 %v425_v21, %v425_v21  ;;  %v917_v25 = vsel %vm503_vm5, %v828_v22, 0.0  ;;  %v968_v26 = vmul.f32 %v828_v22, %v828_v22 }
 0x100   : > { %v516_v27 = vadd.f32 %v515_v23, %v514_v14  ;;  %v918_v28 = vadd.f32 %v917_v25, %v916_v15  ;;  %v4030_v29 = vpop.f32.mrf.mxu0  ;;  %v4086_v30 = vpop.f32.mrf.mxu1 }
 0x101   : > { %v597_v31 = vsel %vm503_vm5, %v567_v24, 0.0  ;;  %v998_v32 = vsel %vm503_vm5, %v968_v26, 0.0 }
 0x102   : > { %v598_v33 = vadd.f32 %v597_v31, %v596_v19  ;;  %v999_v34 = vadd.f32 %v998_v32, %v997_v20  ;;  %v428_v35 = vpop.f32.mrf.mxu0  ;;  %v831_v36 = vpop.f32.mrf.mxu1 }
 0x103   : > { %v517_v37 = vsel %vm503_vm5, %v428_v35, 0.0  ;;  %v568_v38 = vmul.f32 %v428_v35, %v428_v35  ;;  %v919_v39 = vsel %vm503_vm5, %v831_v36, 0.0  ;;  %v969_v40 = vmul.f32 %v831_v36, %v831_v36 }
 0x104   : > { %v518_v41 = vadd.f32 %v517_v37, %v516_v27  ;;  %v920_v42 = vadd.f32 %v919_v39, %v918_v28  ;;  %v4031_v43 = vpop.f32.mrf.mxu0  ;;  %v4087_v44 = vpop.f32.mrf.mxu1 }
 0x105   : > { %v599_v45 = vsel %vm503_vm5, %v568_v38, 0.0  ;;  %v1000_v46 = vsel %vm503_vm5, %v969_v40, 0.0 }
 0x106   : > { %v600_v47 = vadd.f32 %v599_v45, %v598_v33  ;;  %v1001_v48 = vadd.f32 %v1000_v46, %v999_v34  ;;  %v433_v49 = vpop.f32.mrf.mxu0  ;;  %v836_v50 = vpop.f32.mrf.mxu1 }
 0x107   : > { %v519_v51 = vsel %vm503_vm5, %v433_v49, 0.0  ;;  %v569_v52 = vmul.f32 %v433_v49, %v433_v49  ;;  %v921_v53 = vsel %vm503_vm5, %v836_v50, 0.0  ;;  %v970_v54 = vmul.f32 %v836_v50, %v836_v50 }
 0x108   : > { %v520_v55 = vadd.f32 %v519_v51, %v518_v41  ;;  %v922_v56 = vadd.f32 %v921_v53, %v920_v42  ;;  %v4034_v57 = vpop.f32.mrf.mxu0  ;;  %v4090_v58 = vpop.f32.mrf.mxu1 }
 0x109   : > { %v601_v59 = vsel %vm503_vm5, %v569_v52, 0.0  ;;  %v1002_v60 = vsel %vm503_vm5, %v970_v54, 0.0 }
 0x10a   : > { %v602_v61 = vadd.f32 %v601_v59, %v600_v47  ;;  %v1003_v62 = vadd.f32 %v1002_v60, %v1001_v48  ;;  %v436_v63 = vpop.f32.mrf.mxu0  ;;  %v839_v0 = vpop.f32.mrf.mxu1 }
 0x10b   : > { %v521_v5 = vsel %vm503_vm5, %v436_v63, 0.0  ;;  %v570_v7 = vmul.f32 %v436_v63, %v436_v63  ;;  %v923_v8 = vsel %vm503_vm5, %v839_v0, 0.0  ;;  %v971_v9 = vmul.f32 %v839_v0, %v839_v0 }
 0x10c   : > { %v522_v10 = vadd.f32 %v521_v5, %v520_v55  ;;  %v924_v11 = vadd.f32 %v923_v8, %v922_v56  ;;  %v4035_v12 = vpop.f32.mrf.mxu0  ;;  %v4091_v13 = vpop.f32.mrf.mxu1 }
 0x10d   : > { %v603_v14 = vsel %vm503_vm5, %v570_v7, 0.0  ;;  %v1004_v15 = vsel %vm503_vm5, %v971_v9, 0.0 }
 0x10e   : > { %v604_v16 = vadd.f32 %v603_v14, %v602_v61  ;;  %v1005_v6 = vadd.f32 %v1004_v15, %v1003_v62  ;;  %v441_v17 = vpop.f32.mrf.mxu0  ;;  %v844_v18 = vpop.f32.mrf.mxu1 }
 0x10f   : > { %v523_v19 = vsel %vm503_vm5, %v441_v17, 0.0  ;;  %v571_v20 = vmul.f32 %v441_v17, %v441_v17  ;;  %v925_v21 = vsel %vm503_vm5, %v844_v18, 0.0  ;;  %v972_v22 = vmul.f32 %v844_v18, %v844_v18 }
 0x110   : > { %v524_v23 = vadd.f32 %v523_v19, %v522_v10  ;;  %v926_v24 = vadd.f32 %v925_v21, %v924_v11  ;;  %v4038_v25 = vpop.f32.mrf.mxu0  ;;  %v4094_v26 = vpop.f32.mrf.mxu1 }
 0x111   : > { %v605_v27 = vsel %vm503_vm5, %v571_v20, 0.0  ;;  %v1006_v28 = vsel %vm503_vm5, %v972_v22, 0.0 }
 0x112   : > { %v606_v29 = vadd.f32 %v605_v27, %v604_v16  ;;  %v1007_v30 = vadd.f32 %v1006_v28, %v1005_v6  ;;  %v444_v31 = vpop.f32.mrf.mxu0  ;;  %v847_v32 = vpop.f32.mrf.mxu1 }
 0x113   : > { %v525_v33 = vsel %vm503_vm5, %v444_v31, 0.0  ;;  %v572_v34 = vmul.f32 %v444_v31, %v444_v31  ;;  %v927_v35 = vsel %vm503_vm5, %v847_v32, 0.0  ;;  %v973_v36 = vmul.f32 %v847_v32, %v847_v32 }
 0x114   : > { %v526_v37 = vadd.f32 %v525_v33, %v524_v23  ;;  %v928_v38 = vadd.f32 %v927_v35, %v926_v24  ;;  %v4039_v39 = vpop.f32.mrf.mxu0  ;;  %v4095_v40 = vpop.f32.mrf.mxu1 }
 0x115   : > { %v607_v41 = vsel %vm503_vm5, %v572_v34, 0.0  ;;  %v1008_v42 = vsel %vm503_vm5, %v973_v36, 0.0 }
 0x116   : > { %v608_v43 = vadd.f32 %v607_v41, %v606_v29  ;;  %v1009_v44 = vadd.f32 %v1008_v42, %v1007_v30  ;;  %v449_v45 = vpop.f32.mrf.mxu0  ;;  %v852_v46 = vpop.f32.mrf.mxu1 }
 0x117   : > { %v527_v47 = vsel %vm503_vm5, %v449_v45, 0.0  ;;  %v573_v48 = vmul.f32 %v449_v45, %v449_v45  ;;  %v929_v49 = vsel %vm503_vm5, %v852_v46, 0.0  ;;  %v974_v50 = vmul.f32 %v852_v46, %v852_v46 }
 0x118   : > { %v528_v51 = vadd.f32 %v527_v47, %v526_v37  ;;  %v930_v52 = vadd.f32 %v929_v49, %v928_v38  ;;  %v4042_v53 = vpop.f32.mrf.mxu0  ;;  %v4098_v54 = vpop.f32.mrf.mxu1 }
 0x119   : > { %v609_v55 = vsel %vm503_vm5, %v573_v48, 0.0  ;;  %v1010_v56 = vsel %vm503_vm5, %v974_v50, 0.0 }
 0x11a   : > { %v610_v57 = vadd.f32 %v609_v55, %v608_v43  ;;  %v1011_v58 = vadd.f32 %v1010_v56, %v1009_v44  ;;  %v452_v59 = vpop.f32.mrf.mxu0  ;;  %v855_v60 = vpop.f32.mrf.mxu1 }
 0x11b   : > { %v529_v61 = vsel %vm503_vm5, %v452_v59, 0.0  ;;  %v574_v62 = vmul.f32 %v452_v59, %v452_v59  ;;  %v931_v63 = vsel %vm503_vm5, %v855_v60, 0.0  ;;  %v975_v0 = vmul.f32 %v855_v60, %v855_v60 }
 0x11c   : > { %v530_v5 = vadd.f32 %v529_v61, %v528_v51  ;;  %v932_v7 = vadd.f32 %v931_v63, %v930_v52  ;;  %v4043_v8 = vpop.f32.mrf.mxu0  ;;  %v4099_v9 = vpop.f32.mrf.mxu1 }
 0x11d   : > { %v611_v10 = vsel %vm503_vm5, %v574_v62, 0.0  ;;  %v1012_v11 = vsel %vm503_vm5, %v975_v0, 0.0 }
 0x11e   : > { %v612_v12 = vadd.f32 %v611_v10, %v610_v57  ;;  %v1013_v13 = vadd.f32 %v1012_v11, %v1011_v58  ;;  %v457_v14 = vpop.f32.mrf.mxu0  ;;  %v860_v15 = vpop.f32.mrf.mxu1 }
 0x11f   : > { %v531_v16 = vsel %vm503_vm5, %v457_v14, 0.0  ;;  %v575_v6 = vmul.f32 %v457_v14, %v457_v14  ;;  %v933_v17 = vsel %vm503_vm5, %v860_v15, 0.0  ;;  %v976_v18 = vmul.f32 %v860_v15, %v860_v15 }
 0x120   : > { %v532_v19 = vadd.f32 %v531_v16, %v530_v5  ;;  %v934_v20 = vadd.f32 %v933_v17, %v932_v7  ;;  %v4046_v21 = vpop.f32.mrf.mxu0  ;;  %v4102_v22 = vpop.f32.mrf.mxu1 }
 0x121   : > { %v613_v23 = vsel %vm503_vm5, %v575_v6, 0.0  ;;  %v1014_v24 = vsel %vm503_vm5, %v976_v18, 0.0 }
 0x122   : > { %v614_v25 = vadd.f32 %v613_v23, %v612_v12  ;;  %v1015_v26 = vadd.f32 %v1014_v24, %v1013_v13  ;;  %v460_v27 = vpop.f32.mrf.mxu0  ;;  %v863_v28 = vpop.f32.mrf.mxu1 }
 0x123   : > { %v533_v29 = vsel %vm503_vm5, %v460_v27, 0.0  ;;  %v576_v30 = vmul.f32 %v460_v27, %v460_v27  ;;  %v935_v31 = vsel %vm503_vm5, %v863_v28, 0.0  ;;  %v977_v32 = vmul.f32 %v863_v28, %v863_v28 }
 0x124   : > { %v534_v33 = vadd.f32 %v533_v29, %v532_v19  ;;  %v936_v34 = vadd.f32 %v935_v31, %v934_v20  ;;  %v4047_v35 = vpop.f32.mrf.mxu0  ;;  %v4103_v36 = vpop.f32.mrf.mxu1 }
 0x125   : > { %v615_v37 = vsel %vm503_vm5, %v576_v30, 0.0  ;;  %v1016_v38 = vsel %vm503_vm5, %v977_v32, 0.0 }
 0x126   : > { %v616_v39 = vadd.f32 %v615_v37, %v614_v25  ;;  %v1017_v40 = vadd.f32 %v1016_v38, %v1015_v26  ;;  %v465_v41 = vpop.f32.mrf.mxu0  ;;  %v868_v42 = vpop.f32.mrf.mxu1 }
 0x127   : > { %v535_v43 = vsel %vm503_vm5, %v465_v41, 0.0  ;;  %v577_v44 = vmul.f32 %v465_v41, %v465_v41  ;;  %v937_v45 = vsel %vm503_vm5, %v868_v42, 0.0  ;;  %v978_v46 = vmul.f32 %v868_v42, %v868_v42 }
 0x128   : > { %v536_v47 = vadd.f32 %v535_v43, %v534_v33  ;;  %v938_v48 = vadd.f32 %v937_v45, %v936_v34  ;;  %v4050_v49 = vpop.f32.mrf.mxu0  ;;  %v4106_v50 = vpop.f32.mrf.mxu1 }
 0x129   : > { %v617_v51 = vsel %vm503_vm5, %v577_v44, 0.0  ;;  %v1018_v52 = vsel %vm503_vm5, %v978_v46, 0.0 }
 0x12a   : > { %v618_v53 = vadd.f32 %v617_v51, %v616_v39  ;;  %v1019_v54 = vadd.f32 %v1018_v52, %v1017_v40  ;;  %v468_v55 = vpop.f32.mrf.mxu0  ;;  %v871_v56 = vpop.f32.mrf.mxu1 }
 0x12b   : > { %v537_v57 = vsel %vm503_vm5, %v468_v55, 0.0  ;;  %v578_v58 = vmul.f32 %v468_v55, %v468_v55  ;;  %v939_v59 = vsel %vm503_vm5, %v871_v56, 0.0  ;;  %v979_v60 = vmul.f32 %v871_v56, %v871_v56 }
 0x12c   : > { %v538_v61 = vadd.f32 %v537_v57, %v536_v47  ;;  %v940_v62 = vadd.f32 %v939_v59, %v938_v48  ;;  %v4051_v63 = vpop.f32.mrf.mxu0  ;;  %v4107_v0 = vpop.f32.mrf.mxu1 }
 0x12d   : > { %v619_v5 = vsel %vm503_vm5, %v578_v58, 0.0  ;;  %v1020_v7 = vsel %vm503_vm5, %v979_v60, 0.0 }
 0x12e   : > { %v620_v8 = vadd.f32 %v619_v5, %v618_v53  ;;  %v1021_v9 = vadd.f32 %v1020_v7, %v1019_v54  ;;  %v473_v10 = vpop.f32.mrf.mxu0  ;;  %v876_v11 = vpop.f32.mrf.mxu1 }
 0x12f   : > { %v539_v12 = vsel %vm503_vm5, %v473_v10, 0.0  ;;  %v579_v13 = vmul.f32 %v473_v10, %v473_v10  ;;  %v941_v14 = vsel %vm503_vm5, %v876_v11, 0.0  ;;  %v980_v15 = vmul.f32 %v876_v11, %v876_v11 }
 0x130   : > { %v540_v16 = vadd.f32 %v539_v12, %v538_v61  ;;  %v942_v6 = vadd.f32 %v941_v14, %v940_v62  ;;  %v4054_v17 = vpop.f32.mrf.mxu0  ;;  %v4110_v18 = vpop.f32.mrf.mxu1 }
 0x131   : > { %v621_v19 = vsel %vm503_vm5, %v579_v13, 0.0  ;;  %v1022_v20 = vsel %vm503_vm5, %v980_v15, 0.0 }
 0x132   : > { %v622_v21 = vadd.f32 %v621_v19, %v620_v8  ;;  %v1023_v22 = vadd.f32 %v1022_v20, %v1021_v9  ;;  %v476_v23 = vpop.f32.mrf.mxu0  ;;  %v879_v24 = vpop.f32.mrf.mxu1 }
 0x133   : > { %v541_v25 = vsel %vm503_vm5, %v476_v23, 0.0  ;;  %v580_v26 = vmul.f32 %v476_v23, %v476_v23  ;;  %v943_v27 = vsel %vm503_vm5, %v879_v24, 0.0  ;;  %v981_v28 = vmul.f32 %v879_v24, %v879_v24 }
 0x134   : > { %v542_v29 = vadd.f32 %v541_v25, %v540_v16  ;;  %v944_v30 = vadd.f32 %v943_v27, %v942_v6  ;;  %v4055_v31 = vpop.f32.mrf.mxu0  ;;  %v4111_v32 = vpop.f32.mrf.mxu1 }
 0x135   : > { %v623_v33 = vsel %vm503_vm5, %v580_v26, 0.0  ;;  %v1024_v34 = vsel %vm503_vm5, %v981_v28, 0.0 }
 0x136   : > { %v624_v35 = vadd.f32 %v623_v33, %v622_v21  ;;  %v1025_v36 = vadd.f32 %v1024_v34, %v1023_v22  ;;  %v481_v37 = vpop.f32.mrf.mxu0  ;;  %v884_v38 = vpop.f32.mrf.mxu1 }
 0x137   : > { %v543_v39 = vsel %vm503_vm5, %v481_v37, 0.0  ;;  %v581_v40 = vmul.f32 %v481_v37, %v481_v37  ;;  %v945_v41 = vsel %vm503_vm5, %v884_v38, 0.0  ;;  %v982_v42 = vmul.f32 %v884_v38, %v884_v38 }
 0x138   : > { %v544_v43 = vadd.f32 %v543_v39, %v542_v29  ;;  %v946_v44 = vadd.f32 %v945_v41, %v944_v30  ;;  %v4058_v45 = vpop.f32.mrf.mxu0  ;;  %v4114_v46 = vpop.f32.mrf.mxu1 }
 0x139   : > { %v625_v47 = vsel %vm503_vm5, %v581_v40, 0.0  ;;  %v1026_v48 = vsel %vm503_vm5, %v982_v42, 0.0 }
 0x13a   : > { %v626_v49 = vadd.f32 %v625_v47, %v624_v35  ;;  %v1027_v50 = vadd.f32 %v1026_v48, %v1025_v36  ;;  %v484_v51 = vpop.f32.mrf.mxu0  ;;  %v887_v52 = vpop.f32.mrf.mxu1 }
 0x13b   : > { %v545_v53 = vsel %vm503_vm5, %v484_v51, 0.0  ;;  %v582_v54 = vmul.f32 %v484_v51, %v484_v51  ;;  %v947_v55 = vsel %vm503_vm5, %v887_v52, 0.0  ;;  %v983_v56 = vmul.f32 %v887_v52, %v887_v52 }
 0x13c   : > { %v546_v57 = vadd.f32 %v545_v53, %v544_v43  ;;  %v948_v58 = vadd.f32 %v947_v55, %v946_v44  ;;  %v4059_v59 = vpop.f32.mrf.mxu0  ;;  %v4115_v60 = vpop.f32.mrf.mxu1 }
 0x13d   : > { %v627_v61 = vsel %vm503_vm5, %v582_v54, 0.0  ;;  %v1028_v62 = vsel %vm503_vm5, %v983_v56, 0.0 }
 0x13e   : > { %v628_v63 = vadd.f32 %v627_v61, %v626_v49  ;;  %v1029_v0 = vadd.f32 %v1028_v62, %v1027_v50  ;;  %v489_v5 = vpop.f32.mrf.mxu0  ;;  %v892_v7 = vpop.f32.mrf.mxu1 }
 0x13f   : > { %v547_v8 = vsel %vm503_vm5, %v489_v5, 0.0  ;;  %v583_v9 = vmul.f32 %v489_v5, %v489_v5  ;;  %v949_v10 = vsel %vm503_vm5, %v892_v7, 0.0  ;;  %v984_v11 = vmul.f32 %v892_v7, %v892_v7 }
 0x140   : > { %v548_v12 = vadd.f32 %v547_v8, %v546_v57  ;;  %v950_v13 = vadd.f32 %v949_v10, %v948_v58  ;;  %v4062_v14 = vpop.f32.mrf.mxu0  ;;  %v4118_v15 = vpop.f32.mrf.mxu1 }
 0x141   : > { %v629_v16 = vsel %vm503_vm5, %v583_v9, 0.0  ;;  %v1030_v6 = vsel %vm503_vm5, %v984_v11, 0.0 }
 0x142   : > { %v630_v17 = vadd.f32 %v629_v16, %v628_v63  ;;  %v1031_v18 = vadd.f32 %v1030_v6, %v1029_v0  ;;  %v492_v19 = vpop.f32.mrf.mxu0  ;;  %v895_v20 = vpop.f32.mrf.mxu1 }
 0x143   : > { %v549_v21 = vsel %vm503_vm5, %v492_v19, 0.0  ;;  %v584_v22 = vmul.f32 %v492_v19, %v492_v19  ;;  %v951_v23 = vsel %vm503_vm5, %v895_v20, 0.0  ;;  %v985_v24 = vmul.f32 %v895_v20, %v895_v20 }
 0x144   : > { %v550_v25 = vadd.f32 %v549_v21, %v548_v12  ;;  %v952_v26 = vadd.f32 %v951_v23, %v950_v13  ;;  %v4063_v27 = vpop.f32.mrf.mxu0  ;;  %v4119_v28 = vpop.f32.mrf.mxu1 }
 0x145   : > { %v631_v29 = vsel %vm503_vm5, %v584_v22, 0.0  ;;  %v1032_v30 = vsel %vm503_vm5, %v985_v24, 0.0 }
 0x146   : > { %v632_v31 = vadd.f32 %v631_v29, %v630_v17  ;;  %v1033_v32 = vadd.f32 %v1032_v30, %v1031_v18  ;;  %v497_v33 = vpop.f32.mrf.mxu0  ;;  %v900_v34 = vpop.f32.mrf.mxu1 }
 0x147   : > { %v552_v35 = vsel %vm551_vm3, %v497_v33, 0.0  ;;  %v585_v36 = vmul.f32 %v497_v33, %v497_v33  ;;  %v953_v37 = vsel %vm551_vm3, %v900_v34, 0.0  ;;  %v986_v38 = vmul.f32 %v900_v34, %v900_v34 }
 0x148   : > { %v553_v39 = vadd.f32 %v552_v35, %v550_v25  ;;  %v954_v40 = vadd.f32 %v953_v37, %v952_v26  ;;  %v4066_v41 = vpop.f32.mrf.mxu0  ;;  %v4122_v42 = vpop.f32.mrf.mxu1 }
 0x149   : > { %v633_v43 = vsel %vm551_vm3, %v585_v36, 0.0  ;;  %v1034_v44 = vsel %vm551_vm3, %v986_v38, 0.0 }
 0x14a   : > { %v554_v45 = vrot.slane %v553_v39, 4  ;;  %v634_v46 = vadd.f32 %v633_v43, %v632_v31  ;;  %v955_v47 = vrot.slane %v954_v40, 4  ;;  %v1035_v48 = vadd.f32 %v1034_v44, %v1033_v32  ;;  %v500_v49 = vpop.f32.mrf.mxu0  ;;  %v903_v50 = vpop.f32.mrf.mxu1 }
 0x14c   : > { %v555_v51 = vadd.f32 %v554_v45, %v553_v39  ;;  %v635_v52 = vrot.slane %v634_v46, 4  ;;  %v956_v53 = vadd.f32 %v955_v47, %v954_v40  ;;  %v1036_v54 = vrot.slane %v1035_v48, 4  ;;  %v4067_v55 = vpop.f32.mrf.mxu0  ;;  %v4123_v56 = vpop.f32.mrf.mxu1 }
 0x14e   : > { %v556_v57 = vrot.slane %v555_v51, 2  ;;  %v636_v58 = vadd.f32 %v635_v52, %v634_v46  ;;  %v957_v59 = vrot.slane %v956_v53, 2  ;;  %v1037_v60 = vadd.f32 %v1036_v54, %v1035_v48  ;;  %v1205_v61 = vpop.f32.mrf.mxu0  ;;  %v5119_v62 = vpop.f32.mrf.mxu1 }
 0x14f   : > { %v1363_v55 = vmul.f32 %v1205_v61, %v1205_v61  ;;  %v1764_v56 = vmul.f32 %v5119_v62, %v5119_v62 }
 0x150   : > { %v557_v63 = vadd.f32 %v556_v57, %v555_v51  ;;  %v637_v0 = vrot.slane %v636_v58, 2  ;;  %v958_v5 = vadd.f32 %v957_v59, %v956_v53  ;;  %v1038_v7 = vrot.slane %v1037_v60, 2  ;;  %v4130_v8 = vpop.f32.mrf.mxu0  ;;  %v4186_v9 = vpop.f32.mrf.mxu1 }
 0x151   : > { %v1708_v8 = vsel %vm503_vm5, %v5119_v62, 0.0 }
 0x152   : > { %v558_v10 = vrot.slane %v557_v63, 1  ;;  %v638_v11 = vadd.f32 %v637_v0, %v636_v58  ;;  %v959_v12 = vrot.slane %v958_v5, 1  ;;  %v1039_v13 = vadd.f32 %v1038_v7, %v1037_v60  ;;  %v1208_v14 = vpop.f32.mrf.mxu0  ;;  %v1609_v15 = vpop.f32.mrf.mxu1 }
 0x153   : > { %v1364_v53 = vmul.f32 %v1208_v14, %v1208_v14  ;;  %v1765_v54 = vmul.f32 %v1609_v15, %v1609_v15  ;;  %v1308_v59 = vsel %vm503_vm5, %v1208_v14, 0.0 }
 0x154   : > { %v559_v16 = vadd.f32 %v558_v10, %v557_v63  ;;  %v639_v6 = vrot.slane %v638_v11, 1  ;;  %v960_v17 = vadd.f32 %v959_v12, %v958_v5  ;;  %v1040_v18 = vrot.slane %v1039_v13, 1  ;;  %v4131_v19 = vpop.f32.mrf.mxu0  ;;  %v4187_v20 = vpop.f32.mrf.mxu1 }
 0x155   : > { %v1307_v63 = vsel %vm503_vm5, %v1205_v61, 0.0  ;;  %v1389_v9 = vsel %vm503_vm5, %v1364_v53, 0.0  ;;  %v1709_v10 = vsel %vm503_vm5, %v1609_v15, 0.0  ;;  %v1388_v12 = vsel %vm503_vm5, %v1363_v55, 0.0 }
 0x156   : > { %v640_v21 = vadd.f32 %v639_v6, %v638_v11  ;;  %v5121_v22 = vadd.f32 %v960_v17, %v559_v16  ;;  %v1041_v23 = vadd.f32 %v1040_v18, %v1039_v13  ;;  %v1213_v24 = vpop.f32.mrf.mxu0  ;;  %v1614_v25 = vpop.f32.mrf.mxu1  ;;  %v1790_v11 = vsel %vm503_vm5, %v1765_v54, 0.0 }
 0x157   : > { %v1365_v60 = vmul.f32 %v1213_v24, %v1213_v24  ;;  %v1766_v0 = vmul.f32 %v1614_v25, %v1614_v25  ;;  %v1789_v13 = vsel %vm503_vm5, %v1764_v56, 0.0  ;;  %v1309_v14 = vadd.f32 %v1308_v59, %v1307_v63 }
 0x158   : > { %v5123_v26 = vadd.f32 %v1041_v23, %v640_v21  ;;  %v4134_v27 = vpop.f32.mrf.mxu0  ;;  %v4190_v28 = vpop.f32.mrf.mxu1  ;;  %v1310_v17 = vsel %vm503_vm5, %v1213_v24, 0.0  ;;  %v1711_v18 = vsel %vm503_vm5, %v1614_v25, 0.0  ;;  %v1390_v15 = vadd.f32 %v1389_v9, %v1388_v12 }
 0x159   : > { %v1391_v62 = vsel %vm503_vm5, %v1365_v60, 0.0  ;;  %v1710_v20 = vadd.f32 %v1709_v10, %v1708_v8  ;;  %v1791_v21 = vadd.f32 %v1790_v11, %v1789_v13  ;;  %v1792_v23 = vsel %vm503_vm5, %v1766_v0, 0.0 }
 0x15a   : > { %v1216_v29 = vpop.f32.mrf.mxu0  ;;  %v1617_v30 = vpop.f32.mrf.mxu1  ;;  %v1392_v25 = vadd.f32 %v1391_v62, %v1390_v15 }
 0x15b   : > { %v1366_v16 = vmul.f32 %v1216_v29, %v1216_v29  ;;  %v1767_v19 = vmul.f32 %v1617_v30, %v1617_v30 }
 0x15c   : > { %v4135_v31 = vpop.f32.mrf.mxu0  ;;  %v4191_v32 = vpop.f32.mrf.mxu1 }
 0x15d   : > { %v1312_v31 = vsel %vm503_vm5, %v1216_v29, 0.0  ;;  %v1713_v32 = vsel %vm503_vm5, %v1617_v30, 0.0 }
 0x15e   : > { %v5125_v33 = vpop.f32.mrf.mxu0  ;;  %v5127_v34 = vpop.f32.mrf.mxu1 }
 0x15f   : > { %v1768_v24 = vmul.f32 %v5127_v34, %v5127_v34  ;;  %v1314_v29 = vsel %vm503_vm5, %v5125_v33, 0.0  ;;  %v1715_v54 = vsel %vm503_vm5, %v5127_v34, 0.0 }
 0x160   : > { %v4138_v35 = vpop.f32.mrf.mxu0  ;;  %v4194_v36 = vpop.f32.mrf.mxu1 }
 0x161   : > { %v1367_v35 = vmul.f32 %v5125_v33, %v5125_v33  ;;  %v1311_v36 = vadd.f32 %v1310_v17, %v1309_v14  ;;  %v1796_v60 = vsel %vm503_vm5, %v1768_v24, 0.0 }
 0x162   : > { %v5129_v37 = vpop.f32.mrf.mxu0  ;;  %v5131_v38 = vpop.f32.mrf.mxu1 }
 0x163   : > { %v1368_v30 = vmul.f32 %v5129_v37, %v5129_v37  ;;  %v1395_v59 = vsel %vm503_vm5, %v1367_v35, 0.0  ;;  %v1316_v33 = vsel %vm503_vm5, %v5129_v37, 0.0  ;;  %v1717_v12 = vsel %vm503_vm5, %v5131_v38, 0.0 }
 0x164   : > { %v4139_v39 = vpop.f32.mrf.mxu0  ;;  %v4195_v40 = vpop.f32.mrf.mxu1 }
 0x165   : > { %v1712_v39 = vadd.f32 %v1711_v18, %v1710_v20  ;;  %v1393_v40 = vsel %vm503_vm5, %v1366_v16, 0.0  ;;  %v1397_v11 = vsel %vm503_vm5, %v1368_v30, 0.0 }
 0x166   : > { %v5133_v41 = vpop.f32.mrf.mxu0  ;;  %v5135_v42 = vpop.f32.mrf.mxu1  ;;  %v1394_v0 = vadd.f32 %v1393_v40, %v1392_v25 }
 0x167   : > { %v1714_v53 = vadd.f32 %v1713_v32, %v1712_v39  ;;  %v1369_v63 = vmul.f32 %v5133_v41, %v5133_v41  ;;  %v1770_v8 = vmul.f32 %v5135_v42, %v5135_v42  ;;  %v1719_v20 = vsel %vm503_vm5, %v5135_v42, 0.0 }
 0x168   : > { %v4142_v43 = vpop.f32.mrf.mxu0  ;;  %v4198_v44 = vpop.f32.mrf.mxu1  ;;  %v1396_v13 = vadd.f32 %v1395_v59, %v1394_v0 }
 0x169   : > { %v1716_v10 = vadd.f32 %v1715_v54, %v1714_v53  ;;  %v1399_v15 = vsel %vm503_vm5, %v1369_v63, 0.0 }
 0x16a   : > { %v5137_v45 = vpop.f32.mrf.mxu0  ;;  %v5139_v46 = vpop.f32.mrf.mxu1 }
 0x16b   : > { %v1370_v17 = vmul.f32 %v5137_v45, %v5137_v45  ;;  %v1721_v35 = vsel %vm503_vm5, %v5139_v46, 0.0 }
 0x16c   : > { %v4143_v47 = vpop.f32.mrf.mxu0  ;;  %v4199_v48 = vpop.f32.mrf.mxu1 }
 0x16d   : > { %v1794_v47 = vsel %vm503_vm5, %v1767_v19, 0.0  ;;  %v1769_v48 = vmul.f32 %v5131_v38, %v5131_v38  ;;  %v1318_v19 = vsel %vm503_vm5, %v5133_v41, 0.0  ;;  %v1771_v38 = vmul.f32 %v5139_v46, %v5139_v46 }
 0x16e   : > { %v5141_v49 = vpop.f32.mrf.mxu0  ;;  %v5143_v50 = vpop.f32.mrf.mxu1  ;;  %v1320_v41 = vsel %vm503_vm5, %v5137_v45, 0.0  ;;  %v1401_v40 = vsel %vm503_vm5, %v1370_v17, 0.0 }
 0x16f   : > { %v1798_v37 = vsel %vm503_vm5, %v1769_v48, 0.0  ;;  %v1371_v42 = vmul.f32 %v5141_v49, %v5141_v49  ;;  %v1772_v24 = vmul.f32 %v5143_v50, %v5143_v50  ;;  %v1802_v30 = vsel %vm503_vm5, %v1771_v38, 0.0 }
 0x170   : > { %v4146_v51 = vpop.f32.mrf.mxu0  ;;  %v4202_v52 = vpop.f32.mrf.mxu1  ;;  %v1322_v45 = vsel %vm503_vm5, %v5141_v49, 0.0  ;;  %v1723_v46 = vsel %vm503_vm5, %v5143_v50, 0.0 }
 0x171   : > { %v1793_v51 = vadd.f32 %v1792_v23, %v1791_v21  ;;  %v1313_v52 = vadd.f32 %v1312_v31, %v1311_v36  ;;  %v1398_v21 = vadd.f32 %v1397_v11, %v1396_v13  ;;  %v1718_v23 = vadd.f32 %v1717_v12, %v1716_v10 }
 0x172   : > { %v5147_v57 = vpop.f32.mrf.mxu0  ;;  %v5149_v58 = vpop.f32.mrf.mxu1  ;;  %v1403_v59 = vsel %vm503_vm5, %v1371_v42, 0.0  ;;  %v1804_v49 = vsel %vm503_vm5, %v1772_v24, 0.0 }
 0x173   : > { %v1400_v25 = vadd.f32 %v1399_v15, %v1398_v21  ;;  %v1720_v39 = vadd.f32 %v1719_v20, %v1718_v23  ;;  %v1372_v48 = vmul.f32 %v5147_v57, %v5147_v57  ;;  %v1773_v54 = vmul.f32 %v5149_v58, %v5149_v58 }
 0x174   : > { %v4147_v5 = vpop.f32.mrf.mxu0  ;;  %v4203_v7 = vpop.f32.mrf.mxu1  ;;  %v1725_v11 = vsel %vm503_vm5, %v5149_v58, 0.0 }
 0x175   : > { %v1795_v5 = vadd.f32 %v1794_v47, %v1793_v51  ;;  %v1315_v7 = vadd.f32 %v1314_v29, %v1313_v52  ;;  %v1722_v53 = vadd.f32 %v1721_v35, %v1720_v39  ;;  %v1405_v10 = vsel %vm503_vm5, %v1372_v48, 0.0 }
 0x176   : > { %v5160_v6 = vpop.f32.mrf.mxu0  ;;  %v5162_v61 = vpop.f32.mrf.mxu1 }
 0x177   : > { %v1797_v14 = vadd.f32 %v1796_v60, %v1795_v5  ;;  %v1317_v16 = vadd.f32 %v1316_v33, %v1315_v7  ;;  %v1373_v50 = vmul.f32 %v5160_v6, %v5160_v6  ;;  %v1402_v60 = vadd.f32 %v1401_v40, %v1400_v25 }
 0x178   : > { %v4150_v27 = vpop.f32.mrf.mxu0  ;;  %v4206_v28 = vpop.f32.mrf.mxu1  ;;  %v1724_v0 = vadd.f32 %v1723_v46, %v1722_v53  ;;  %v1774_v12 = vmul.f32 %v5162_v61, %v5162_v61 }
 0x179   : > { %v1799_v27 = vadd.f32 %v1798_v37, %v1797_v14  ;;  %v1800_v28 = vsel %vm503_vm5, %v1770_v8, 0.0  ;;  %v1319_v36 = vadd.f32 %v1318_v19, %v1317_v16  ;;  %v1324_v8 = vsel %vm503_vm5, %v5147_v57, 0.0 }
 0x17a   : > { %v5175_v43 = vpop.f32.mrf.mxu0  ;;  %v5177_v44 = vpop.f32.mrf.mxu1  ;;  %v1404_v37 = vadd.f32 %v1403_v59, %v1402_v60  ;;  %v1806_v14 = vsel %vm503_vm5, %v1773_v54, 0.0  ;;  %v1326_v16 = vsel %vm503_vm5, %v5160_v6, 0.0  ;;  %v1407_v57 = vsel %vm503_vm5, %v1373_v50, 0.0 }
 0x17b   : > { %v1801_v51 = vadd.f32 %v1800_v28, %v1799_v27  ;;  %v1321_v52 = vadd.f32 %v1320_v41, %v1319_v36  ;;  %v1374_v58 = vmul.f32 %v5175_v43, %v5175_v43  ;;  %v1775_v19 = vmul.f32 %v5177_v44, %v5177_v44 }
 0x17c   : > { %v4151_v55 = vpop.f32.mrf.mxu0  ;;  %v4207_v56 = vpop.f32.mrf.mxu1  ;;  %v1406_v20 = vadd.f32 %v1405_v10, %v1404_v37  ;;  %v1726_v38 = vadd.f32 %v1725_v11, %v1724_v0  ;;  %v1808_v27 = vsel %vm503_vm5, %v1774_v12, 0.0  ;;  %v1328_v28 = vsel %vm503_vm5, %v5175_v43, 0.0 }
 0x17d   : > { %v1803_v33 = vadd.f32 %v1802_v30, %v1801_v51  ;;  %v1323_v63 = vadd.f32 %v1322_v45, %v1321_v52  ;;  %v1729_v24 = vsel %vm503_vm5, %v5177_v44, 0.0  ;;  %v1409_v39 = vsel %vm503_vm5, %v1374_v58, 0.0 }
 0x17e   : > { %v5196_v9 = vpop.f32.mrf.mxu0  ;;  %v5198_v34 = vpop.f32.mrf.mxu1  ;;  %v1408_v35 = vadd.f32 %v1407_v57, %v1406_v20  ;;  %v1810_v40 = vsel %vm503_vm5, %v1775_v19, 0.0 }
 0x17f   : > { %v1805_v13 = vadd.f32 %v1804_v49, %v1803_v33  ;;  %v1325_v15 = vadd.f32 %v1324_v8, %v1323_v63  ;;  %v1776_v43 = vmul.f32 %v5198_v34, %v5198_v34  ;;  %v1731_v53 = vsel %vm503_vm5, %v5198_v34, 0.0 }
 0x180   : > { %v4154_v62 = vpop.f32.mrf.mxu0  ;;  %v4210_v18 = vpop.f32.mrf.mxu1 }
 0x181   : > { %v1727_v18 = vsel %vm503_vm5, %v5162_v61, 0.0  ;;  %v1807_v6 = vadd.f32 %v1806_v14, %v1805_v13  ;;  %v1375_v61 = vmul.f32 %v5196_v9, %v5196_v9  ;;  %v1327_v41 = vadd.f32 %v1326_v16, %v1325_v15 }
 0x182   : > { %v5214_v31 = vpop.f32.mrf.mxu0  ;;  %v5216_v32 = vpop.f32.mrf.mxu1  ;;  %v1728_v42 = vadd.f32 %v1727_v18, %v1726_v38  ;;  %v1812_v33 = vsel %vm503_vm5, %v1776_v43, 0.0 }
 0x183   : > { %v1329_v30 = vadd.f32 %v1328_v28, %v1327_v41  ;;  %v1376_v45 = vmul.f32 %v5214_v31, %v5214_v31  ;;  %v1777_v44 = vmul.f32 %v5216_v32, %v5216_v32  ;;  %v1411_v52 = vsel %vm503_vm5, %v1375_v61, 0.0 }
 0x184   : > { %v4155_v47 = vpop.f32.mrf.mxu0  ;;  %v4211_v29 = vpop.f32.mrf.mxu1  ;;  %v1730_v51 = vadd.f32 %v1729_v24, %v1728_v42  ;;  %v1332_v63 = vsel %vm503_vm5, %v5214_v31, 0.0  ;;  %v1733_v0 = vsel %vm503_vm5, %v5216_v32, 0.0 }
 0x185   : > { %v1330_v47 = vsel %vm503_vm5, %v5196_v9, 0.0  ;;  %v1809_v29 = vadd.f32 %v1808_v27, %v1807_v6  ;;  %v1410_v9 = vadd.f32 %v1409_v39, %v1408_v35  ;;  %v1413_v8 = vsel %vm503_vm5, %v1376_v45, 0.0 }
 0x186   : > { %v5236_v55 = vpop.f32.mrf.mxu0  ;;  %v5238_v56 = vpop.f32.mrf.mxu1  ;;  %v1331_v59 = vadd.f32 %v1330_v47, %v1329_v30  ;;  %v1814_v10 = vsel %vm503_vm5, %v1777_v44, 0.0 }
 0x187   : > { %v1811_v54 = vadd.f32 %v1810_v40, %v1809_v29  ;;  %v1377_v49 = vmul.f32 %v5236_v55, %v5236_v55  ;;  %v1412_v34 = vadd.f32 %v1411_v52, %v1410_v9  ;;  %v1334_v37 = vsel %vm503_vm5, %v5236_v55, 0.0 }
 0x188   : > { %v4158_v5 = vpop.f32.mrf.mxu0  ;;  %v4214_v7 = vpop.f32.mrf.mxu1  ;;  %v1735_v31 = vsel %vm503_vm5, %v5238_v56, 0.0  ;;  %v1333_v16 = vadd.f32 %v1332_v63, %v1331_v59 }
 0x189   : > { %v1778_v5 = vmul.f32 %v5238_v56, %v5238_v56  ;;  %v1732_v7 = vadd.f32 %v1731_v53, %v1730_v51  ;;  %v1813_v14 = vadd.f32 %v1812_v33, %v1811_v54  ;;  %v1415_v18 = vsel %vm503_vm5, %v1377_v49, 0.0 }
 0x18a   : > { %v1264_v17 = vpop.f32.mrf.mxu0  ;;  %v5254_v62 = vpop.f32.mrf.mxu1  ;;  %v1335_v56 = vadd.f32 %v1334_v37, %v1333_v16 }
 0x18b   : > { %v1378_v13 = vmul.f32 %v1264_v17, %v1264_v17  ;;  %v1779_v32 = vmul.f32 %v5254_v62, %v5254_v62  ;;  %v1734_v57 = vadd.f32 %v1733_v0, %v1732_v7  ;;  %v1816_v15 = vsel %vm503_vm5, %v1778_v5, 0.0 }
 0x18c   : > { %v4159_v21 = vpop.f32.mrf.mxu0  ;;  %v4215_v23 = vpop.f32.mrf.mxu1  ;;  %v1336_v20 = vsel %vm503_vm5, %v1264_v17, 0.0  ;;  %v1737_v41 = vsel %vm503_vm5, %v5254_v62, 0.0 }
 0x18d   : > { %v1414_v21 = vadd.f32 %v1413_v8, %v1412_v34  ;;  %v1815_v23 = vadd.f32 %v1814_v10, %v1813_v14  ;;  %v1736_v6 = vadd.f32 %v1735_v31, %v1734_v57  ;;  %v1417_v61 = vsel %vm503_vm5, %v1378_v13, 0.0 }
 0x18e   : > { %v1269_v36 = vpop.f32.mrf.mxu0  ;;  %v1670_v25 = vpop.f32.mrf.mxu1  ;;  %v1818_v35 = vsel %vm503_vm5, %v1779_v32, 0.0  ;;  %v1337_v40 = vadd.f32 %v1336_v20, %v1335_v56 }
 0x18f   : > { %v1379_v38 = vmul.f32 %v1269_v36, %v1269_v36  ;;  %v1780_v55 = vmul.f32 %v1670_v25, %v1670_v25  ;;  %v1416_v24 = vadd.f32 %v1415_v18, %v1414_v21  ;;  %v1817_v39 = vadd.f32 %v1816_v15, %v1815_v23 }
 0x190   : > { %v4162_v46 = vpop.f32.mrf.mxu0  ;;  %v4218_v48 = vpop.f32.mrf.mxu1  ;;  %v1338_v17 = vsel %vm503_vm5, %v1269_v36, 0.0  ;;  %v1739_v30 = vsel %vm503_vm5, %v1670_v25, 0.0 }
 0x191   : > { %v1419_v29 = vsel %vm503_vm5, %v1379_v38, 0.0  ;;  %v1820_v45 = vsel %vm503_vm5, %v1780_v55, 0.0  ;;  %v1418_v46 = vadd.f32 %v1417_v61, %v1416_v24  ;;  %v1738_v48 = vadd.f32 %v1737_v41, %v1736_v6 }
 0x192   : > { %v1272_v50 = vpop.f32.mrf.mxu0  ;;  %v1673_v60 = vpop.f32.mrf.mxu1  ;;  %v1819_v62 = vadd.f32 %v1818_v35, %v1817_v39  ;;  %v1339_v49 = vadd.f32 %v1338_v17, %v1337_v40 }
 0x193   : > { %v1380_v42 = vmul.f32 %v1272_v50, %v1272_v50  ;;  %v1781_v44 = vmul.f32 %v1673_v60, %v1673_v60  ;;  %v1340_v51 = vsel %vm503_vm5, %v1272_v50, 0.0  ;;  %v1741_v36 = vsel %vm503_vm5, %v1673_v60, 0.0 }
 0x194   : > { %v4163_v11 = vpop.f32.mrf.mxu0  ;;  %v4219_v12 = vpop.f32.mrf.mxu1  ;;  %v1420_v33 = vadd.f32 %v1419_v29, %v1418_v46  ;;  %v1740_v63 = vadd.f32 %v1739_v30, %v1738_v48  ;;  %v1821_v25 = vadd.f32 %v1820_v45, %v1819_v62  ;;  %v1341_v10 = vadd.f32 %v1340_v51, %v1339_v49 }
 0x195   : > { %v1421_v9 = vsel %vm503_vm5, %v1380_v42, 0.0  ;;  %v1822_v34 = vsel %vm503_vm5, %v1781_v44, 0.0 }
 0x196   : > { %v1277_v58 = vpop.f32.mrf.mxu0  ;;  %v1678_v19 = vpop.f32.mrf.mxu1  ;;  %v1422_v11 = vadd.f32 %v1421_v9, %v1420_v33  ;;  %v1742_v12 = vadd.f32 %v1741_v36, %v1740_v63  ;;  %v1823_v57 = vadd.f32 %v1822_v34, %v1821_v25 }
 0x197   : > { %v1381_v54 = vmul.f32 %v1277_v58, %v1277_v58  ;;  %v1782_v59 = vmul.f32 %v1678_v19, %v1678_v19  ;;  %v1342_v7 = vsel %vm503_vm5, %v1277_v58, 0.0  ;;  %v1743_v37 = vsel %vm503_vm5, %v1678_v19, 0.0 }
 0x198   : > { %v4166_v27 = vpop.f32.mrf.mxu0  ;;  %v4222_v28 = vpop.f32.mrf.mxu1  ;;  %v1343_v18 = vadd.f32 %v1342_v7, %v1341_v10  ;;  %v1744_v55 = vadd.f32 %v1743_v37, %v1742_v12 }
 0x199   : > { %v1423_v13 = vsel %vm503_vm5, %v1381_v54, 0.0  ;;  %v1824_v32 = vsel %vm503_vm5, %v1782_v59, 0.0 }
 0x19a   : > { %v1280_v47 = vpop.f32.mrf.mxu0  ;;  %v1681_v43 = vpop.f32.mrf.mxu1  ;;  %v1424_v56 = vadd.f32 %v1423_v13, %v1422_v11  ;;  %v1825_v6 = vadd.f32 %v1824_v32, %v1823_v57 }
 0x19b   : > { %v1382_v8 = vmul.f32 %v1280_v47, %v1280_v47  ;;  %v1783_v50 = vmul.f32 %v1681_v43, %v1681_v43  ;;  %v1344_v14 = vsel %vm503_vm5, %v1280_v47, 0.0  ;;  %v1745_v58 = vsel %vm503_vm5, %v1681_v43, 0.0 }
 0x19c   : > { %v4167_v52 = vpop.f32.mrf.mxu0  ;;  %v4223_v53 = vpop.f32.mrf.mxu1  ;;  %v1345_v27 = vadd.f32 %v1344_v14, %v1343_v18  ;;  %v1746_v41 = vadd.f32 %v1745_v58, %v1744_v55 }
 0x19d   : > { %v1425_v21 = vsel %vm503_vm5, %v1382_v8, 0.0  ;;  %v1826_v19 = vsel %vm503_vm5, %v1783_v50, 0.0 }
 0x19e   : > { %v1285_v0 = vpop.f32.mrf.mxu0  ;;  %v1686_v5 = vpop.f32.mrf.mxu1  ;;  %v1426_v39 = vadd.f32 %v1425_v21, %v1424_v56  ;;  %v1827_v40 = vadd.f32 %v1826_v19, %v1825_v6 }
 0x19f   : > { %v1383_v16 = vmul.f32 %v1285_v0, %v1285_v0  ;;  %v1784_v15 = vmul.f32 %v1686_v5, %v1686_v5  ;;  %v1346_v35 = vsel %vm503_vm5, %v1285_v0, 0.0  ;;  %v1747_v24 = vsel %vm503_vm5, %v1686_v5, 0.0 }
 0x1a0   : > { %v4170_v60 = vpop.f32.mrf.mxu0  ;;  %v4226_v31 = vpop.f32.mrf.mxu1  ;;  %v1347_v48 = vadd.f32 %v1346_v35, %v1345_v27  ;;  %v1748_v51 = vadd.f32 %v1747_v24, %v1746_v41 }
 0x1a1   : > { %v1427_v42 = vsel %vm503_vm5, %v1383_v16, 0.0  ;;  %v1828_v17 = vsel %vm503_vm5, %v1784_v15, 0.0 }
 0x1a2   : > { %v1288_v20 = vpop.f32.mrf.mxu0  ;;  %v1689_v38 = vpop.f32.mrf.mxu1  ;;  %v1428_v62 = vadd.f32 %v1427_v42, %v1426_v39  ;;  %v1829_v36 = vadd.f32 %v1828_v17, %v1827_v40 }
 0x1a3   : > { %v1384_v23 = vmul.f32 %v1288_v20, %v1288_v20  ;;  %v1785_v47 = vmul.f32 %v1689_v38, %v1689_v38  ;;  %v1348_v30 = vsel %vm503_vm5, %v1288_v20, 0.0  ;;  %v1749_v44 = vsel %vm503_vm5, %v1689_v38, 0.0 }
 0x1a4   : > { %v4171_v28 = vpop.f32.mrf.mxu0  ;;  %v4227_v61 = vpop.f32.mrf.mxu1  ;;  %v1349_v49 = vadd.f32 %v1348_v30, %v1347_v48  ;;  %v1750_v63 = vadd.f32 %v1749_v44, %v1748_v51 }
 0x1a5   : > { %v1429_v45 = vsel %vm503_vm5, %v1384_v23, 0.0  ;;  %v1830_v25 = vsel %vm503_vm5, %v1785_v47, 0.0 }
 0x1a6   : > { %v1293_v43 = vpop.f32.mrf.mxu0  ;;  %v1694_v29 = vpop.f32.mrf.mxu1  ;;  %v1430_v33 = vadd.f32 %v1429_v45, %v1428_v62  ;;  %v1831_v13 = vadd.f32 %v1830_v25, %v1829_v36 }
 0x1a7   : > { %v1385_v46 = vmul.f32 %v1293_v43, %v1293_v43  ;;  %v1786_v52 = vmul.f32 %v1694_v29, %v1694_v29  ;;  %v1350_v54 = vsel %vm503_vm5, %v1293_v43, 0.0  ;;  %v1751_v59 = vsel %vm503_vm5, %v1694_v29, 0.0 }
 0x1a8   : > { %v4174_v53 = vpop.f32.mrf.mxu0  ;;  %v4230_v9 = vpop.f32.mrf.mxu1  ;;  %v1351_v10 = vadd.f32 %v1350_v54, %v1349_v49  ;;  %v1752_v11 = vadd.f32 %v1751_v59, %v1750_v63 }
 0x1a9   : > { %v1431_v34 = vsel %vm503_vm5, %v1385_v46, 0.0  ;;  %v1832_v12 = vsel %vm503_vm5, %v1786_v52, 0.0 }
 0x1aa   : > { %v1296_v0 = vpop.f32.mrf.mxu0  ;;  %v1697_v5 = vpop.f32.mrf.mxu1  ;;  %v1432_v14 = vadd.f32 %v1431_v34, %v1430_v33  ;;  %v1833_v20 = vadd.f32 %v1832_v12, %v1831_v13 }
 0x1ab   : > { %v1352_v7 = vsel %vm503_vm5, %v1296_v0, 0.0  ;;  %v1386_v8 = vmul.f32 %v1296_v0, %v1296_v0  ;;  %v1753_v50 = vsel %vm503_vm5, %v1697_v5, 0.0  ;;  %v1787_v37 = vmul.f32 %v1697_v5, %v1697_v5 }
 0x1ac   : > { %v4175_v60 = vpop.f32.mrf.mxu0  ;;  %v4231_v31 = vpop.f32.mrf.mxu1  ;;  %v1353_v16 = vadd.f32 %v1352_v7, %v1351_v10  ;;  %v1754_v57 = vadd.f32 %v1753_v50, %v1752_v11  ;;  %v1845_v50 = vld [vmem:[#allocation2] sm:$0x1] }
 0x1ad   : > { %v1433_v32 = vsel %vm503_vm5, %v1386_v8, 0.0  ;;  %v1834_v18 = vsel %vm503_vm5, %v1787_v37, 0.0  ;;  %v1849_v37 = vld [vmem:[#allocation3] sm:$0x1] }
 0x1ae   : > { %v1301_v58 = vpop.f32.mrf.mxu0  ;;  %v1702_v15 = vpop.f32.mrf.mxu1  ;;  %v1434_v19 = vadd.f32 %v1433_v32, %v1432_v14  ;;  %v1835_v61 = vadd.f32 %v1834_v18, %v1833_v20 }
 0x1af   : > { %v1354_v38 = vsel %vm551_vm3, %v1301_v58, 0.0  ;;  %v1387_v55 = vmul.f32 %v1301_v58, %v1301_v58  ;;  %v1755_v21 = vsel %vm551_vm3, %v1702_v15, 0.0  ;;  %v1788_v6 = vmul.f32 %v1702_v15, %v1702_v15 }
 0x1b0   : > { %v1355_v23 = vadd.f32 %v1354_v38, %v1353_v16  ;;  %v1756_v56 = vadd.f32 %v1755_v21, %v1754_v57  ;;  %v4178_v27 = vpop.f32.mrf.mxu0  ;;  %v4234_v28 = vpop.f32.mrf.mxu1 }
 0x1b1   : > { %v1435_v41 = vsel %vm551_vm3, %v1387_v55, 0.0  ;;  %v1836_v39 = vsel %vm551_vm3, %v1788_v6, 0.0 }
 0x1b2   : > { %v1356_v35 = vrot.slane %v1355_v23, 4  ;;  %v1436_v42 = vadd.f32 %v1435_v41, %v1434_v19  ;;  %v1757_v24 = vrot.slane %v1756_v56, 4  ;;  %v1304_v40 = vpop.f32.mrf.mxu0  ;;  %v1705_v17 = vpop.f32.mrf.mxu1  ;;  %v1837_v47 = vadd.f32 %v1836_v39, %v1835_v61 }
 0x1b4   : > { %v1357_v43 = vadd.f32 %v1356_v35, %v1355_v23  ;;  %v1437_v29 = vrot.slane %v1436_v42, 4  ;;  %v1758_v30 = vadd.f32 %v1757_v24, %v1756_v56  ;;  %v4179_v45 = vpop.f32.mrf.mxu0  ;;  %v4235_v44 = vpop.f32.mrf.mxu1  ;;  %v1838_v46 = vrot.slane %v1837_v47, 4 }
 0x1b6   : > { %v1358_v48 = vrot.slane %v1357_v43, 2  ;;  %v1438_v62 = vadd.f32 %v1437_v29, %v1436_v42  ;;  %v1759_v51 = vrot.slane %v1758_v30, 2  ;;  %v1839_v52 = vadd.f32 %v1838_v46, %v1837_v47 }
 0x1b8   : > { %v1359_v53 = vadd.f32 %v1358_v48, %v1357_v43  ;;  %v1439_v9 = vrot.slane %v1438_v62, 2  ;;  %v1760_v36 = vadd.f32 %v1759_v51, %v1758_v30  ;;  %v1840_v54 = vrot.slane %v1839_v52, 2 }
 0x1ba   : > { %v1360_v59 = vrot.slane %v1359_v53, 1  ;;  %v1440_v49 = vadd.f32 %v1439_v9, %v1438_v62  ;;  %v1761_v33 = vrot.slane %v1760_v36, 1  ;;  %v1841_v63 = vadd.f32 %v1840_v54, %v1839_v52 }
 0x1bc   : > { %v1361_v25 = vadd.f32 %v1360_v59, %v1359_v53  ;;  %v1441_v0 = vrot.slane %v1440_v49, 1  ;;  %v1842_v5 = vrot.slane %v1841_v63, 1  ;;  %v1762_v8 = vadd.f32 %v1761_v33, %v1760_v36 }
 0x1be   : > { %v1362_v34 = vadd.f32 %v1361_v25, %v5121_v22  ;;  %v1442_v7 = vadd.f32 %v1441_v0, %v1440_v49  ;;  %v1843_v12 = vadd.f32 %v1842_v5, %v1841_v63 }
 0x1c0   : > { %v1443_v10 = vadd.f32 %v1442_v7, %v5123_v26  ;;  %v1763_v11 = vadd.f32 %v1762_v8, %v1362_v34 }
 0x1c2   : > { %v1844_v60 = vadd.f32 %v1843_v12, %v1443_v10  ;;  %v1846_v31 = vadd.f32 %v1845_v50, %v1763_v11 }
 0x1c4   : > { %1848 = vst.msk [vmem:[#allocation2] sm:$0x1] %vm1847_vm6, %v1846_v31  ;;  %v1850_v13 = vadd.f32 %v1849_v37, %v1844_v60 }
 0x1c6   : > { %1851 = vst.msk [vmem:[#allocation3] sm:$0x1] %vm1847_vm6, %v1850_v13 }
 0x1c7 PF: > { %p3658_p10 = scmp.ne.s32.totalorder %s4640_s16, 1 }
 0x1c9   : > { %1881 = sbr.rel (%p3658_p10) target bundleno = 877 (0x36d), region = 48 }
 0x1ce   : > { %v3673_v22 = vcombine.low %v4741_v3, %v4746_v4  ;;  %v4658_v32 = vmov 0.0   ;;  %v3672_v26 = vcombine.low %v4731_v1, %v4736_v2  ;;  %vm4659_vm7 = vmmov 0   ;;  %v4560_v3 = vld [vmem:[%s4721_s26] sm:$0xff]   ;;  %v4562_v1 = vld [vmem:[%s4721_s26 + $0x8] sm:$0xff]   ;;  %v4564_v14 = vld [vmem:[%s4721_s26 + $0x10] sm:$0xff]  }
 0x1cf   : > { %4236 = vmatprep.subr.bf16.mxu0 %v4658_v32  ;;  %4292 = vmatprep.subr.bf16.mxu1 %v4658_v32  ;;  %v4561_v4 = vld [vmem:[%s4721_s26 + $0x64] sm:$0xff]   ;;  %vm1995_vm8 = vcmask 261120   ;;  %v4563_v2 = vld [vmem:[%s4721_s26 + $0x6c] sm:$0xff]   ;;  %v4565_v16 = vld [vmem:[%s4721_s26 + $0x74] sm:$0xff]   ;;  %v2172_v11 = vlaneseq  ;;  %vm3376_vm9 = vcmask 60416   ;;  %vm3401_vm10 = vcmask 58368  }
 0x1d0   : > { %4237 = vmatpush3.bf16.msra.mxu0 %v3673_v22  ;;  %4293 = vmatpush3.bf16.msra.mxu1 %v3673_v22  ;;  %v4566_v57 = vld [vmem:[%s4721_s26 + $0x18] sm:$0xff]   ;;  %v4568_v58 = vld [vmem:[%s4721_s26 + $0x20] sm:$0xff]   ;;  %v4570_v20 = vld [vmem:[%s4721_s26 + $0x28] sm:$0xff]  }
 0x1d1   : > { %4238 = vmatprep.subr.bf16.mxu0 %v4658_v32  ;;  %4294 = vmatprep.subr.bf16.mxu1 %v4658_v32  ;;  %v4567_v18 = vld [vmem:[%s4721_s26 + $0x7c] sm:$0xff]   ;;  %v4569_v15 = vld [vmem:[%s4721_s26 + $0x84] sm:$0xff]   ;;  %v4571_v38 = vld [vmem:[%s4721_s26 + $0x8c] sm:$0xff]   ;;  %v2173_v31 = vshrl.u32 %v2172_v11, 7 }
 0x1d2   : > { %4240 = vmatprep.mubr.msk.bf16.mxu0 %vm4659_vm7, %v4658_v32  ;;  %4296 = vmatprep.mubr.msk.bf16.mxu1 %vm4659_vm7, %v4658_v32  ;;  %v4572_v55 = vld [vmem:[%s4721_s26 + $0x30] sm:$0xff]   ;;  %v4574_v19 = vld [vmem:[%s4721_s26 + $0x38] sm:$0xff]   ;;  %v4576_v56 = vld [vmem:[%s4721_s26 + $0x40] sm:$0xff]  }
 0x1d3   : > { %v4573_v21 = vld [vmem:[%s4721_s26 + $0x94] sm:$0xff]   ;;  %v4575_v23 = vld [vmem:[%s4721_s26 + $0x9c] sm:$0xff]   ;;  %v4577_v6 = vld [vmem:[%s4721_s26 + $0xa4] sm:$0xff]  }
 0x1d4   : > { %4239 = vmatpush3.bf16.msra.mxu0 %v3672_v26  ;;  %4295 = vmatpush3.bf16.msra.mxu1 %v3672_v26  ;;  %v4578_v27 = vld [vmem:[%s4721_s26 + $0x48] sm:$0xff]   ;;  %v4580_v61 = vld [vmem:[%s4721_s26 + $0x50] sm:$0xff]   ;;  %v4582_v35 = vld [vmem:[%s4721_s26 + $0x58] sm:$0xff]  }
 0x1d5   : > { %4348 = vmatprep.subr.bf16.mxu0 %v4658_v32  ;;  %4404 = vmatprep.subr.bf16.mxu1 %v4658_v32  ;;  %v4579_v28 = vld [vmem:[%s4721_s26 + $0xac] sm:$0xff]   ;;  %v4581_v41 = vld [vmem:[%s4721_s26 + $0xb4] sm:$0xff]   ;;  %v4583_v42 = vld [vmem:[%s4721_s26 + $0xbc] sm:$0xff]  }
 0x1d6   : > { %v4584_v24 = vld [vmem:[%s4721_s26 + $0x60] ss:$0 sps:$4 sm:$0x33]   ;;  %v4585_v39 = vld [vmem:[%s4721_s26 + $0xc4] ss:$0 sps:$4 sm:$0x33]  }
 0x1d7   : > { %4241 = vmatmul.mubr.msk.bf16.vlgmr.msra.gmra.mxu0 %vm1995_vm8, %v4560_v3  ;;  %4297 = vmatmul.mubr.msk.bf16.vlgmr.msra.gmra.mxu1 %vm1995_vm8, %v4561_v4  ;;  %v4586_v40 = vld [vmem:[%s4721_s26 + $0xc8] sm:$0xff]   ;;  %v4588_v47 = vld [vmem:[%s4721_s26 + $0xd0] sm:$0xff]   ;;  %v4590_v29 = vld [vmem:[%s4721_s26 + $0xd8] sm:$0xff]  }
 0x1d8   : > { %4349 = vmatpush3.bf16.msra.mxu0 %v3673_v22  ;;  %4405 = vmatpush3.bf16.msra.mxu1 %v3673_v22  ;;  %v4587_v17 = vld [vmem:[%s4721_s26 + $0x12c] sm:$0xff]   ;;  %v4589_v43 = vld [vmem:[%s4721_s26 + $0x134] sm:$0xff]   ;;  %v4591_v30 = vld [vmem:[%s4721_s26 + $0x13c] sm:$0xff]  }
 0x1d9   : > { %4244 = vmatprep.mubr.msk.bf16.mxu0 %vm4659_vm7, %v4658_v32  ;;  %4300 = vmatprep.mubr.msk.bf16.mxu1 %vm4659_vm7, %v4658_v32  ;;  %v4592_v45 = vld [vmem:[%s4721_s26 + $0xe0] sm:$0xff]   ;;  %v4594_v46 = vld [vmem:[%s4721_s26 + $0xe8] sm:$0xff]   ;;  %v4596_v62 = vld [vmem:[%s4721_s26 + $0xf0] sm:$0xff]  }
 0x1da   : > { %4350 = vmatprep.subr.bf16.mxu0 %v4658_v32  ;;  %4406 = vmatprep.subr.bf16.mxu1 %v4658_v32  ;;  %v4593_v44 = vld [vmem:[%s4721_s26 + $0x144] sm:$0xff]   ;;  %v4595_v48 = vld [vmem:[%s4721_s26 + $0x14c] sm:$0xff]   ;;  %v4597_v51 = vld [vmem:[%s4721_s26 + $0x154] sm:$0xff]  }
 0x1db   : > { %v1882_v52 = vld [vmem:[#allocation2] sm:$0x1]  ;;  %v4598_v9 = vld [vmem:[%s4721_s26 + $0xf8] sm:$0xff]   ;;  %v1884_v54 = vld [vmem:[#allocation3] sm:$0x1] }
 0x1dc   : > { %4351 = vmatpush3.bf16.msra.mxu0 %v3672_v26  ;;  %4407 = vmatpush3.bf16.msra.mxu1 %v3672_v26  ;;  %v1883_v53 = vmul.f32 0.0006377551, %v1882_v52  ;;  %v4599_v36 = vld [vmem:[%s4721_s26 + $0x15c] sm:$0xff]   ;;  %v1885_v59 = vmul.f32 0.0006377551, %v1884_v54  ;;  %v4601_v25 = vld [vmem:[%s4721_s26 + $0x164] sm:$0xff]  }
 0x1dd   : > { %v4600_v63 = vld [vmem:[%s4721_s26 + $0x100] sm:$0xff]   ;;  %v4602_v5 = vld [vmem:[%s4721_s26 + $0x108] sm:$0xff]   ;;  %v4604_v7 = vld [vmem:[%s4721_s26 + $0x110] sm:$0xff]   ;;  %v2174_v26 = vsub.s32 0, %v2173_v31 }
 0x1de   : > { %v1886_v49 = vmul.f32 %v1883_v53, %v1883_v53  ;;  %v4603_v34 = vld [vmem:[%s4721_s26 + $0x16c] sm:$0xff]   ;;  %v4605_v8 = vld [vmem:[%s4721_s26 + $0x174] sm:$0xff]   ;;  %v1890_v10 = vld [vmem:[%s6067_s2] sm:$0x1] }
 0x1df   : > { %4245 = vmatmul.mubr.msk.bf16.gmra.mxu0 %vm1995_vm8, %v4562_v1  ;;  %4301 = vmatmul.mubr.msk.bf16.gmra.mxu1 %vm1995_vm8, %v4563_v2  ;;  %v4606_v37 = vld [vmem:[%s4721_s26 + $0x118] sm:$0xff]   ;;  %v1892_v22 = vld [vmem:[%s6068_s3] sm:$0x1]  ;;  %v4609_v1 = vld [vmem:[%s4721_s26 + $0x184] sm:$0xff]  }
 0x1e0   : > { %4248 = vmatprep.mubr.msk.bf16.mxu0 %vm4659_vm7, %v4658_v32  ;;  %4304 = vmatprep.mubr.msk.bf16.mxu1 %vm4659_vm7, %v4658_v32  ;;  %v1887_v33 = vsub.f32 %v1885_v59, %v1886_v49  ;;  %v4607_v60 = vld [vmem:[%s4721_s26 + $0x17c] sm:$0xff]  }
 0x1e1   : > { %v4608_v4 = vld [vmem:[%s4721_s26 + $0x120] sm:$0xff]  }
 0x1e2   : > { %v1888_v0 = vadd.f32 1e-05, %v1887_v33 }
 0x1e4   : > { %4612 = vrsqrt.f32 %v1888_v0 }
 0x1e7   : > { %4249 = vmatmul.mubr.msk.bf16.gmra.mxu0 %vm1995_vm8, %v4564_v14  ;;  %4305 = vmatmul.mubr.msk.bf16.gmra.mxu1 %vm1995_vm8, %v4565_v16 }
 0x1e8   : > { %4252 = vmatprep.mubr.msk.bf16.mxu0 %vm4659_vm7, %v4658_v32  ;;  %4308 = vmatprep.mubr.msk.bf16.mxu1 %vm4659_vm7, %v4658_v32 }
 0x1ef   : > { %4253 = vmatmul.mubr.msk.bf16.gmra.mxu0 %vm1995_vm8, %v4566_v57  ;;  %4309 = vmatmul.mubr.msk.bf16.gmra.mxu1 %vm1995_vm8, %v4567_v18 }
 0x1f0   : > { %4256 = vmatprep.mubr.msk.bf16.mxu0 %vm4659_vm7, %v4658_v32  ;;  %4312 = vmatprep.mubr.msk.bf16.mxu1 %vm4659_vm7, %v4658_v32 }
 0x1f1   : > { %v4613_v50 = vpop.eup %4612 }
 0x1f2   : > { %v1891_v12 = vmul.f32 %v4613_v50, %v1890_v10 }
 0x1f4   : > { %v1893_v13 = vmul.f32 %v1891_v12, %v1883_v53  ;;  %v5562_v2 = vrot.slane %v1891_v12, %v2174_v26 }
 0x1f6   : > { %v1894_v3 = vsub.f32 %v1892_v22, %v1893_v13 }
 0x1f7   : > { %4257 = vmatmul.mubr.msk.bf16.gmra.mxu0 %vm1995_vm8, %v4568_v58  ;;  %4313 = vmatmul.mubr.msk.bf16.gmra.mxu1 %vm1995_vm8, %v4569_v15 }
 0x1f8   : > { %4260 = vmatprep.mubr.msk.bf16.mxu0 %vm4659_vm7, %v4658_v32  ;;  %4316 = vmatprep.mubr.msk.bf16.mxu1 %vm4659_vm7, %v4658_v32  ;;  %v5564_v14 = vrot.slane %v1894_v3, %v2174_v26 }
 0x1ff   : > { %4261 = vmatmul.mubr.msk.bf16.gmra.mxu0 %vm1995_vm8, %v4570_v20  ;;  %4317 = vmatmul.mubr.msk.bf16.gmra.mxu1 %vm1995_vm8, %v4571_v38 }
 0x200   : > { %4264 = vmatprep.mubr.msk.bf16.mxu0 %vm4659_vm7, %v4658_v32  ;;  %4320 = vmatprep.mubr.msk.bf16.mxu1 %vm4659_vm7, %v4658_v32 }
 0x207   : > { %4265 = vmatmul.mubr.msk.bf16.gmra.mxu0 %vm1995_vm8, %v4572_v55  ;;  %4321 = vmatmul.mubr.msk.bf16.gmra.mxu1 %vm1995_vm8, %v4573_v21 }
 0x208   : > { %4268 = vmatprep.mubr.msk.bf16.mxu0 %vm4659_vm7, %v4658_v32  ;;  %4324 = vmatprep.mubr.msk.bf16.mxu1 %vm4659_vm7, %v4658_v32 }
 0x20f   : > { %4269 = vmatmul.mubr.msk.bf16.gmra.mxu0 %vm1995_vm8, %v4574_v19  ;;  %4325 = vmatmul.mubr.msk.bf16.gmra.mxu1 %vm1995_vm8, %v4575_v23  ;;  %v4610_v23 = vld [vmem:[%s4721_s26 + $0x128] ss:$0 sps:$4 sm:$0x33]  }
 0x210   : > { %4272 = vmatprep.mubr.msk.bf16.mxu0 %vm4659_vm7, %v4658_v32  ;;  %4328 = vmatprep.mubr.msk.bf16.mxu1 %vm4659_vm7, %v4658_v32 }
 0x217   : > { %4273 = vmatmul.mubr.msk.bf16.gmra.mxu0 %vm1995_vm8, %v4576_v56  ;;  %4329 = vmatmul.mubr.msk.bf16.gmra.mxu1 %vm1995_vm8, %v4577_v6  ;;  %v4611_v56 = vld [vmem:[%s4721_s26 + $0x18c] ss:$0 sps:$4 sm:$0x33]  }
 0x218   : > { %4276 = vmatprep.mubr.msk.bf16.mxu0 %vm4659_vm7, %v4658_v32  ;;  %4332 = vmatprep.mubr.msk.bf16.mxu1 %vm4659_vm7, %v4658_v32 }
 0x21f   : > { %4277 = vmatmul.mubr.msk.bf16.gmra.mxu0 %vm1995_vm8, %v4578_v27  ;;  %4333 = vmatmul.mubr.msk.bf16.gmra.mxu1 %vm1995_vm8, %v4579_v28 }
 0x220   : > { %4280 = vmatprep.mubr.msk.bf16.mxu0 %vm4659_vm7, %v4658_v32  ;;  %4336 = vmatprep.mubr.msk.bf16.mxu1 %vm4659_vm7, %v4658_v32 }
 0x227   : > { %4281 = vmatmul.mubr.msk.bf16.gmra.mxu0 %vm1995_vm8, %v4580_v61  ;;  %4337 = vmatmul.mubr.msk.bf16.gmra.mxu1 %vm1995_vm8, %v4581_v41 }
 0x228   : > { %4284 = vmatprep.mubr.msk.bf16.mxu0 %vm4659_vm7, %v4658_v32  ;;  %4340 = vmatprep.mubr.msk.bf16.mxu1 %vm4659_vm7, %v4658_v32 }
 0x22f   : > { %4285 = vmatmul.mubr.msk.bf16.gmra.mxu0 %vm1995_vm8, %v4582_v35  ;;  %4341 = vmatmul.mubr.msk.bf16.gmra.mxu1 %vm1995_vm8, %v4583_v42 }
 0x230   : > { %4288 = vmatprep.mubr.msk.bf16.mxu0 %vm4659_vm7, %v4658_v32  ;;  %4344 = vmatprep.mubr.msk.bf16.mxu1 %vm4659_vm7, %v4658_v32 }
 0x237   : > { %4289 = vmatmul.mubr.msk.bf16.gmra.mxu0 %vm1995_vm8, %v4584_v24  ;;  %4345 = vmatmul.mubr.msk.bf16.gmra.mxu1 %vm1995_vm8, %v4585_v39 }
 0x238   : > { %4352 = vmatprep.mubr.msk.bf16.mxu0 %vm4659_vm7, %v4658_v32  ;;  %4408 = vmatprep.mubr.msk.bf16.mxu1 %vm4659_vm7, %v4658_v32 }
 0x23f   : > { %4353 = vmatmul.mubr.msk.bf16.vlgmr.msra.gmra.mxu0 %vm1995_vm8, %v4586_v40  ;;  %4409 = vmatmul.mubr.msk.bf16.vlgmr.msra.gmra.mxu1 %vm1995_vm8, %v4587_v17 }
 0x240   : > { %4356 = vmatprep.mubr.msk.bf16.mxu0 %vm4659_vm7, %v4658_v32  ;;  %4412 = vmatprep.mubr.msk.bf16.mxu1 %vm4659_vm7, %v4658_v32 }
 0x247   : > { %4357 = vmatmul.mubr.msk.bf16.gmra.mxu0 %vm1995_vm8, %v4588_v47  ;;  %4413 = vmatmul.mubr.msk.bf16.gmra.mxu1 %vm1995_vm8, %v4589_v43 }
 0x248   : > { %4360 = vmatprep.mubr.msk.bf16.mxu0 %vm4659_vm7, %v4658_v32  ;;  %4416 = vmatprep.mubr.msk.bf16.mxu1 %vm4659_vm7, %v4658_v32 }
 0x24f   : > { %4361 = vmatmul.mubr.msk.bf16.gmra.mxu0 %vm1995_vm8, %v4590_v29  ;;  %4417 = vmatmul.mubr.msk.bf16.gmra.mxu1 %vm1995_vm8, %v4591_v30 }
 0x250   : > { %4364 = vmatprep.mubr.msk.bf16.mxu0 %vm4659_vm7, %v4658_v32  ;;  %4420 = vmatprep.mubr.msk.bf16.mxu1 %vm4659_vm7, %v4658_v32 }
 0x257   : > { %4365 = vmatmul.mubr.msk.bf16.gmra.mxu0 %vm1995_vm8, %v4592_v45  ;;  %4421 = vmatmul.mubr.msk.bf16.gmra.mxu1 %vm1995_vm8, %v4593_v44 }
 0x258   : > { %4368 = vmatprep.mubr.msk.bf16.mxu0 %vm4659_vm7, %v4658_v32  ;;  %4424 = vmatprep.mubr.msk.bf16.mxu1 %vm4659_vm7, %v4658_v32 }
 0x25f   : > { %4369 = vmatmul.mubr.msk.bf16.gmra.mxu0 %vm1995_vm8, %v4594_v46  ;;  %4425 = vmatmul.mubr.msk.bf16.gmra.mxu1 %vm1995_vm8, %v4595_v48 }
 0x260   : > { %4372 = vmatprep.mubr.msk.bf16.mxu0 %vm4659_vm7, %v4658_v32  ;;  %4428 = vmatprep.mubr.msk.bf16.mxu1 %vm4659_vm7, %v4658_v32 }
 0x267   : > { %4373 = vmatmul.mubr.msk.bf16.gmra.mxu0 %vm1995_vm8, %v4596_v62  ;;  %4429 = vmatmul.mubr.msk.bf16.gmra.mxu1 %vm1995_vm8, %v4597_v51 }
 0x268   : > { %4376 = vmatprep.mubr.msk.bf16.mxu0 %vm4659_vm7, %v4658_v32  ;;  %4432 = vmatprep.mubr.msk.bf16.mxu1 %vm4659_vm7, %v4658_v32 }
 0x26f   : > { %4377 = vmatmul.mubr.msk.bf16.gmra.mxu0 %vm1995_vm8, %v4598_v9  ;;  %4433 = vmatmul.mubr.msk.bf16.gmra.mxu1 %vm1995_vm8, %v4599_v36 }
 0x270   : > { %4380 = vmatprep.mubr.msk.bf16.mxu0 %vm4659_vm7, %v4658_v32  ;;  %4436 = vmatprep.mubr.msk.bf16.mxu1 %vm4659_vm7, %v4658_v32 }
 0x277   : > { %4381 = vmatmul.mubr.msk.bf16.gmra.mxu0 %vm1995_vm8, %v4600_v63  ;;  %4437 = vmatmul.mubr.msk.bf16.gmra.mxu1 %vm1995_vm8, %v4601_v25 }
 0x278   : > { %4384 = vmatprep.mubr.msk.bf16.mxu0 %vm4659_vm7, %v4658_v32  ;;  %4440 = vmatprep.mubr.msk.bf16.mxu1 %vm4659_vm7, %v4658_v32 }
 0x27f   : > { %4385 = vmatmul.mubr.msk.bf16.gmra.mxu0 %vm1995_vm8, %v4602_v5  ;;  %4441 = vmatmul.mubr.msk.bf16.gmra.mxu1 %vm1995_vm8, %v4603_v34 }
 0x280   : > { %4388 = vmatprep.mubr.msk.bf16.mxu0 %vm4659_vm7, %v4658_v32  ;;  %4444 = vmatprep.mubr.msk.bf16.mxu1 %vm4659_vm7, %v4658_v32 }
 0x287   : > { %4389 = vmatmul.mubr.msk.bf16.gmra.mxu0 %vm1995_vm8, %v4604_v7  ;;  %4445 = vmatmul.mubr.msk.bf16.gmra.mxu1 %vm1995_vm8, %v4605_v8 }
 0x288   : > { %4392 = vmatprep.mubr.msk.bf16.mxu0 %vm4659_vm7, %v4658_v32  ;;  %4448 = vmatprep.mubr.msk.bf16.mxu1 %vm4659_vm7, %v4658_v32 }
 0x28f   : > { %4393 = vmatmul.mubr.msk.bf16.gmra.mxu0 %vm1995_vm8, %v4606_v37  ;;  %4449 = vmatmul.mubr.msk.bf16.gmra.mxu1 %vm1995_vm8, %v4607_v60 }
 0x290   : > { %4396 = vmatprep.mubr.msk.bf16.mxu0 %vm4659_vm7, %v4658_v32  ;;  %4452 = vmatprep.mubr.msk.bf16.mxu1 %vm4659_vm7, %v4658_v32 }
 0x297   : > { %v2069_v16 = vpop.f32.mrf.mxu0  ;;  %v2395_v57 = vpop.f32.mrf.mxu1  ;;  %4397 = vmatmul.mubr.msk.bf16.gmra.mxu0 %vm1995_vm8, %v4608_v4  ;;  %4453 = vmatmul.mubr.msk.bf16.gmra.mxu1 %vm1995_vm8, %v4609_v1 }
 0x298   : > { %v2177_v18 = vmul.f32 %v5562_v2, %v2069_v16  ;;  %v2497_v58 = vmul.f32 %v2395_v57, %v5562_v2  ;;  %4400 = vmatprep.mubr.msk.bf16.mxu0 %vm4659_vm7, %v4658_v32  ;;  %4456 = vmatprep.mubr.msk.bf16.mxu1 %vm4659_vm7, %v4658_v32 }
 0x299   : > { %v4242_v15 = vpop.f32.mrf.mxu0  ;;  %v4298_v20 = vpop.f32.mrf.mxu1 }
 0x29a   : > { %v5575_v38 = vadd.f32 %v5564_v14, %v2177_v18  ;;  %v5578_v55 = vadd.f32 %v2497_v58, %v5564_v14 }
 0x29b   : > { %v2072_v21 = vpop.f32.mrf.mxu0  ;;  %v2398_v19 = vpop.f32.mrf.mxu1 }
 0x29c   : > { %v2178_v27 = vmul.f32 %v5562_v2, %v2072_v21  ;;  %v2498_v28 = vmul.f32 %v2398_v19, %v5562_v2 }
 0x29d   : > { %v4243_v32 = vpop.f32.mrf.mxu0  ;;  %v4299_v61 = vpop.f32.mrf.mxu1 }
 0x29e   : > { %v5587_v41 = vadd.f32 %v5564_v14, %v2178_v27  ;;  %v5590_v35 = vadd.f32 %v2498_v28, %v5564_v14 }
 0x29f   : > { %v2077_v42 = vpop.f32.mrf.mxu0  ;;  %v2403_v24 = vpop.f32.mrf.mxu1  ;;  %4401 = vmatmul.mubr.msk.bf16.gmra.mxu0 %vm1995_vm8, %v4610_v23  ;;  %4457 = vmatmul.mubr.msk.bf16.gmra.mxu1 %vm1995_vm8, %v4611_v56 }
 0x2a0   : > { %v2179_v40 = vmul.f32 %v5562_v2, %v2077_v42  ;;  %v2499_v17 = vmul.f32 %v2403_v24, %v5562_v2 }
 0x2a1   : > { %v4246_v47 = vpop.f32.mrf.mxu0  ;;  %v4302_v43 = vpop.f32.mrf.mxu1 }
 0x2a2   : > { %v5599_v29 = vadd.f32 %v5564_v14, %v2179_v40  ;;  %v5602_v30 = vadd.f32 %v2499_v17, %v5564_v14 }
 0x2a3   : > { %v2080_v45 = vpop.f32.mrf.mxu0  ;;  %v2406_v44 = vpop.f32.mrf.mxu1 }
 0x2a4   : > { %v2180_v48 = vmul.f32 %v5562_v2, %v2080_v45  ;;  %v2500_v62 = vmul.f32 %v2406_v44, %v5562_v2 }
 0x2a5   : > { %v4247_v51 = vpop.f32.mrf.mxu0  ;;  %v4303_v52 = vpop.f32.mrf.mxu1 }
 0x2a6   : > { %v5609_v53 = vadd.f32 %v5564_v14, %v2180_v48  ;;  %v5612_v9 = vadd.f32 %v2500_v62, %v5564_v14 }
 0x2a7   : > { %v2085_v36 = vpop.f32.mrf.mxu0  ;;  %v2411_v54 = vpop.f32.mrf.mxu1 }
 0x2a8   : > { %v2181_v49 = vmul.f32 %v5562_v2, %v2085_v36  ;;  %v2501_v33 = vmul.f32 %v2411_v54, %v5562_v2 }
 0x2a9   : > { %v4250_v63 = vpop.f32.mrf.mxu0  ;;  %v4306_v25 = vpop.f32.mrf.mxu1 }
 0x2aa   : > { %v5619_v0 = vadd.f32 %v5564_v14, %v2181_v49  ;;  %v5622_v5 = vadd.f32 %v2501_v33, %v5564_v14 }
 0x2ab   : > { %v2088_v34 = vpop.f32.mrf.mxu0  ;;  %v2414_v7 = vpop.f32.mrf.mxu1 }
 0x2ac   : > { %v2182_v50 = vmul.f32 %v5562_v2, %v2088_v34  ;;  %v2502_v10 = vmul.f32 %v2414_v7, %v5562_v2 }
 0x2ad   : > { %v4251_v11 = vpop.f32.mrf.mxu0  ;;  %v4307_v12 = vpop.f32.mrf.mxu1 }
 0x2ae   : > { %v5629_v37 = vadd.f32 %v5564_v14, %v2182_v50  ;;  %v5632_v60 = vadd.f32 %v2502_v10, %v5564_v14 }
 0x2af   : > { %v2093_v31 = vpop.f32.mrf.mxu0  ;;  %v2419_v13 = vpop.f32.mrf.mxu1 }
 0x2b0   : > { %v2183_v26 = vmul.f32 %v5562_v2, %v2093_v31  ;;  %v2503_v3 = vmul.f32 %v2419_v13, %v5562_v2 }
 0x2b1   : > { %v4254_v4 = vpop.f32.mrf.mxu0  ;;  %v4310_v1 = vpop.f32.mrf.mxu1 }
 0x2b2   : > { %v5639_v16 = vadd.f32 %v5564_v14, %v2183_v26  ;;  %v5642_v57 = vadd.f32 %v2503_v3, %v5564_v14 }
 0x2b3   : > { %v2096_v18 = vpop.f32.mrf.mxu0  ;;  %v2422_v58 = vpop.f32.mrf.mxu1 }
 0x2b4   : > { %v2184_v20 = vmul.f32 %v5562_v2, %v2096_v18  ;;  %v2504_v21 = vmul.f32 %v2422_v58, %v5562_v2 }
 0x2b5   : > { %v4255_v19 = vpop.f32.mrf.mxu0  ;;  %v4311_v23 = vpop.f32.mrf.mxu1 }
 0x2b6   : > { %v5649_v56 = vadd.f32 %v5564_v14, %v2184_v20  ;;  %v5652_v27 = vadd.f32 %v2504_v21, %v5564_v14 }
 0x2b7   : > { %v2101_v28 = vpop.f32.mrf.mxu0  ;;  %v2427_v32 = vpop.f32.mrf.mxu1 }
 0x2b8   : > { %v2185_v42 = vmul.f32 %v5562_v2, %v2101_v28  ;;  %v2505_v24 = vmul.f32 %v2427_v32, %v5562_v2 }
 0x2b9   : > { %v4258_v40 = vpop.f32.mrf.mxu0  ;;  %v4314_v17 = vpop.f32.mrf.mxu1 }
 0x2ba   : > { %v5659_v47 = vadd.f32 %v5564_v14, %v2185_v42  ;;  %v5662_v43 = vadd.f32 %v2505_v24, %v5564_v14 }
 0x2bb   : > { %v2104_v45 = vpop.f32.mrf.mxu0  ;;  %v2430_v44 = vpop.f32.mrf.mxu1 }
 0x2bc   : > { %v2186_v62 = vmul.f32 %v5562_v2, %v2104_v45  ;;  %v2506_v51 = vmul.f32 %v2430_v44, %v5562_v2 }
 0x2bd   : > { %v4259_v52 = vpop.f32.mrf.mxu0  ;;  %v4315_v36 = vpop.f32.mrf.mxu1 }
 0x2be   : > { %v5669_v54 = vadd.f32 %v5564_v14, %v2186_v62  ;;  %v5672_v49 = vadd.f32 %v2506_v51, %v5564_v14 }
 0x2bf   : > { %v2109_v33 = vpop.f32.mrf.mxu0  ;;  %v2435_v63 = vpop.f32.mrf.mxu1 }
 0x2c0   : > { %v2187_v34 = vmul.f32 %v5562_v2, %v2109_v33  ;;  %v2507_v7 = vmul.f32 %v2435_v63, %v5562_v2 }
 0x2c1   : > { %v4262_v50 = vpop.f32.mrf.mxu0  ;;  %v4318_v10 = vpop.f32.mrf.mxu1 }
 0x2c2   : > { %v5679_v11 = vadd.f32 %v5564_v14, %v2187_v34  ;;  %v5682_v12 = vadd.f32 %v2507_v7, %v5564_v14 }
 0x2c3   : > { %v2112_v31 = vpop.f32.mrf.mxu0  ;;  %v2438_v13 = vpop.f32.mrf.mxu1 }
 0x2c4   : > { %v2188_v3 = vmul.f32 %v5562_v2, %v2112_v31  ;;  %v2508_v4 = vmul.f32 %v2438_v13, %v5562_v2 }
 0x2c5   : > { %v4263_v1 = vpop.f32.mrf.mxu0  ;;  %v4319_v18 = vpop.f32.mrf.mxu1 }
 0x2c6   : > { %v5689_v58 = vadd.f32 %v5564_v14, %v2188_v3  ;;  %v5692_v20 = vadd.f32 %v2508_v4, %v5564_v14 }
 0x2c7   : > { %v2117_v21 = vpop.f32.mrf.mxu0  ;;  %v2443_v19 = vpop.f32.mrf.mxu1 }
 0x2c8   : > { %v2189_v28 = vmul.f32 %v5562_v2, %v2117_v21  ;;  %v2509_v32 = vmul.f32 %v2443_v19, %v5562_v2 }
 0x2c9   : > { %v4266_v42 = vpop.f32.mrf.mxu0  ;;  %v4322_v24 = vpop.f32.mrf.mxu1 }
 0x2ca   : > { %v5699_v40 = vadd.f32 %v5564_v14, %v2189_v28  ;;  %v5702_v17 = vadd.f32 %v2509_v32, %v5564_v14 }
 0x2cb   : > { %v2120_v45 = vpop.f32.mrf.mxu0  ;;  %v2446_v44 = vpop.f32.mrf.mxu1 }
 0x2cc   : > { %v2190_v51 = vmul.f32 %v5562_v2, %v2120_v45  ;;  %v2510_v52 = vmul.f32 %v2446_v44, %v5562_v2 }
 0x2cd   : > { %v4267_v36 = vpop.f32.mrf.mxu0  ;;  %v4323_v33 = vpop.f32.mrf.mxu1 }
 0x2ce   : > { %v5709_v63 = vadd.f32 %v5564_v14, %v2190_v51  ;;  %v5712_v34 = vadd.f32 %v2510_v52, %v5564_v14 }
 0x2cf   : > { %v2125_v7 = vpop.f32.mrf.mxu0  ;;  %v2451_v50 = vpop.f32.mrf.mxu1 }
 0x2d0   : > { %v2191_v31 = vmul.f32 %v5562_v2, %v2125_v7  ;;  %v2511_v13 = vmul.f32 %v2451_v50, %v5562_v2 }
 0x2d1   : > { %v4270_v3 = vpop.f32.mrf.mxu0  ;;  %v4326_v4 = vpop.f32.mrf.mxu1 }
 0x2d2   : > { %v5719_v1 = vadd.f32 %v5564_v14, %v2191_v31  ;;  %v5722_v18 = vadd.f32 %v2511_v13, %v5564_v14 }
 0x2d3   : > { %v2128_v21 = vpop.f32.mrf.mxu0  ;;  %v2454_v19 = vpop.f32.mrf.mxu1 }
 0x2d4   : > { %v2192_v32 = vmul.f32 %v5562_v2, %v2128_v21  ;;  %v2512_v42 = vmul.f32 %v2454_v19, %v5562_v2 }
 0x2d5   : > { %v4271_v24 = vpop.f32.mrf.mxu0  ;;  %v4327_v45 = vpop.f32.mrf.mxu1 }
 0x2d6   : > { %v5729_v44 = vadd.f32 %v5564_v14, %v2192_v32  ;;  %v5732_v51 = vadd.f32 %v2512_v42, %v5564_v14 }
 0x2d7   : > { %v2133_v52 = vpop.f32.mrf.mxu0  ;;  %v2459_v36 = vpop.f32.mrf.mxu1 }
 0x2d8   : > { %v2193_v7 = vmul.f32 %v5562_v2, %v2133_v52  ;;  %v2513_v50 = vmul.f32 %v2459_v36, %v5562_v2 }
 0x2d9   : > { %v4274_v31 = vpop.f32.mrf.mxu0  ;;  %v4330_v13 = vpop.f32.mrf.mxu1 }
 0x2da   : > { %v5739_v3 = vadd.f32 %v5564_v14, %v2193_v7  ;;  %v5742_v4 = vadd.f32 %v2513_v50, %v5564_v14 }
 0x2db   : > { %v2136_v21 = vpop.f32.mrf.mxu0  ;;  %v2462_v19 = vpop.f32.mrf.mxu1 }
 0x2dc   : > { %v2194_v42 = vmul.f32 %v5562_v2, %v2136_v21  ;;  %v2514_v24 = vmul.f32 %v2462_v19, %v5562_v2 }
 0x2dd   : > { %v4275_v45 = vpop.f32.mrf.mxu0  ;;  %v4331_v52 = vpop.f32.mrf.mxu1 }
 0x2de   : > { %v5749_v36 = vadd.f32 %v5564_v14, %v2194_v42  ;;  %v5752_v7 = vadd.f32 %v2514_v24, %v5564_v14 }
 0x2df   : > { %v2141_v31 = vpop.f32.mrf.mxu0  ;;  %v2467_v50 = vpop.f32.mrf.mxu1 }
 0x2e0   : > { %v2195_v33 = vmul.f32 %v5562_v2, %v2141_v31  ;;  %v2515_v32 = vmul.f32 %v2467_v50, %v5562_v2 }
 0x2e1   : > { %v4278_v21 = vpop.f32.mrf.mxu0  ;;  %v4334_v28 = vpop.f32.mrf.mxu1 }
 0x2e2   : > { %v5759_v19 = vadd.f32 %v5564_v14, %v2195_v33  ;;  %v5762_v42 = vadd.f32 %v2515_v32, %v5564_v14 }
 0x2e3   : > { %v2144_v45 = vpop.f32.mrf.mxu0  ;;  %v2470_v24 = vpop.f32.mrf.mxu1 }
 0x2e4   : > { %v2196_v10 = vmul.f32 %v5562_v2, %v2144_v45  ;;  %v2516_v13 = vmul.f32 %v2470_v24, %v5562_v2 }
 0x2e5   : > { %v4279_v31 = vpop.f32.mrf.mxu0  ;;  %v4335_v62 = vpop.f32.mrf.mxu1 }
 0x2e6   : > { %v5769_v50 = vadd.f32 %v5564_v14, %v2196_v10  ;;  %v5772_v28 = vadd.f32 %v2516_v13, %v5564_v14 }
 0x2e7   : > { %v2149_v33 = vpop.f32.mrf.mxu0  ;;  %v2475_v32 = vpop.f32.mrf.mxu1 }
 0x2e8   : > { %v2197_v23 = vmul.f32 %v5562_v2, %v2149_v33  ;;  %v2517_v52 = vmul.f32 %v2475_v32, %v5562_v2 }
 0x2e9   : > { %v4282_v45 = vpop.f32.mrf.mxu0  ;;  %v4338_v26 = vpop.f32.mrf.mxu1 }
 0x2ea   : > { %v5779_v24 = vadd.f32 %v5564_v14, %v2197_v23  ;;  %v5782_v62 = vadd.f32 %v2517_v52, %v5564_v14 }
 0x2eb   : > { %v2152_v10 = vpop.f32.mrf.mxu0  ;;  %v2478_v13 = vpop.f32.mrf.mxu1 }
 0x2ec   : > { %v2198_v25 = vmul.f32 %v5562_v2, %v2152_v10  ;;  %v2518_v21 = vmul.f32 %v2478_v13, %v5562_v2 }
 0x2ed   : > { %v4283_v33 = vpop.f32.mrf.mxu0  ;;  %v4339_v48 = vpop.f32.mrf.mxu1 }
 0x2ee   : > { %v5789_v32 = vadd.f32 %v5564_v14, %v2198_v25  ;;  %v5792_v26 = vadd.f32 %v2518_v21, %v5564_v14 }
 0x2ef   : > { %v2157_v23 = vpop.f32.mrf.mxu0  ;;  %v2483_v52 = vpop.f32.mrf.mxu1 }
 0x2f0   : > { %v2199_v61 = vmul.f32 %v5562_v2, %v2157_v23  ;;  %v2519_v31 = vmul.f32 %v2483_v52, %v5562_v2 }
 0x2f1   : > { %v4286_v10 = vpop.f32.mrf.mxu0  ;;  %v4342_v15 = vpop.f32.mrf.mxu1 }
 0x2f2   : > { %v5799_v13 = vadd.f32 %v5564_v14, %v2199_v61  ;;  %v5802_v48 = vadd.f32 %v2519_v31, %v5564_v14 }
 0x2f3   : > { %v2160_v25 = vpop.f32.mrf.mxu0  ;;  %v2486_v21 = vpop.f32.mrf.mxu1 }
 0x2f4   : > { %6075 = vst [vmem:[#allocation4_spill] sm:$0xff] %v5802_v48  ;;  %v2200_v22 = vmul.f32 %v5562_v2, %v2160_v25  ;;  %v2520_v45 = vmul.f32 %v2486_v21, %v5562_v2  ;;  %v6081_v48 = vmax.f32 %v5587_v41, %v5590_v35  ;;  %v6082_v35 = vmax.f32 %v5599_v29, %v5602_v30 }
 0x2f5   : > { %v4287_v23 = vpop.f32.mrf.mxu0  ;;  %v4343_v8 = vpop.f32.mrf.mxu1  ;;  %v6083_v29 = vmax.f32 %v5609_v53, %v5612_v9  ;;  %v6084_v53 = vmax.f32 %v5619_v0, %v5622_v5  ;;  %v6085_v0 = vmax.f32 %v5629_v37, %v5632_v60  ;;  %v6086_v37 = vmax.f32 %v5639_v16, %v5642_v57 }
 0x2f6   : > { %v5809_v52 = vadd.f32 %v5564_v14, %v2200_v22  ;;  %v5812_v15 = vadd.f32 %v2520_v45, %v5564_v14  ;;  %v6087_v16 = vmax.f32 %v5649_v56, %v5652_v27  ;;  %v6088_v56 = vmax.f32 %v5659_v47, %v5662_v43 }
 0x2f7   : > { %v2165_v61 = vpop.f32.mrf.mxu0  ;;  %v2491_v31 = vpop.f32.mrf.mxu1  ;;  %v6089_v47 = vmax.f32 %v5669_v54, %v5672_v49  ;;  %v6090_v54 = vmax.f32 %v5679_v11, %v5682_v12  ;;  %v6091_v11 = vmax.f32 %v5689_v58, %v5692_v20  ;;  %v6092_v58 = vmax.f32 %v5699_v40, %v5702_v17 }
 0x2f8   : > { %6076 = vst [vmem:[#allocation5_spill] sm:$0xff] %v5809_v52  ;;  %6077 = vst [vmem:[#allocation6_spill] sm:$0xff] %v5812_v15  ;;  %v2201_v59 = vmul.f32 %v5562_v2, %v2165_v61  ;;  %v2521_v33 = vmul.f32 %v2491_v31, %v5562_v2  ;;  %v6093_v40 = vmax.f32 %v5709_v63, %v5712_v34 }
 0x2f9   : > { %v4290_v25 = vpop.f32.mrf.mxu0  ;;  %v4346_v46 = vpop.f32.mrf.mxu1  ;;  %v6094_v63 = vmax.f32 %v5719_v1, %v5722_v18  ;;  %v6095_v1 = vmax.f32 %v5729_v44, %v5732_v51  ;;  %v6096_v44 = vmax.f32 %v5739_v3, %v5742_v4  ;;  %v6097_v3 = vmax.f32 %v5749_v36, %v5752_v7 }
 0x2fa   : > { %v5819_v21 = vadd.f32 %v5564_v14, %v2201_v59  ;;  %v5822_v8 = vadd.f32 %v2521_v33, %v5564_v14  ;;  %v6098_v36 = vmax.f32 %v5759_v19, %v5762_v42  ;;  %v6099_v19 = vmax.f32 %v5769_v50, %v5772_v28 }
 0x2fb   : > { %v2168_v22 = vpop.f32.mrf.mxu0  ;;  %v2494_v45 = vpop.f32.mrf.mxu1  ;;  %v6100_v50 = vmax.f32 %v5779_v24, %v5782_v62  ;;  %v6101_v24 = vmax.f32 %v5789_v32, %v5792_v26  ;;  %v6102_v32 = vld [vmem:[#allocation4_spill] sm:$0xff] }
 0x2fc   : > { %6078 = vst [vmem:[#allocation7_spill] sm:$0xff] %v5819_v21  ;;  %6079 = vst [vmem:[#allocation8_spill] sm:$0xff] %v5822_v8  ;;  %v6080_v45 = vmax.f32 %v5575_v38, %v5578_v55  ;;  %v6103_v26 = vmax.f32 %v5799_v13, %v6102_v32 }
 0x2fd   : > { %v4291_v39 = vpop.f32.mrf.mxu0  ;;  %v4347_v6 = vpop.f32.mrf.mxu1 }
 0x2ff   : > { %v2734_v10 = vpop.f32.mrf.mxu0  ;;  %v3073_v15 = vpop.f32.mrf.mxu1  ;;  %v6104_v13 = vld [vmem:[#allocation5_spill] sm:$0xff] }
 0x300   : > { %v2836_v61 = vmul.f32 %v2734_v10, %v5562_v2  ;;  %v3175_v31 = vmul.f32 %v3073_v15, %v5562_v2 }
 0x301   : > { %v4354_v46 = vpop.f32.mrf.mxu0  ;;  %v4410_v25 = vpop.f32.mrf.mxu1 }
 0x302   : > { %v2861_v59 = vadd.f32 %v2836_v61, %v5564_v14  ;;  %v3200_v33 = vadd.f32 %v3175_v31, %v5564_v14 }
 0x303   : > { %v2737_v52 = vpop.f32.mrf.mxu0  ;;  %v3076_v22 = vpop.f32.mrf.mxu1 }
 0x304   : > { %v2886_v23 = vmax.f32 %v6080_v45, %v2861_v59  ;;  %v2837_v6 = vmul.f32 %v2737_v52, %v5562_v2  ;;  %v3176_v39 = vmul.f32 %v3076_v22, %v5562_v2 }
 0x305   : > { %v4355_v8 = vpop.f32.mrf.mxu0  ;;  %v4411_v10 = vpop.f32.mrf.mxu1 }
 0x306   : > { %v3225_v21 = vmax.f32 %v2886_v23, %v3200_v33  ;;  %v2862_v15 = vadd.f32 %v2837_v6, %v5564_v14  ;;  %v3201_v46 = vadd.f32 %v3176_v39, %v5564_v14 }
 0x307   : > { %v2742_v61 = vpop.f32.mrf.mxu0  ;;  %v3081_v31 = vpop.f32.mrf.mxu1 }
 0x308   : > { %v3250_v25 = vmax.f32 %v3225_v21, 0.0  ;;  %v2887_v38 = vmax.f32 %v6081_v48, %v2862_v15  ;;  %v2838_v55 = vmul.f32 %v2742_v61, %v5562_v2  ;;  %v3177_v52 = vmul.f32 %v3081_v31, %v5562_v2 }
 0x309   : > { %v4358_v8 = vpop.f32.mrf.mxu0  ;;  %v4414_v59 = vpop.f32.mrf.mxu1 }
 0x30a   : > { %v3867_v23 = vpack.c.bf16 %v3250_v25, %v3250_v25  ;;  %v3226_v33 = vmax.f32 %v2887_v38, %v3201_v46  ;;  %v2863_v22 = vadd.f32 %v2838_v55, %v5564_v14  ;;  %v3202_v45 = vadd.f32 %v3177_v52, %v5564_v14 }
 0x30b   : > { %v2745_v6 = vpop.f32.mrf.mxu0  ;;  %v3084_v21 = vpop.f32.mrf.mxu1 }
 0x30c   : > { %3377 = vst.msk [vmem:[%s4726_s29] sm:$0xf] %vm3376_vm9, %v3867_v23  ;;  %v3251_v41 = vmax.f32 %v3226_v33, 0.0  ;;  %v2888_v48 = vmax.f32 %v6082_v35, %v2863_v22  ;;  %v2839_v39 = vmul.f32 %v2745_v6, %v5562_v2  ;;  %v3178_v10 = vmul.f32 %v3084_v21, %v5562_v2 }
 0x30d   : > { %v4359_v15 = vpop.f32.mrf.mxu0  ;;  %v4415_v46 = vpop.f32.mrf.mxu1 }
 0x30e   : > { %v3868_v61 = vpack.c.bf16 %v3251_v41, %v3251_v41  ;;  %v3227_v31 = vmax.f32 %v2888_v48, %v3202_v45  ;;  %v2864_v25 = vadd.f32 %v2839_v39, %v5564_v14  ;;  %v3203_v38 = vadd.f32 %v3178_v10, %v5564_v14 }
 0x30f   : > { %v2750_v55 = vpop.f32.mrf.mxu0  ;;  %v3089_v52 = vpop.f32.mrf.mxu1 }
 0x310   : > { %3378 = vst.msk [vmem:[%s4726_s29 + $0x4] sm:$0xf] %vm3376_vm9, %v3868_v61  ;;  %v3252_v8 = vmax.f32 %v3227_v31, 0.0  ;;  %v2889_v30 = vmax.f32 %v6083_v29, %v2864_v25  ;;  %v2840_v59 = vmul.f32 %v2750_v55, %v5562_v2  ;;  %v3179_v23 = vmul.f32 %v3089_v52, %v5562_v2 }
 0x311   : > { %v4362_v33 = vpop.f32.mrf.mxu0  ;;  %v4418_v22 = vpop.f32.mrf.mxu1 }
 0x312   : > { %v3869_v45 = vpack.c.bf16 %v3252_v8, %v3252_v8  ;;  %v3228_v6 = vmax.f32 %v2889_v30, %v3203_v38  ;;  %v2865_v21 = vadd.f32 %v2840_v59, %v5564_v14  ;;  %v3204_v41 = vadd.f32 %v3179_v23, %v5564_v14 }
 0x313   : > { %v2753_v35 = vpop.f32.mrf.mxu0  ;;  %v3092_v48 = vpop.f32.mrf.mxu1 }
 0x314   : > { %3379 = vst.msk [vmem:[%s4726_s29 + $0x8] sm:$0xf] %vm3376_vm9, %v3869_v45  ;;  %v3253_v39 = vmax.f32 %v3228_v6, 0.0  ;;  %v2890_v9 = vmax.f32 %v6084_v53, %v2865_v21  ;;  %v2841_v10 = vmul.f32 %v2753_v35, %v5562_v2  ;;  %v3180_v15 = vmul.f32 %v3092_v48, %v5562_v2 }
 0x315   : > { %v4363_v46 = vpop.f32.mrf.mxu0  ;;  %v4419_v61 = vpop.f32.mrf.mxu1 }
 0x316   : > { %v3870_v31 = vpack.c.bf16 %v3253_v39, %v3253_v39  ;;  %v3229_v25 = vmax.f32 %v2890_v9, %v3204_v41  ;;  %v2866_v38 = vadd.f32 %v2841_v10, %v5564_v14  ;;  %v3205_v55 = vadd.f32 %v3180_v15, %v5564_v14 }
 0x317   : > { %v2758_v52 = vpop.f32.mrf.mxu0  ;;  %v3097_v8 = vpop.f32.mrf.mxu1 }
 0x318   : > { %3380 = vst.msk [vmem:[%s4726_s29 + $0xc] sm:$0xf] %vm3376_vm9, %v3870_v31  ;;  %v3254_v29 = vmax.f32 %v3229_v25, 0.0  ;;  %v2891_v5 = vmax.f32 %v6085_v0, %v2866_v38  ;;  %v2842_v30 = vmul.f32 %v2758_v52, %v5562_v2  ;;  %v3181_v59 = vmul.f32 %v3097_v8, %v5562_v2 }
 0x319   : > { %v4366_v23 = vpop.f32.mrf.mxu0  ;;  %v4422_v33 = vpop.f32.mrf.mxu1 }
 0x31a   : > { %v3871_v22 = vpack.c.bf16 %v3254_v29, %v3254_v29  ;;  %v3230_v45 = vmax.f32 %v2891_v5, %v3205_v55  ;;  %v2867_v6 = vadd.f32 %v2842_v30, %v5564_v14  ;;  %v3206_v21 = vadd.f32 %v3181_v59, %v5564_v14 }
 0x31b   : > { %v2761_v41 = vpop.f32.mrf.mxu0  ;;  %v3100_v35 = vpop.f32.mrf.mxu1 }
 0x31c   : > { %3381 = vst.msk [vmem:[%s4726_s29 + $0x10] sm:$0xf] %vm3376_vm9, %v3871_v22  ;;  %v3255_v48 = vmax.f32 %v3230_v45, 0.0  ;;  %v2892_v60 = vmax.f32 %v6086_v37, %v2867_v6  ;;  %v2843_v39 = vmul.f32 %v2761_v41, %v5562_v2  ;;  %v3182_v53 = vmul.f32 %v3100_v35, %v5562_v2 }
 0x31d   : > { %v4367_v9 = vpop.f32.mrf.mxu0  ;;  %v4423_v10 = vpop.f32.mrf.mxu1 }
 0x31e   : > { %v3872_v15 = vpack.c.bf16 %v3255_v48, %v3255_v48  ;;  %v3231_v46 = vmax.f32 %v2892_v60, %v3206_v21  ;;  %v2868_v61 = vadd.f32 %v2843_v39, %v5564_v14  ;;  %v3207_v31 = vadd.f32 %v3182_v53, %v5564_v14 }
 0x31f   : > { %v2766_v25 = vpop.f32.mrf.mxu0  ;;  %v3105_v38 = vpop.f32.mrf.mxu1 }
 0x320   : > { %3382 = vst.msk [vmem:[%s4726_s29 + $0x14] sm:$0xf] %vm3376_vm9, %v3872_v15  ;;  %v3256_v55 = vmax.f32 %v3231_v46, 0.0  ;;  %v2893_v57 = vmax.f32 %v6087_v16, %v2868_v61  ;;  %v2844_v52 = vmul.f32 %v2766_v25, %v5562_v2  ;;  %v3183_v8 = vmul.f32 %v3105_v38, %v5562_v2 }
 0x321   : > { %v4370_v29 = vpop.f32.mrf.mxu0  ;;  %v4426_v0 = vpop.f32.mrf.mxu1 }
 0x322   : > { %v3873_v5 = vpack.c.bf16 %v3256_v55, %v3256_v55  ;;  %v3232_v30 = vmax.f32 %v2893_v57, %v3207_v31  ;;  %v2869_v59 = vadd.f32 %v2844_v52, %v5564_v14  ;;  %v3208_v23 = vadd.f32 %v3183_v8, %v5564_v14 }
 0x323   : > { %v2769_v33 = vpop.f32.mrf.mxu0  ;;  %v3108_v22 = vpop.f32.mrf.mxu1 }
 0x324   : > { %3383 = vst.msk [vmem:[%s4726_s29 + $0x18] sm:$0xf] %vm3376_vm9, %v3873_v5  ;;  %v3257_v45 = vmax.f32 %v3232_v30, 0.0  ;;  %v2894_v27 = vmax.f32 %v6088_v56, %v2869_v59  ;;  %v2845_v6 = vmul.f32 %v2769_v33, %v5562_v2  ;;  %v3184_v21 = vmul.f32 %v3108_v22, %v5562_v2 }
 0x325   : > { %v4371_v41 = vpop.f32.mrf.mxu0  ;;  %v4427_v35 = vpop.f32.mrf.mxu1 }
 0x326   : > { %v3874_v48 = vpack.c.bf16 %v3257_v45, %v3257_v45  ;;  %v3233_v37 = vmax.f32 %v2894_v27, %v3208_v23  ;;  %v2870_v60 = vadd.f32 %v2845_v6, %v5564_v14  ;;  %v3209_v39 = vadd.f32 %v3184_v21, %v5564_v14 }
 0x327   : > { %v2774_v53 = vpop.f32.mrf.mxu0  ;;  %v3113_v9 = vpop.f32.mrf.mxu1 }
 0x328   : > { %3384 = vst.msk [vmem:[%s4726_s29 + $0x1c] sm:$0xf] %vm3376_vm9, %v3874_v48  ;;  %v3258_v10 = vmax.f32 %v3233_v37, 0.0  ;;  %v2895_v43 = vmax.f32 %v6089_v47, %v2870_v60  ;;  %v2846_v15 = vmul.f32 %v2774_v53, %v5562_v2  ;;  %v3185_v46 = vmul.f32 %v3113_v9, %v5562_v2 }
 0x329   : > { %v4374_v61 = vpop.f32.mrf.mxu0  ;;  %v4430_v31 = vpop.f32.mrf.mxu1 }
 0x32a   : > { %v3875_v25 = vpack.c.bf16 %v3258_v10, %v3258_v10  ;;  %v3234_v38 = vmax.f32 %v2895_v43, %v3209_v39  ;;  %v2871_v55 = vadd.f32 %v2846_v15, %v5564_v14  ;;  %v3210_v16 = vadd.f32 %v3185_v46, %v5564_v14 }
 0x32b   : > { %v2777_v57 = vpop.f32.mrf.mxu0  ;;  %v3116_v52 = vpop.f32.mrf.mxu1 }
 0x32c   : > { %3385 = vst.msk [vmem:[%s4726_s29 + $0x20] sm:$0xf] %vm3376_vm9, %v3875_v25  ;;  %v3259_v8 = vmax.f32 %v3234_v38, 0.0  ;;  %v2896_v49 = vmax.f32 %v6090_v54, %v2871_v55  ;;  %v2847_v29 = vmul.f32 %v2777_v57, %v5562_v2  ;;  %v3186_v0 = vmul.f32 %v3116_v52, %v5562_v2 }
 0x32d   : > { %v4375_v5 = vpop.f32.mrf.mxu0  ;;  %v4431_v30 = vpop.f32.mrf.mxu1 }
 0x32e   : > { %v3876_v59 = vpack.c.bf16 %v3259_v8, %v3259_v8  ;;  %v3235_v23 = vmax.f32 %v2896_v49, %v3210_v16  ;;  %v2872_v33 = vadd.f32 %v2847_v29, %v5564_v14  ;;  %v3211_v22 = vadd.f32 %v3186_v0, %v5564_v14 }
 0x32f   : > { %v2782_v45 = vpop.f32.mrf.mxu0  ;;  %v3121_v56 = vpop.f32.mrf.mxu1 }
 0x330   : > { %3386 = vst.msk [vmem:[%s4726_s29 + $0x24] sm:$0xf] %vm3376_vm9, %v3876_v59  ;;  %v3260_v27 = vmax.f32 %v3235_v23, 0.0  ;;  %v2897_v12 = vmax.f32 %v6091_v11, %v2872_v33  ;;  %v2848_v6 = vmul.f32 %v2782_v45, %v5562_v2  ;;  %v3187_v21 = vmul.f32 %v3121_v56, %v5562_v2 }
 0x331   : > { %v4378_v41 = vpop.f32.mrf.mxu0  ;;  %v4434_v35 = vpop.f32.mrf.mxu1 }
 0x332   : > { %v3877_v48 = vpack.c.bf16 %v3260_v27, %v3260_v27  ;;  %v3236_v37 = vmax.f32 %v2897_v12, %v3211_v22  ;;  %v2873_v60 = vadd.f32 %v2848_v6, %v5564_v14  ;;  %v3212_v39 = vadd.f32 %v3187_v21, %v5564_v14 }
 0x333   : > { %v2785_v53 = vpop.f32.mrf.mxu0  ;;  %v3124_v9 = vpop.f32.mrf.mxu1 }
 0x334   : > { %3387 = vst.msk [vmem:[%s4726_s29 + $0x28] sm:$0xf] %vm3376_vm9, %v3877_v48  ;;  %v3261_v10 = vmax.f32 %v3236_v37, 0.0  ;;  %v2898_v20 = vmax.f32 %v6092_v58, %v2873_v60  ;;  %v2849_v47 = vmul.f32 %v2785_v53, %v5562_v2  ;;  %v3188_v43 = vmul.f32 %v3124_v9, %v5562_v2 }
 0x335   : > { %v4379_v15 = vpop.f32.mrf.mxu0  ;;  %v4435_v46 = vpop.f32.mrf.mxu1 }
 0x336   : > { %v3878_v61 = vpack.c.bf16 %v3261_v10, %v3261_v10  ;;  %v3237_v31 = vmax.f32 %v2898_v20, %v3212_v39  ;;  %v2874_v25 = vadd.f32 %v2849_v47, %v5564_v14  ;;  %v3213_v38 = vadd.f32 %v3188_v43, %v5564_v14 }
 0x337   : > { %v2790_v55 = vpop.f32.mrf.mxu0  ;;  %v3129_v16 = vpop.f32.mrf.mxu1 }
 0x338   : > { %3388 = vst.msk [vmem:[%s4726_s29 + $0x2c] sm:$0xf] %vm3376_vm9, %v3878_v61  ;;  %v3262_v57 = vmax.f32 %v3237_v31, 0.0  ;;  %v2899_v17 = vmax.f32 %v6093_v40, %v2874_v25  ;;  %v2850_v52 = vmul.f32 %v2790_v55, %v5562_v2  ;;  %v3189_v8 = vmul.f32 %v3129_v16, %v5562_v2 }
 0x339   : > { %v4382_v54 = vpop.f32.mrf.mxu0  ;;  %v4438_v49 = vpop.f32.mrf.mxu1 }
 0x33a   : > { %v3879_v29 = vpack.c.bf16 %v3262_v57, %v3262_v57  ;;  %v3238_v0 = vmax.f32 %v2899_v17, %v3213_v38  ;;  %v2875_v5 = vadd.f32 %v2850_v52, %v5564_v14  ;;  %v3214_v30 = vadd.f32 %v3189_v8, %v5564_v14 }
 0x33b   : > { %v2793_v59 = vpop.f32.mrf.mxu0  ;;  %v3132_v23 = vpop.f32.mrf.mxu1 }
 0x33c   : > { %3389 = vst.msk [vmem:[%s4726_s29 + $0x30] sm:$0xf] %vm3376_vm9, %v3879_v29  ;;  %v3263_v33 = vmax.f32 %v3238_v0, 0.0  ;;  %v2900_v34 = vmax.f32 %v6094_v63, %v2875_v5  ;;  %v2851_v22 = vmul.f32 %v2793_v59, %v5562_v2  ;;  %v3190_v45 = vmul.f32 %v3132_v23, %v5562_v2 }
 0x33d   : > { %v4383_v56 = vpop.f32.mrf.mxu0  ;;  %v4439_v27 = vpop.f32.mrf.mxu1 }
 0x33e   : > { %v3880_v11 = vpack.c.bf16 %v3263_v33, %v3263_v33  ;;  %v3239_v12 = vmax.f32 %v2900_v34, %v3214_v30  ;;  %v2876_v6 = vadd.f32 %v2851_v22, %v5564_v14  ;;  %v3215_v21 = vadd.f32 %v3190_v45, %v5564_v14 }
 0x33f   : > { %v2798_v41 = vpop.f32.mrf.mxu0  ;;  %v3137_v35 = vpop.f32.mrf.mxu1 }
 0x340   : > { %3390 = vst.msk [vmem:[%s4726_s29 + $0x34] sm:$0xf] %vm3376_vm9, %v3880_v11  ;;  %v3264_v48 = vmax.f32 %v3239_v12, 0.0  ;;  %v2901_v18 = vmax.f32 %v6095_v1, %v2876_v6  ;;  %v2852_v37 = vmul.f32 %v2798_v41, %v5562_v2  ;;  %v3191_v60 = vmul.f32 %v3137_v35, %v5562_v2 }
 0x341   : > { %v4386_v39 = vpop.f32.mrf.mxu0  ;;  %v4442_v53 = vpop.f32.mrf.mxu1 }
 0x342   : > { %v3881_v9 = vpack.c.bf16 %v3264_v48, %v3264_v48  ;;  %v3240_v10 = vmax.f32 %v2901_v18, %v3215_v21  ;;  %v2877_v58 = vadd.f32 %v2852_v37, %v5564_v14  ;;  %v3216_v20 = vadd.f32 %v3191_v60, %v5564_v14 }
 0x343   : > { %v2801_v47 = vpop.f32.mrf.mxu0  ;;  %v3140_v43 = vpop.f32.mrf.mxu1 }
 0x344   : > { %3391 = vst.msk [vmem:[%s4726_s29 + $0x38] sm:$0xf] %vm3376_vm9, %v3881_v9  ;;  %v3265_v15 = vmax.f32 %v3240_v10, 0.0  ;;  %v2902_v51 = vmax.f32 %v6096_v44, %v2877_v58  ;;  %v2853_v46 = vmul.f32 %v2801_v47, %v5562_v2  ;;  %v3192_v61 = vmul.f32 %v3140_v43, %v5562_v2 }
 0x345   : > { %v4387_v31 = vpop.f32.mrf.mxu0  ;;  %v4443_v25 = vpop.f32.mrf.mxu1 }
 0x346   : > { %v3882_v38 = vpack.c.bf16 %v3265_v15, %v3265_v15  ;;  %v3241_v55 = vmax.f32 %v2902_v51, %v3216_v20  ;;  %v2878_v16 = vadd.f32 %v2853_v46, %v5564_v14  ;;  %v3217_v57 = vadd.f32 %v3192_v61, %v5564_v14 }
 0x347   : > { %v2806_v40 = vpop.f32.mrf.mxu0  ;;  %v3145_v17 = vpop.f32.mrf.mxu1 }
 0x348   : > { %3392 = vst.msk [vmem:[%s4726_s29 + $0x3c] sm:$0xf] %vm3376_vm9, %v3882_v38  ;;  %v3266_v52 = vmax.f32 %v3241_v55, 0.0  ;;  %v2903_v4 = vmax.f32 %v6097_v3, %v2878_v16  ;;  %v2854_v8 = vmul.f32 %v2806_v40, %v5562_v2  ;;  %v3193_v54 = vmul.f32 %v3145_v17, %v5562_v2 }
 0x349   : > { %v4390_v49 = vpop.f32.mrf.mxu0  ;;  %v4446_v29 = vpop.f32.mrf.mxu1 }
 0x34a   : > { %v3883_v0 = vpack.c.bf16 %v3266_v52, %v3266_v52  ;;  %v3242_v5 = vmax.f32 %v2903_v4, %v3217_v57  ;;  %v2879_v30 = vadd.f32 %v2854_v8, %v5564_v14  ;;  %v3218_v59 = vadd.f32 %v3193_v54, %v5564_v14 }
 0x34b   : > { %v2809_v23 = vpop.f32.mrf.mxu0  ;;  %v3148_v33 = vpop.f32.mrf.mxu1 }
 0x34c   : > { %3393 = vst.msk [vmem:[%s4726_s29 + $0x40] sm:$0xf] %vm3376_vm9, %v3883_v0  ;;  %v3267_v63 = vmax.f32 %v3242_v5, 0.0  ;;  %v2904_v7 = vmax.f32 %v6098_v36, %v2879_v30  ;;  %v2855_v34 = vmul.f32 %v2809_v23, %v5562_v2  ;;  %v3194_v22 = vmul.f32 %v3148_v33, %v5562_v2 }
 0x34d   : > { %v4391_v45 = vpop.f32.mrf.mxu0  ;;  %v4447_v56 = vpop.f32.mrf.mxu1 }
 0x34e   : > { %v3884_v27 = vpack.c.bf16 %v3267_v63, %v3267_v63  ;;  %v3243_v11 = vmax.f32 %v2904_v7, %v3218_v59  ;;  %v2880_v12 = vadd.f32 %v2855_v34, %v5564_v14  ;;  %v3219_v6 = vadd.f32 %v3194_v22, %v5564_v14  ;;  %v6105_v56 = vld [vmem:[#allocation6_spill] sm:$0xff] }
 0x34f   : > { %v2814_v21 = vpop.f32.mrf.mxu0  ;;  %v3153_v41 = vpop.f32.mrf.mxu1 }
 0x350   : > { %3394 = vst.msk [vmem:[%s4726_s29 + $0x44] sm:$0xf] %vm3376_vm9, %v3884_v27  ;;  %v3268_v35 = vmax.f32 %v3243_v11, 0.0  ;;  %v2905_v42 = vmax.f32 %v6099_v19, %v2880_v12  ;;  %v2856_v48 = vmul.f32 %v2814_v21, %v5562_v2  ;;  %v3195_v1 = vmul.f32 %v3153_v41, %v5562_v2 }
 0x351   : > { %v4394_v18 = vpop.f32.mrf.mxu0  ;;  %v4450_v37 = vpop.f32.mrf.mxu1  ;;  %v6106_v27 = vmax.f32 %v6104_v13, %v6105_v56 }
 0x352   : > { %v3885_v60 = vpack.c.bf16 %v3268_v35, %v3268_v35  ;;  %v3244_v39 = vmax.f32 %v2905_v42, %v3219_v6  ;;  %v2881_v53 = vadd.f32 %v2856_v48, %v5564_v14  ;;  %v3220_v9 = vadd.f32 %v3195_v1, %v5564_v14 }
 0x353   : > { %v2817_v10 = vpop.f32.mrf.mxu0  ;;  %v3156_v58 = vpop.f32.mrf.mxu1 }
 0x354   : > { %3395 = vst.msk [vmem:[%s4726_s29 + $0x48] sm:$0xf] %vm3376_vm9, %v3885_v60  ;;  %v3269_v20 = vmax.f32 %v3244_v39, 0.0  ;;  %v2906_v28 = vmax.f32 %v6100_v50, %v2881_v53  ;;  %v2857_v47 = vmul.f32 %v2817_v10, %v5562_v2  ;;  %v3196_v43 = vmul.f32 %v3156_v58, %v5562_v2  ;;  %v6107_v60 = vld [vmem:[#allocation7_spill] sm:$0xff]  ;;  %v6108_v39 = vld [vmem:[#allocation8_spill] sm:$0xff] }
 0x355   : > { %v4395_v15 = vpop.f32.mrf.mxu0  ;;  %v4451_v44 = vpop.f32.mrf.mxu1  ;;  %v6109_v53 = vmax.f32 %v6107_v60, %v6108_v39 }
 0x356   : > { %v3886_v51 = vpack.c.bf16 %v3269_v20, %v3269_v20  ;;  %v3245_v46 = vmax.f32 %v2906_v28, %v3220_v9  ;;  %v2882_v61 = vadd.f32 %v2857_v47, %v5564_v14  ;;  %v3221_v31 = vadd.f32 %v3196_v43, %v5564_v14 }
 0x357   : > { %v2822_v25 = vpop.f32.mrf.mxu0  ;;  %v3161_v38 = vpop.f32.mrf.mxu1 }
 0x358   : > { %3396 = vst.msk [vmem:[%s4726_s29 + $0x4c] sm:$0xf] %vm3376_vm9, %v3886_v51  ;;  %v3270_v55 = vmax.f32 %v3245_v46, 0.0  ;;  %v2907_v62 = vmax.f32 %v6101_v24, %v2882_v61  ;;  %v2858_v16 = vmul.f32 %v2822_v25, %v5562_v2  ;;  %v3197_v57 = vmul.f32 %v3161_v38, %v5562_v2 }
 0x359   : > { %v4398_v40 = vpop.f32.mrf.mxu0  ;;  %v4454_v17 = vpop.f32.mrf.mxu1 }
 0x35a   : > { %v3887_v52 = vpack.c.bf16 %v3270_v55, %v3270_v55  ;;  %v3246_v3 = vmax.f32 %v2907_v62, %v3221_v31  ;;  %v2883_v4 = vadd.f32 %v2858_v16, %v5564_v14  ;;  %v3222_v8 = vadd.f32 %v3197_v57, %v5564_v14 }
 0x35b   : > { %v2825_v54 = vpop.f32.mrf.mxu0  ;;  %v3164_v49 = vpop.f32.mrf.mxu1 }
 0x35c   : > { %3397 = vst.msk [vmem:[%s4726_s29 + $0x50] sm:$0xf] %vm3376_vm9, %v3887_v52  ;;  %v3271_v29 = vmax.f32 %v3246_v3, 0.0  ;;  %v2908_v0 = vmax.f32 %v6103_v26, %v2883_v4  ;;  %v2859_v5 = vmul.f32 %v2825_v54, %v5562_v2  ;;  %v3198_v30 = vmul.f32 %v3164_v49, %v5562_v2 }
 0x35d   : > { %v4399_v59 = vpop.f32.mrf.mxu0  ;;  %v4455_v23 = vpop.f32.mrf.mxu1 }
 0x35e   : > { %v3888_v33 = vpack.c.bf16 %v3271_v29, %v3271_v29  ;;  %v3247_v63 = vmax.f32 %v2908_v0, %v3222_v8  ;;  %v2884_v36 = vadd.f32 %v2859_v5, %v5564_v14  ;;  %v3223_v7 = vadd.f32 %v3198_v30, %v5564_v14 }
 0x35f   : > { %v2830_v34 = vpop.f32.mrf.mxu0  ;;  %v3169_v22 = vpop.f32.mrf.mxu1 }
 0x360   : > { %3398 = vst.msk [vmem:[%s4726_s29 + $0x54] sm:$0xf] %vm3376_vm9, %v3888_v33  ;;  %v3272_v45 = vmax.f32 %v3247_v63, 0.0  ;;  %v2909_v11 = vmax.f32 %v6106_v27, %v2884_v36  ;;  %v2860_v12 = vmul.f32 %v2830_v34, %v5562_v2  ;;  %v3199_v6 = vmul.f32 %v3169_v22, %v5562_v2 }
 0x361   : > { %v4402_v21 = vpop.f32.mrf.mxu0  ;;  %v4458_v41 = vpop.f32.mrf.mxu1 }
 0x362   : > { %v3889_v35 = vpack.c.bf16 %v3272_v45, %v3272_v45  ;;  %v3248_v19 = vmax.f32 %v2909_v11, %v3223_v7  ;;  %v2885_v42 = vadd.f32 %v2860_v12, %v5564_v14  ;;  %v3224_v48 = vadd.f32 %v3199_v6, %v5564_v14 }
 0x363   : > { %v2833_v1 = vpop.f32.mrf.mxu0  ;;  %v3172_v18 = vpop.f32.mrf.mxu1 }
 0x364   : > { %3399 = vst.msk [vmem:[%s4726_s29 + $0x58] sm:$0xf] %vm3376_vm9, %v3889_v35  ;;  %v3273_v37 = vmax.f32 %v3248_v19, 0.0  ;;  %v2910_v9 = vmax.f32 %v6109_v53, %v2885_v42 }
 0x365   : > { %v4403_v2 = vpop.f32.mrf.mxu0  ;;  %v4459_v10 = vpop.f32.mrf.mxu1 }
 0x366   : > { %v3890_v58 = vpack.c.bf16 %v3273_v37, %v3273_v37  ;;  %v3249_v20 = vmax.f32 %v2910_v9, %v3224_v48 }
 0x368   : > { %3400 = vst.msk [vmem:[%s4726_s29 + $0x5c] sm:$0xf] %vm3376_vm9, %v3890_v58  ;;  %v3274_v50 = vmax.f32 %v3249_v20, 0.0 }
 0x36a   : > { %v3891_v28 = vpack.c.bf16 %v3274_v50, %v3274_v50 }
 0x36c   : > { %3402 = vst.msk [vmem:[%s4726_s29 + $0x60] sm:$0x3] %vm3401_vm10, %v3891_v28 }
 0x36d PF: > { %s14_s19 = sadd.s32 1, %s4652_s19   ;;  %s6110_s15 = smov %s4644_s17 }
 0x36e   : > { %p11_p11 = scmp.ge.s32.totalorder %s14_s19, 6   ;;  %s6111_s16 = smov %s4648_s18 }
 0x36f   : > { %s6112_s17 = smov %s6115_s20  ;;  %s6113_s18 = smov %s6119_s21 }
 0x370   :  { %13 = sbr.rel (!%p11_p11) target bundleno = 3 (0x3), region = 84 }

// kernel: lenet5_forward.4
= control target key start
LH: loop header
LB: loop body
LE: loop exit
PB: predicated region body
PF: predicated region fallthrough
CT: control target
= control target key end

     0   :  { %s1578_s15 = smov 0   ;;  %s1580_s16 = smov 0   ;;  %s2057_s0 = inlined_call_operand.vmem [shape: bf16[2,4,25,160], index: 0, kind: input, shape index: {}]   ;;  %s2058_s1 = inlined_call_operand.vmem [shape: bf16[160,16], index: 1, kind: input, shape index: {}]   ;;  %s2059_s2 = inlined_call_operand.vmem [shape: f32[1,16], index: 2, kind: input, shape index: {}]   ;;  %s2060_s3 = inlined_call_operand.vmem [shape: f32[1,16], index: 3, kind: input, shape index: {}]   ;;  %s2061_s4 = inlined_call_operand.vmem [shape: bf16[2,25,16], index: 4, kind: output, shape index: {}]  }
   0x1   :  { %s1582_s17 = smov 0   ;;  %s1584_s18 = smov 0  }
   0x2   :  { %s1586_s19 = smov 0  }
   0x3 LB: > { %s23_s20 = sadd.s32 1, %s1540_s17  ;;  %s26_s21 = sadd.s32 1, %s1544_s18  ;;  %s1548_s19 = sphi %s1586_s19, %s14_s19   ;;  %s1544_s18 = sphi %s1584_s18, %s2065_s18   ;;  %s1540_s17 = sphi %s1582_s17, %s2064_s17   ;;  %s1536_s16 = sphi %s1580_s16, %s2063_s16   ;;  %s1532_s15 = sphi %s1578_s15, %s2062_s15  }
   0x4   : > { %p24_p0 = scmp.ge.s32.totalorder %s23_s20, 2  ;;  %p1306_p1 = scmp.ge.s32.totalorder %s1548_s19, 1 }
   0x5   : > { %p174_p2 = scmp.lt.s32.totalorder %s1548_s19, 5 }
   0x6   : > { %s2067_s20 = smov (%p24_p0, %s23_s20), 0  ;;  %s2069_s21 = smov (!%p24_p0, %s26_s21), %s1544_s18 }
   0x7   : > { %p175_p3 = pnand %p1306_p1, %p174_p2  ;;  %p28_p4 = scmp.ge.s32.totalorder %s2069_s21, 2 }
   0x8   : > { %p200_p5 = scmp.lt.s32.totalorder (!%p175_p3), %s1532_s15, 1  ;;  %p211_p6 = scmp.eq.s32.totalorder (!%p175_p3), %s1536_s16, 0 }
   0x9   : > { %s2071_s21 = smov (%p28_p4, %s2069_s21), 0  ;;  %178 = sbr.rel (%p175_p3) target bundleno = 651 (0x28b), region = 36 }
   0xa   : > { %p212_p7 = scmp.eq.s32.totalorder (!%p175_p3), %s1532_s15, 0 }
   0xc   : > { %p213_p8 = pnand (!%p175_p3), %p212_p7, %p211_p6 }
   0xe   : > { %s2073_s15 = smov (!%p200_p5, %s1532_s15), 1  ;;  %216 = sbr.rel (%p213_p8) target bundleno = 21 (0x15), region = 40 }
   0xf   : > { %s1411_s22 = sshll.u32 %s2073_s15, 7  ;;  %s1412_s23 = sshll.u32 %s2073_s15, 4 }
  0x10   : > { %s1614_s26 = scalar_lea.vmem %s2057_s0, %s1411_s22  ;;  %s1619_s29 = scalar_lea.vmem %s2061_s4, %s1412_s23 }
  0x13   : > { %vm217_vm0 = vcmask 122880   ;;  %v1550_v0 = vmov 0.0  }
  0x14   : > { %218 = vst.msk [vmem:[#allocation2] sm:$0x1] %vm217_vm0, %v1550_v0  ;;  %219 = vst.msk [vmem:[#allocation3] sm:$0x1] %vm217_vm0, %v1550_v0 }
  0x15 PF: > { %v1624_v1 = vld [vmem:[%s2058_s1] sm:$0xf]  ;;  %v1629_v2 = vld [vmem:[%s2058_s1 + $0x4] sm:$0xf]  ;;  %v1634_v3 = vld [vmem:[%s2058_s1 + $0x8] sm:$0xf] }
  0x16   : > { %v1639_v4 = vld [vmem:[%s2058_s1 + $0xc] sm:$0xf]  ;;  %v1644_v5 = vld [vmem:[%s2058_s1 + $0x10] sm:$0xf]  ;;  %v1649_v6 = vld [vmem:[%s2058_s1 + $0x14] sm:$0xf] }
  0x17   : > { %v1654_v7 = vld [vmem:[%s2058_s1 + $0x18] sm:$0xf]  ;;  %v1659_v8 = vld [vmem:[%s2058_s1 + $0x1c] sm:$0xf]  ;;  %v1664_v9 = vld [vmem:[%s2058_s1 + $0x20] sm:$0xf] }
  0x18   : > { %v1669_v10 = vld [vmem:[%s2058_s1 + $0x24] sm:$0xf]  ;;  %v1674_v11 = vld [vmem:[%s2058_s1 + $0x28] sm:$0xf]  ;;  %v1679_v12 = vld [vmem:[%s2058_s1 + $0x2c] sm:$0xf] }
  0x19   : > { %v1684_v13 = vld [vmem:[%s2058_s1 + $0x30] sm:$0xf]  ;;  %v1689_v14 = vld [vmem:[%s2058_s1 + $0x34] sm:$0xf]  ;;  %v1694_v15 = vld [vmem:[%s2058_s1 + $0x38] sm:$0xf] }
  0x1a   : > { %v1699_v16 = vld [vmem:[%s2058_s1 + $0x3c] sm:$0xf]  ;;  %v1704_v17 = vld [vmem:[%s2058_s1 + $0x40] sm:$0xf]  ;;  %v1709_v18 = vld [vmem:[%s2058_s1 + $0x44] sm:$0xf] }
  0x1b   : > { %v1714_v19 = vld [vmem:[%s2058_s1 + $0x48] sm:$0xf]  ;;  %v1719_v20 = vld [vmem:[%s2058_s1 + $0x4c] sm:$0xf]  ;;  %p1311_p9 = scmp.ne.s32.totalorder %s1536_s16, 0 }
  0x1d   : > { %242 = sbr.rel (%p1311_p9) target bundleno = 344 (0x158), region = 44 }
  0x22   : > { %v1724_v21 = vcombine.low %v1694_v15, %v1699_v16  ;;  %v1551_v22 = vmov 0   ;;  %v1462_v23 = vld [vmem:[%s1614_s26 + $0x4] ss:$8 sps:$4 sm:$0xff]   ;;  %vm325_vm1 = vcmask 261120   ;;  %v1733_v24 = vcombine.low %v1684_v13, %v1689_v14  ;;  %v1460_v34 = vld [vmem:[%s1614_s26] ss:$8 sps:$4 sm:$0xff]  }
  0x23   : > { %332 = vmatprep.subr.bf16.mxu0 %v1551_v22  ;;  %444 = vmatprep.subr.bf16.mxu1 %v1551_v22  ;;  %v1465_v25 = vld [vmem:[%s1614_s26 + $0x24] ss:$8 sps:$4 sm:$0xff]   ;;  %v1744_v26 = vcombine.low %v1674_v11, %v1679_v12  ;;  %v1752_v27 = vcombine.low %v1664_v9, %v1669_v10  ;;  %v1760_v28 = vcombine.low %v1654_v7, %v1659_v8  ;;  %v1463_v35 = vld [vmem:[%s1614_s26 + $0x20] ss:$8 sps:$4 sm:$0xff]   ;;  %vm387_vm2 = vcmask 122880  }
  0x24   : > { %333 = vmatpush1.bf16.msra.mxu0 %v1724_v21  ;;  %445 = vmatpush1.bf16.msra.mxu1 %v1724_v21  ;;  %v1768_v29 = vcombine.low %v1644_v5, %v1649_v6  ;;  %v1317_v30 = vcombine.low %v1634_v3, %v1639_v4  ;;  %v1316_v31 = vcombine.low %v1624_v1, %v1629_v2  ;;  %v1466_v36 = vld [vmem:[%s1614_s26 + $0x14] ss:$8 sps:$4 sm:$0x1f]   ;;  %v1470_v38 = vld [vmem:[%s1614_s26 + $0x10] ss:$8 sps:$4 sm:$0x1f]  }
  0x25   : > { %334 = vmatprep.subr.bf16.mxu0 %v1551_v22  ;;  %446 = vmatprep.subr.bf16.mxu1 %v1551_v22  ;;  %v1325_v32 = vcombine.low %v1714_v19, %v1719_v20  ;;  %v1324_v33 = vcombine.low %v1704_v17, %v1709_v18  ;;  %v1468_v37 = vld [vmem:[%s1614_s26 + $0x34] ss:$8 sps:$4 sm:$0x1f]   ;;  %v1471_v39 = vld [vmem:[%s1614_s26 + $0x30] ss:$8 sps:$4 sm:$0x1f]  }
  0x26   : > { %1326 = vmatprep.mubr.msk.bf16.mxu0 %vm325_vm1, %v1462_v23  ;;  %1336 = vmatprep.mubr.msk.bf16.mxu1 %vm325_vm1, %v1465_v25  ;;  %v1474_v40 = vld [vmem:[%s1614_s26 + $0x44] ss:$8 sps:$4 sm:$0xff]   ;;  %v1472_v42 = vld [vmem:[%s1614_s26 + $0x40] ss:$8 sps:$4 sm:$0xff]   ;;  %vm756_vm3 = vsmask.f32 256 }
  0x27   : > { %v1477_v41 = vld [vmem:[%s1614_s26 + $0x64] ss:$8 sps:$4 sm:$0xff]   ;;  %v1475_v43 = vld [vmem:[%s1614_s26 + $0x60] ss:$8 sps:$4 sm:$0xff]   ;;  %vm757_vm4 = vmand %vm387_vm2, %vm756_vm3  ;;  %vm751_vm5 = vcmask 125952   ;;  %vm381_vm6 = vcmask 130048  }
  0x28   : > { %335 = vmatpush1.bf16.msra.mxu0 %v1733_v24  ;;  %447 = vmatpush1.bf16.msra.mxu1 %v1733_v24  ;;  %v1478_v44 = vld [vmem:[%s1614_s26 + $0x54] ss:$8 sps:$4 sm:$0x1f]   ;;  %v1482_v46 = vld [vmem:[%s1614_s26 + $0x50] ss:$8 sps:$4 sm:$0x1f]  }
  0x29   : > { %336 = vmatprep.subr.bf16.mxu0 %v1551_v22  ;;  %448 = vmatprep.subr.bf16.mxu1 %v1551_v22  ;;  %v1480_v45 = vld [vmem:[%s1614_s26 + $0x74] ss:$8 sps:$4 sm:$0x1f]   ;;  %v1483_v47 = vld [vmem:[%s1614_s26 + $0x70] ss:$8 sps:$4 sm:$0x1f]  }
  0x2a   : > { %v758_v48 = vld [vmem:[%s1619_s29 + $0xc] sm:$0x1]  ;;  %752 = vst.msk [vmem:[%s1619_s29] sm:$0xf] %vm751_vm5, %v1551_v22  ;;  %753 = vst.msk [vmem:[%s1619_s29 + $0x4] sm:$0xf] %vm751_vm5, %v1551_v22 }
  0x2b   : > { %v759_v49 = vsel %vm757_vm4, 0, %v758_v48  ;;  %754 = vst.msk [vmem:[%s1619_s29 + $0x8] sm:$0xf] %vm751_vm5, %v1551_v22 }
  0x2c   : > { %337 = vmatpush1.bf16.msra.mxu0 %v1744_v26  ;;  %449 = vmatpush1.bf16.msra.mxu1 %v1744_v26  ;;  %760 = vst [vmem:[%s1619_s29 + $0xc] sm:$0x1] %v759_v49 }
  0x2d   : > { %338 = vmatprep.subr.bf16.mxu0 %v1551_v22  ;;  %450 = vmatprep.subr.bf16.mxu1 %v1551_v22 }
  0x30   : > { %339 = vmatpush1.bf16.msra.mxu0 %v1752_v27  ;;  %451 = vmatpush1.bf16.msra.mxu1 %v1752_v27 }
  0x31   : > { %340 = vmatprep.subr.bf16.mxu0 %v1551_v22  ;;  %452 = vmatprep.subr.bf16.mxu1 %v1551_v22 }
  0x34   : > { %341 = vmatpush1.bf16.msra.mxu0 %v1760_v28  ;;  %453 = vmatpush1.bf16.msra.mxu1 %v1760_v28 }
  0x35   : > { %342 = vmatprep.subr.bf16.mxu0 %v1551_v22  ;;  %454 = vmatprep.subr.bf16.mxu1 %v1551_v22 }
  0x38   : > { %343 = vmatpush1.bf16.msra.mxu0 %v1768_v29  ;;  %455 = vmatpush1.bf16.msra.mxu1 %v1768_v29 }
  0x39   : > { %344 = vmatprep.subr.bf16.mxu0 %v1551_v22  ;;  %456 = vmatprep.subr.bf16.mxu1 %v1551_v22 }
  0x3c   : > { %345 = vmatpush1.bf16.msra.mxu0 %v1317_v30  ;;  %457 = vmatpush1.bf16.msra.mxu1 %v1317_v30 }
  0x3d   : > { %346 = vmatprep.subr.bf16.mxu0 %v1551_v22  ;;  %458 = vmatprep.subr.bf16.mxu1 %v1551_v22 }
  0x40   : > { %347 = vmatpush1.bf16.msra.mxu0 %v1316_v31  ;;  %459 = vmatpush1.bf16.msra.mxu1 %v1316_v31 }
  0x41   : > { %360 = vmatprep.subr.bf16.mxu0 %v1551_v22  ;;  %472 = vmatprep.subr.bf16.mxu1 %v1551_v22 }
  0x44   : > { %361 = vmatpush2.bf16.msra.mxu0 %v1325_v32  ;;  %473 = vmatpush2.bf16.msra.mxu1 %v1325_v32 }
  0x45   : > { %362 = vmatprep.subr.bf16.mxu0 %v1551_v22  ;;  %474 = vmatprep.subr.bf16.mxu1 %v1551_v22 }
  0x48   : > { %363 = vmatpush2.bf16.msra.mxu0 %v1324_v33  ;;  %475 = vmatpush2.bf16.msra.mxu1 %v1324_v33 }
  0x49   : > { %554 = vmatprep.subr.bf16.mxu0 %v1551_v22  ;;  %664 = vmatprep.subr.bf16.mxu1 %v1551_v22 }
  0x4b   : > { %365 = vmatmul.mubr.bf16.vlgmr.msra.gmra.mxu0 %v1460_v34  ;;  %477 = vmatmul.mubr.bf16.vlgmr.msra.gmra.mxu1 %v1463_v35 }
  0x4c   : > { %555 = vmatpush1.bf16.msra.mxu0 %v1724_v21  ;;  %665 = vmatpush1.bf16.msra.mxu1 %v1724_v21 }
  0x4d   : > { %556 = vmatprep.subr.bf16.mxu0 %v1551_v22  ;;  %666 = vmatprep.subr.bf16.mxu1 %v1551_v22 }
  0x4e   : > { %1327 = vmatprep.mubr.msk.bf16.mxu0 %vm325_vm1, %v1466_v36  ;;  %1337 = vmatprep.mubr.msk.bf16.mxu1 %vm325_vm1, %v1468_v37 }
  0x50   : > { %557 = vmatpush1.bf16.msra.mxu0 %v1733_v24  ;;  %667 = vmatpush1.bf16.msra.mxu1 %v1733_v24 }
  0x51   : > { %558 = vmatprep.subr.bf16.mxu0 %v1551_v22  ;;  %668 = vmatprep.subr.bf16.mxu1 %v1551_v22 }
  0x53   : > { %373 = vmatmul.mubr.bf16.gmra.mxu0 %v1470_v38  ;;  %485 = vmatmul.mubr.bf16.gmra.mxu1 %v1471_v39 }
  0x54   : > { %559 = vmatpush1.bf16.msra.mxu0 %v1744_v26  ;;  %669 = vmatpush1.bf16.msra.mxu1 %v1744_v26 }
  0x55   : > { %560 = vmatprep.subr.bf16.mxu0 %v1551_v22  ;;  %670 = vmatprep.subr.bf16.mxu1 %v1551_v22 }
  0x56   : > { %1346 = vmatprep.mubr.msk.bf16.mxu0 %vm325_vm1, %v1474_v40  ;;  %1356 = vmatprep.mubr.msk.bf16.mxu1 %vm325_vm1, %v1477_v41 }
  0x58   : > { %561 = vmatpush1.bf16.msra.mxu0 %v1752_v27  ;;  %671 = vmatpush1.bf16.msra.mxu1 %v1752_v27 }
  0x59   : > { %562 = vmatprep.subr.bf16.mxu0 %v1551_v22  ;;  %672 = vmatprep.subr.bf16.mxu1 %v1551_v22 }
  0x5c   : > { %563 = vmatpush1.bf16.msra.mxu0 %v1760_v28  ;;  %673 = vmatpush1.bf16.msra.mxu1 %v1760_v28 }
  0x5d   : > { %564 = vmatprep.subr.bf16.mxu0 %v1551_v22  ;;  %674 = vmatprep.subr.bf16.mxu1 %v1551_v22 }
  0x60   : > { %565 = vmatpush1.bf16.msra.mxu0 %v1768_v29  ;;  %675 = vmatpush1.bf16.msra.mxu1 %v1768_v29 }
  0x61   : > { %566 = vmatprep.subr.bf16.mxu0 %v1551_v22  ;;  %676 = vmatprep.subr.bf16.mxu1 %v1551_v22 }
  0x64   : > { %567 = vmatpush1.bf16.msra.mxu0 %v1317_v30  ;;  %677 = vmatpush1.bf16.msra.mxu1 %v1317_v30 }
  0x65   : > { %568 = vmatprep.subr.bf16.mxu0 %v1551_v22  ;;  %678 = vmatprep.subr.bf16.mxu1 %v1551_v22 }
  0x68   : > { %569 = vmatpush1.bf16.msra.mxu0 %v1316_v31  ;;  %679 = vmatpush1.bf16.msra.mxu1 %v1316_v31 }
  0x69   : > { %582 = vmatprep.subr.bf16.mxu0 %v1551_v22  ;;  %692 = vmatprep.subr.bf16.mxu1 %v1551_v22 }
  0x6c   : > { %583 = vmatpush2.bf16.msra.mxu0 %v1325_v32  ;;  %693 = vmatpush2.bf16.msra.mxu1 %v1325_v32 }
  0x6d   : > { %584 = vmatprep.subr.bf16.mxu0 %v1551_v22  ;;  %694 = vmatprep.subr.bf16.mxu1 %v1551_v22 }
  0x70   : > { %585 = vmatpush2.bf16.msra.mxu0 %v1324_v33  ;;  %695 = vmatpush2.bf16.msra.mxu1 %v1324_v33 }
  0x73   : > { %587 = vmatmul.mubr.bf16.vlgmr.msra.gmra.mxu0 %v1472_v42  ;;  %697 = vmatmul.mubr.bf16.vlgmr.msra.gmra.mxu1 %v1475_v43 }
  0x74   : > { %1347 = vmatprep.mubr.msk.bf16.mxu0 %vm325_vm1, %v1478_v44  ;;  %1357 = vmatprep.mubr.msk.bf16.mxu1 %vm325_vm1, %v1480_v45 }
  0x7b   : > { %595 = vmatmul.mubr.bf16.gmra.mxu0 %v1482_v46  ;;  %705 = vmatmul.mubr.bf16.gmra.mxu1 %v1483_v47 }
 0x10b   : > { %v366_v50 = vpop.f32.mrf.mxu0  ;;  %v478_v51 = vpop.f32.mrf.mxu1 }
 0x10c   : > { %v382_v24 = vsel %vm381_vm6, %v366_v50, 0.0  ;;  %v397_v25 = vmul.f32 %v366_v50, %v366_v50  ;;  %v493_v28 = vsel %vm381_vm6, %v478_v51, 0.0  ;;  %v507_v29 = vmul.f32 %v478_v51, %v478_v51 }
 0x10d   : > { %v368_v52 = vpop.f32.mrf.mxu0  ;;  %v480_v53 = vpop.f32.mrf.mxu1 }
 0x10e   : > { %v401_v37 = vsel %vm381_vm6, %v397_v25, 0.0  ;;  %v511_v41 = vsel %vm381_vm6, %v507_v29, 0.0 }
 0x10f   : > { %v369_v54 = vpop.f32.mrf.mxu0  ;;  %v481_v55 = vpop.f32.mrf.mxu1 }
 0x110   : > { %v383_v23 = vsel %vm381_vm6, %v369_v54, 0.0  ;;  %v398_v22 = vmul.f32 %v369_v54, %v369_v54  ;;  %v494_v31 = vsel %vm381_vm6, %v481_v55, 0.0  ;;  %v508_v33 = vmul.f32 %v481_v55, %v481_v55 }
 0x111   : > { %v371_v56 = vpop.f32.mrf.mxu0  ;;  %v483_v57 = vpop.f32.mrf.mxu1  ;;  %v384_v30 = vadd.f32 %v383_v23, %v382_v24  ;;  %v495_v43 = vadd.f32 %v494_v31, %v493_v28 }
 0x112   : > { %v402_v32 = vsel %vm381_vm6, %v398_v22, 0.0  ;;  %v512_v45 = vsel %vm381_vm6, %v508_v33, 0.0 }
 0x113   : > { %v374_v58 = vpop.f32.mrf.mxu0  ;;  %v486_v59 = vpop.f32.mrf.mxu1  ;;  %v403_v42 = vadd.f32 %v402_v32, %v401_v37  ;;  %v513_v52 = vadd.f32 %v512_v45, %v511_v41 }
 0x114   : > { %v385_v26 = vsel %vm381_vm6, %v374_v58, 0.0  ;;  %v399_v27 = vmul.f32 %v374_v58, %v374_v58  ;;  %v496_v39 = vsel %vm381_vm6, %v486_v59, 0.0  ;;  %v509_v40 = vmul.f32 %v486_v59, %v486_v59 }
 0x115   : > { %v376_v60 = vpop.f32.mrf.mxu0  ;;  %v488_v61 = vpop.f32.mrf.mxu1  ;;  %v386_v36 = vadd.f32 %v385_v26, %v384_v30  ;;  %v497_v50 = vadd.f32 %v496_v39, %v495_v43 }
 0x116   : > { %v404_v38 = vsel %vm381_vm6, %v399_v27, 0.0  ;;  %v514_v51 = vsel %vm381_vm6, %v509_v40, 0.0 }
 0x117   : > { %v377_v62 = vpop.f32.mrf.mxu0  ;;  %v489_v63 = vpop.f32.mrf.mxu1  ;;  %v405_v49 = vadd.f32 %v404_v38, %v403_v42  ;;  %v515_v57 = vadd.f32 %v514_v51, %v513_v52 }
 0x118   : > { %v388_v34 = vsel %vm387_vm2, %v377_v62, 0.0  ;;  %v400_v35 = vmul.f32 %v377_v62, %v377_v62  ;;  %v498_v47 = vsel %vm387_vm2, %v489_v63, 0.0  ;;  %v510_v48 = vmul.f32 %v489_v63, %v489_v63 }
 0x119   : > { %v379_v0 = vpop.f32.mrf.mxu0  ;;  %v491_v21 = vpop.f32.mrf.mxu1  ;;  %v389_v44 = vadd.f32 %v388_v34, %v386_v36  ;;  %v499_v55 = vadd.f32 %v498_v47, %v497_v50 }
 0x11a   : > { %v406_v46 = vsel %vm387_vm2, %v400_v35, 0.0  ;;  %v516_v56 = vsel %vm387_vm2, %v510_v48, 0.0 }
 0x11b   : > { %v390_v53 = vrot.slane %v389_v44, 4  ;;  %v407_v54 = vadd.f32 %v406_v46, %v405_v49  ;;  %v500_v60 = vrot.slane %v499_v55, 4  ;;  %v517_v61 = vadd.f32 %v516_v56, %v515_v57 }
 0x11d   : > { %v391_v58 = vadd.f32 %v390_v53, %v389_v44  ;;  %v408_v59 = vrot.slane %v407_v54, 4  ;;  %v501_v63 = vadd.f32 %v500_v60, %v499_v55  ;;  %v518_v22 = vrot.slane %v517_v61, 4 }
 0x11f   : > { %v392_v21 = vrot.slane %v391_v58, 2  ;;  %v409_v23 = vadd.f32 %v408_v59, %v407_v54  ;;  %v502_v32 = vrot.slane %v501_v63, 2  ;;  %v519_v33 = vadd.f32 %v518_v22, %v517_v61 }
 0x121   : > { %v1867_v30 = vadd.f32 %v392_v21, %v391_v58  ;;  %v410_v31 = vrot.slane %v409_v23, 2  ;;  %v503_v50 = vadd.f32 %v502_v32, %v501_v63  ;;  %v520_v51 = vrot.slane %v519_v33, 2 }
 0x133   : > { %v588_v62 = vpop.f32.mrf.mxu0  ;;  %v698_v0 = vpop.f32.mrf.mxu1 }
 0x134   : > { %v617_v36 = vmul.f32 %v588_v62, %v588_v62  ;;  %v727_v37 = vmul.f32 %v698_v0, %v698_v0  ;;  %v603_v40 = vsel %vm381_vm6, %v588_v62, 0.0  ;;  %v713_v41 = vsel %vm381_vm6, %v698_v0, 0.0 }
 0x135   : > { %v590_v24 = vpop.f32.mrf.mxu0  ;;  %v700_v25 = vpop.f32.mrf.mxu1 }
 0x136   : > { %v621_v56 = vsel %vm381_vm6, %v617_v36, 0.0  ;;  %v731_v57 = vsel %vm381_vm6, %v727_v37, 0.0  ;;  %v411_v36 = vadd.f32 %v410_v31, %v409_v23  ;;  %v521_v37 = vadd.f32 %v520_v51, %v519_v33 }
 0x137   : > { %v591_v26 = vpop.f32.mrf.mxu0  ;;  %v701_v27 = vpop.f32.mrf.mxu1 }
 0x138   : > { %v618_v28 = vmul.f32 %v591_v26, %v591_v26  ;;  %v728_v29 = vmul.f32 %v701_v27, %v701_v27  ;;  %v604_v38 = vsel %vm381_vm6, %v591_v26, 0.0  ;;  %v714_v39 = vsel %vm381_vm6, %v701_v27, 0.0 }
 0x139   : > { %v593_v34 = vpop.f32.mrf.mxu0  ;;  %v703_v35 = vpop.f32.mrf.mxu1  ;;  %v605_v52 = vadd.f32 %v604_v38, %v603_v40  ;;  %v715_v53 = vadd.f32 %v714_v39, %v713_v41 }
 0x13a   : > { %v622_v42 = vsel %vm381_vm6, %v618_v28, 0.0  ;;  %v732_v43 = vsel %vm381_vm6, %v728_v29, 0.0 }
 0x13b   : > { %v596_v44 = vpop.f32.mrf.mxu0  ;;  %v706_v45 = vpop.f32.mrf.mxu1  ;;  %v623_v60 = vadd.f32 %v622_v42, %v621_v56  ;;  %v733_v61 = vadd.f32 %v732_v43, %v731_v57 }
 0x13c   : > { %v606_v46 = vsel %vm381_vm6, %v596_v44, 0.0  ;;  %v619_v47 = vmul.f32 %v596_v44, %v596_v44  ;;  %v716_v48 = vsel %vm381_vm6, %v706_v45, 0.0  ;;  %v729_v49 = vmul.f32 %v706_v45, %v706_v45 }
 0x13d   : > { %v598_v54 = vpop.f32.mrf.mxu0  ;;  %v708_v55 = vpop.f32.mrf.mxu1  ;;  %v607_v62 = vadd.f32 %v606_v46, %v605_v52  ;;  %v717_v0 = vadd.f32 %v716_v48, %v715_v53  ;;  %v394_v44 = vrot.slane %v1867_v30, 1  ;;  %v504_v45 = vrot.slane %v503_v50, 1 }
 0x13e   : > { %v624_v58 = vsel %vm381_vm6, %v619_v47, 0.0  ;;  %v734_v59 = vsel %vm381_vm6, %v729_v49, 0.0  ;;  %v412_v52 = vrot.slane %v411_v36, 1  ;;  %v522_v53 = vrot.slane %v521_v37, 1 }
 0x13f   : > { %v599_v21 = vpop.f32.mrf.mxu0  ;;  %v709_v22 = vpop.f32.mrf.mxu1  ;;  %v625_v27 = vadd.f32 %v624_v58, %v623_v60  ;;  %v735_v28 = vadd.f32 %v734_v59, %v733_v61  ;;  %v395_v51 = vadd.f32 %v394_v44, %v1867_v30  ;;  %v505_v55 = vadd.f32 %v504_v45, %v503_v50  ;;  %v745_v30 = vld [vmem:[#allocation2] sm:$0x1] }
 0x140   : > { %v608_v63 = vsel %vm387_vm2, %v599_v21, 0.0  ;;  %v620_v24 = vmul.f32 %v599_v21, %v599_v21  ;;  %v718_v25 = vsel %vm387_vm2, %v709_v22, 0.0  ;;  %v730_v26 = vmul.f32 %v709_v22, %v709_v22 }
 0x141   : > { %v609_v29 = vadd.f32 %v608_v63, %v607_v62  ;;  %v719_v32 = vadd.f32 %v718_v25, %v717_v0  ;;  %v601_v34 = vpop.f32.mrf.mxu0  ;;  %v711_v35 = vpop.f32.mrf.mxu1  ;;  %v413_v60 = vadd.f32 %v412_v52, %v411_v36  ;;  %v523_v61 = vadd.f32 %v522_v53, %v521_v37 }
 0x142   : > { %v626_v38 = vsel %vm387_vm2, %v620_v24, 0.0  ;;  %v736_v39 = vsel %vm387_vm2, %v730_v26, 0.0  ;;  %v506_v63 = vadd.f32 %v505_v55, %v395_v51 }
 0x143   : > { %v610_v40 = vrot.slane %v609_v29, 4  ;;  %v627_v41 = vadd.f32 %v626_v38, %v625_v27  ;;  %v720_v42 = vrot.slane %v719_v32, 4  ;;  %v737_v43 = vadd.f32 %v736_v39, %v735_v28  ;;  %v748_v38 = vld [vmem:[#allocation3] sm:$0x1] }
 0x144   : > { %v524_v27 = vadd.f32 %v523_v61, %v413_v60 }
 0x145   : > { %v611_v46 = vadd.f32 %v610_v40, %v609_v29  ;;  %v628_v47 = vrot.slane %v627_v41, 4  ;;  %v721_v48 = vadd.f32 %v720_v42, %v719_v32  ;;  %v738_v49 = vrot.slane %v737_v43, 4 }
 0x147   : > { %v612_v54 = vrot.slane %v611_v46, 2  ;;  %v629_v23 = vadd.f32 %v628_v47, %v627_v41  ;;  %v722_v31 = vrot.slane %v721_v48, 2  ;;  %v739_v33 = vadd.f32 %v738_v49, %v737_v43 }
 0x149   : > { %v613_v56 = vadd.f32 %v612_v54, %v611_v46  ;;  %v630_v57 = vrot.slane %v629_v23, 2  ;;  %v723_v58 = vadd.f32 %v722_v31, %v721_v48  ;;  %v740_v59 = vrot.slane %v739_v33, 2 }
 0x14b   : > { %v614_v62 = vrot.slane %v613_v56, 1  ;;  %v631_v0 = vadd.f32 %v630_v57, %v629_v23  ;;  %v724_v21 = vrot.slane %v723_v58, 1  ;;  %v741_v22 = vadd.f32 %v740_v59, %v739_v33 }
 0x14d   : > { %v615_v24 = vadd.f32 %v614_v62, %v613_v56  ;;  %v632_v25 = vrot.slane %v631_v0, 1  ;;  %v742_v26 = vrot.slane %v741_v22, 1  ;;  %v725_v32 = vadd.f32 %v724_v21, %v723_v58 }
 0x14f   : > { %v616_v28 = vadd.f32 %v615_v24, %v506_v63  ;;  %v633_v29 = vadd.f32 %v632_v25, %v631_v0  ;;  %v743_v35 = vadd.f32 %v742_v26, %v741_v22 }
 0x151   : > { %v634_v50 = vadd.f32 %v633_v29, %v524_v27  ;;  %v726_v34 = vadd.f32 %v725_v32, %v616_v28 }
 0x153   : > { %v744_v39 = vadd.f32 %v743_v35, %v634_v50  ;;  %v746_v36 = vadd.f32 %v745_v30, %v726_v34 }
 0x155   : > { %747 = vst.msk [vmem:[#allocation2] sm:$0x1] %vm387_vm2, %v746_v36  ;;  %v749_v37 = vadd.f32 %v748_v38, %v744_v39 }
 0x157   : > { %750 = vst.msk [vmem:[#allocation3] sm:$0x1] %vm387_vm2, %v749_v37 }
 0x158 PF: > { %p1358_p10 = scmp.ne.s32.totalorder %s1536_s16, 1 }
 0x15a   : > { %764 = sbr.rel (%p1358_p10) target bundleno = 651 (0x28b), region = 48 }
 0x15f   : > { %v1892_v40 = vcombine.low %v1694_v15, %v1699_v16  ;;  %v1552_v41 = vmov 0   ;;  %v1486_v42 = vld [vmem:[%s1614_s26 + $0x4] ss:$8 sps:$4 sm:$0xff]   ;;  %vm860_vm7 = vcmask 261120   ;;  %v1901_v43 = vcombine.low %v1684_v13, %v1689_v14  ;;  %v765_v47 = vld [vmem:[#allocation2] sm:$0x1] }
 0x160   : > { %867 = vmatprep.subr.bf16.mxu0 %v1552_v41  ;;  %965 = vmatprep.subr.bf16.mxu1 %v1552_v41  ;;  %v1489_v44 = vld [vmem:[%s1614_s26 + $0x24] ss:$8 sps:$4 sm:$0xff]   ;;  %v1912_v15 = vcombine.low %v1674_v11, %v1679_v12  ;;  %v1920_v13 = vcombine.low %v1664_v9, %v1669_v10  ;;  %v1928_v11 = vcombine.low %v1654_v7, %v1659_v8  ;;  %v1493_v8 = vld [vmem:[%s1614_s26 + $0x34] ss:$8 sps:$4 sm:$0x1f]   ;;  %v917_v25 = vlaneseq }
 0x161   : > { %868 = vmatpush1.bf16.msra.mxu0 %v1892_v40  ;;  %966 = vmatpush1.bf16.msra.mxu1 %v1892_v40  ;;  %v1936_v9 = vcombine.low %v1644_v5, %v1649_v6  ;;  %v1364_v7 = vcombine.low %v1634_v3, %v1639_v4  ;;  %v1363_v5 = vcombine.low %v1624_v1, %v1629_v2  ;;  %v1484_v2 = vld [vmem:[%s1614_s26] ss:$8 sps:$4 sm:$0xff]   ;;  %v1490_v6 = vld [vmem:[%s1614_s26 + $0x14] ss:$8 sps:$4 sm:$0x1f]   ;;  %vm1226_vm8 = vcmask 125952  }
 0x162   : > { %869 = vmatprep.subr.bf16.mxu0 %v1552_v41  ;;  %967 = vmatprep.subr.bf16.mxu1 %v1552_v41  ;;  %v1372_v3 = vcombine.low %v1714_v19, %v1719_v20  ;;  %v1371_v1 = vcombine.low %v1704_v17, %v1709_v18  ;;  %v1487_v4 = vld [vmem:[%s1614_s26 + $0x20] ss:$8 sps:$4 sm:$0xff]   ;;  %v1492_v10 = vld [vmem:[%s1614_s26 + $0x10] ss:$8 sps:$4 sm:$0x1f]   ;;  %v918_v29 = vshrl.u32 %v917_v25, 7 }
 0x163   : > { %1373 = vmatprep.mubr.msk.bf16.mxu0 %vm860_vm7, %v1486_v42  ;;  %1383 = vmatprep.mubr.msk.bf16.mxu1 %vm860_vm7, %v1489_v44  ;;  %v1495_v12 = vld [vmem:[%s1614_s26 + $0x30] ss:$8 sps:$4 sm:$0x1f]   ;;  %v1498_v14 = vld [vmem:[%s1614_s26 + $0x44] ss:$8 sps:$4 sm:$0xff]   ;;  %vm1230_vm9 = vcmask 122880  }
 0x164   : > { %v1501_v16 = vld [vmem:[%s1614_s26 + $0x64] ss:$8 sps:$4 sm:$0xff]   ;;  %v1496_v17 = vld [vmem:[%s1614_s26 + $0x40] ss:$8 sps:$4 sm:$0xff]   ;;  %v766_v48 = vmul.f32 0.005, %v765_v47 }
 0x165   : > { %870 = vmatpush1.bf16.msra.mxu0 %v1901_v43  ;;  %968 = vmatpush1.bf16.msra.mxu1 %v1901_v43  ;;  %v1499_v18 = vld [vmem:[%s1614_s26 + $0x60] ss:$8 sps:$4 sm:$0xff]   ;;  %v1502_v19 = vld [vmem:[%s1614_s26 + $0x54] ss:$8 sps:$4 sm:$0x1f]   ;;  %v919_v30 = vsub.s32 0, %v918_v29 }
 0x166   : > { %871 = vmatprep.subr.bf16.mxu0 %v1552_v41  ;;  %969 = vmatprep.subr.bf16.mxu1 %v1552_v41  ;;  %v1504_v20 = vld [vmem:[%s1614_s26 + $0x74] ss:$8 sps:$4 sm:$0x1f]   ;;  %v1506_v45 = vld [vmem:[%s1614_s26 + $0x50] ss:$8 sps:$4 sm:$0x1f]   ;;  %v769_v53 = vmul.f32 %v766_v48, %v766_v48 }
 0x167   : > { %v1507_v46 = vld [vmem:[%s1614_s26 + $0x70] ss:$8 sps:$4 sm:$0x1f]   ;;  %v767_v49 = vld [vmem:[#allocation3] sm:$0x1] }
 0x168   : > { %v768_v52 = vmul.f32 0.005, %v767_v49  ;;  %v773_v27 = vld [vmem:[%s2059_s2] sm:$0x1]  ;;  %vm1231_vm10 = vsmask.f32 256 }
 0x169   : > { %872 = vmatpush1.bf16.msra.mxu0 %v1912_v15  ;;  %970 = vmatpush1.bf16.msra.mxu1 %v1912_v15  ;;  %v775_v50 = vld [vmem:[%s2060_s3] sm:$0x1]  ;;  %vm1232_vm11 = vmand %vm1230_vm9, %vm1231_vm10 }
 0x16a   : > { %873 = vmatprep.subr.bf16.mxu0 %v1552_v41  ;;  %971 = vmatprep.subr.bf16.mxu1 %v1552_v41  ;;  %v770_v54 = vsub.f32 %v768_v52, %v769_v53 }
 0x16c   : > { %v771_v33 = vadd.f32 1e-05, %v770_v54 }
 0x16d   : > { %874 = vmatpush1.bf16.msra.mxu0 %v1920_v13  ;;  %972 = vmatpush1.bf16.msra.mxu1 %v1920_v13 }
 0x16e   : > { %875 = vmatprep.subr.bf16.mxu0 %v1552_v41  ;;  %973 = vmatprep.subr.bf16.mxu1 %v1552_v41  ;;  %1508 = vrsqrt.f32 %v771_v33 }
 0x171   : > { %876 = vmatpush1.bf16.msra.mxu0 %v1928_v11  ;;  %974 = vmatpush1.bf16.msra.mxu1 %v1928_v11 }
 0x172   : > { %877 = vmatprep.subr.bf16.mxu0 %v1552_v41  ;;  %975 = vmatprep.subr.bf16.mxu1 %v1552_v41 }
 0x175   : > { %878 = vmatpush1.bf16.msra.mxu0 %v1936_v9  ;;  %976 = vmatpush1.bf16.msra.mxu1 %v1936_v9 }
 0x176   : > { %879 = vmatprep.subr.bf16.mxu0 %v1552_v41  ;;  %977 = vmatprep.subr.bf16.mxu1 %v1552_v41 }
 0x179   : > { %880 = vmatpush1.bf16.msra.mxu0 %v1364_v7  ;;  %978 = vmatpush1.bf16.msra.mxu1 %v1364_v7 }
 0x17a   : > { %881 = vmatprep.subr.bf16.mxu0 %v1552_v41  ;;  %979 = vmatprep.subr.bf16.mxu1 %v1552_v41 }
 0x17b   : > { %v1509_v26 = vpop.eup %1508 }
 0x17c   : > { %v774_v28 = vmul.f32 %v1509_v26, %v773_v27 }
 0x17d   : > { %882 = vmatpush1.bf16.msra.mxu0 %v1363_v5  ;;  %980 = vmatpush1.bf16.msra.mxu1 %v1363_v5 }
 0x17e   : > { %895 = vmatprep.subr.bf16.mxu0 %v1552_v41  ;;  %993 = vmatprep.subr.bf16.mxu1 %v1552_v41  ;;  %v776_v32 = vmul.f32 %v774_v28, %v766_v48  ;;  %v920_v35 = vrot.slane %v774_v28, %v919_v30 }
 0x180   : > { %v777_v34 = vsub.f32 %v775_v50, %v776_v32 }
 0x181   : > { %896 = vmatpush2.bf16.msra.mxu0 %v1372_v3  ;;  %994 = vmatpush2.bf16.msra.mxu1 %v1372_v3 }
 0x182   : > { %897 = vmatprep.subr.bf16.mxu0 %v1552_v41  ;;  %995 = vmatprep.subr.bf16.mxu1 %v1552_v41  ;;  %v2016_v39 = vrot.slane %v777_v34, %v919_v30 }
 0x185   : > { %898 = vmatpush2.bf16.msra.mxu0 %v1371_v1  ;;  %996 = vmatpush2.bf16.msra.mxu1 %v1371_v1 }
 0x186   : > { %1055 = vmatprep.subr.bf16.mxu0 %v1552_v41  ;;  %1145 = vmatprep.subr.bf16.mxu1 %v1552_v41 }
 0x188   : > { %900 = vmatmul.mubr.bf16.vlgmr.msra.gmra.mxu0 %v1484_v2  ;;  %998 = vmatmul.mubr.bf16.vlgmr.msra.gmra.mxu1 %v1487_v4 }
 0x189   : > { %1056 = vmatpush1.bf16.msra.mxu0 %v1892_v40  ;;  %1146 = vmatpush1.bf16.msra.mxu1 %v1892_v40 }
 0x18a   : > { %1057 = vmatprep.subr.bf16.mxu0 %v1552_v41  ;;  %1147 = vmatprep.subr.bf16.mxu1 %v1552_v41 }
 0x18b   : > { %1374 = vmatprep.mubr.msk.bf16.mxu0 %vm860_vm7, %v1490_v6  ;;  %1384 = vmatprep.mubr.msk.bf16.mxu1 %vm860_vm7, %v1493_v8 }
 0x18d   : > { %1058 = vmatpush1.bf16.msra.mxu0 %v1901_v43  ;;  %1148 = vmatpush1.bf16.msra.mxu1 %v1901_v43 }
 0x18e   : > { %1059 = vmatprep.subr.bf16.mxu0 %v1552_v41  ;;  %1149 = vmatprep.subr.bf16.mxu1 %v1552_v41 }
 0x190   : > { %908 = vmatmul.mubr.bf16.gmra.mxu0 %v1492_v10  ;;  %1006 = vmatmul.mubr.bf16.gmra.mxu1 %v1495_v12 }
 0x191   : > { %1060 = vmatpush1.bf16.msra.mxu0 %v1912_v15  ;;  %1150 = vmatpush1.bf16.msra.mxu1 %v1912_v15 }
 0x192   : > { %1061 = vmatprep.subr.bf16.mxu0 %v1552_v41  ;;  %1151 = vmatprep.subr.bf16.mxu1 %v1552_v41 }
 0x193   : > { %1393 = vmatprep.mubr.msk.bf16.mxu0 %vm860_vm7, %v1498_v14  ;;  %1403 = vmatprep.mubr.msk.bf16.mxu1 %vm860_vm7, %v1501_v16 }
 0x195   : > { %1062 = vmatpush1.bf16.msra.mxu0 %v1920_v13  ;;  %1152 = vmatpush1.bf16.msra.mxu1 %v1920_v13 }
 0x196   : > { %1063 = vmatprep.subr.bf16.mxu0 %v1552_v41  ;;  %1153 = vmatprep.subr.bf16.mxu1 %v1552_v41 }
 0x199   : > { %1064 = vmatpush1.bf16.msra.mxu0 %v1928_v11  ;;  %1154 = vmatpush1.bf16.msra.mxu1 %v1928_v11 }
 0x19a   : > { %1065 = vmatprep.subr.bf16.mxu0 %v1552_v41  ;;  %1155 = vmatprep.subr.bf16.mxu1 %v1552_v41 }
 0x19d   : > { %1066 = vmatpush1.bf16.msra.mxu0 %v1936_v9  ;;  %1156 = vmatpush1.bf16.msra.mxu1 %v1936_v9 }
 0x19e   : > { %1067 = vmatprep.subr.bf16.mxu0 %v1552_v41  ;;  %1157 = vmatprep.subr.bf16.mxu1 %v1552_v41 }
 0x1a1   : > { %1068 = vmatpush1.bf16.msra.mxu0 %v1364_v7  ;;  %1158 = vmatpush1.bf16.msra.mxu1 %v1364_v7 }
 0x1a2   : > { %1069 = vmatprep.subr.bf16.mxu0 %v1552_v41  ;;  %1159 = vmatprep.subr.bf16.mxu1 %v1552_v41 }
 0x1a5   : > { %1070 = vmatpush1.bf16.msra.mxu0 %v1363_v5  ;;  %1160 = vmatpush1.bf16.msra.mxu1 %v1363_v5 }
 0x1a6   : > { %1083 = vmatprep.subr.bf16.mxu0 %v1552_v41  ;;  %1173 = vmatprep.subr.bf16.mxu1 %v1552_v41 }
 0x1a9   : > { %1084 = vmatpush2.bf16.msra.mxu0 %v1372_v3  ;;  %1174 = vmatpush2.bf16.msra.mxu1 %v1372_v3 }
 0x1aa   : > { %1085 = vmatprep.subr.bf16.mxu0 %v1552_v41  ;;  %1175 = vmatprep.subr.bf16.mxu1 %v1552_v41 }
 0x1ad   : > { %1086 = vmatpush2.bf16.msra.mxu0 %v1371_v1  ;;  %1176 = vmatpush2.bf16.msra.mxu1 %v1371_v1 }
 0x1b0   : > { %1088 = vmatmul.mubr.bf16.vlgmr.msra.gmra.mxu0 %v1496_v17  ;;  %1178 = vmatmul.mubr.bf16.vlgmr.msra.gmra.mxu1 %v1499_v18 }
 0x1b1   : > { %1394 = vmatprep.mubr.msk.bf16.mxu0 %vm860_vm7, %v1502_v19  ;;  %1404 = vmatprep.mubr.msk.bf16.mxu1 %vm860_vm7, %v1504_v20 }
 0x1b8   : > { %1096 = vmatmul.mubr.bf16.gmra.mxu0 %v1506_v45  ;;  %1186 = vmatmul.mubr.bf16.gmra.mxu1 %v1507_v46 }
 0x248   : > { %v901_v23 = vpop.f32.mrf.mxu0  ;;  %v999_v31 = vpop.f32.mrf.mxu1 }
 0x249   : > { %v922_v38 = vmul.f32 %v920_v35, %v901_v23  ;;  %v1014_v36 = vmul.f32 %v999_v31, %v920_v35 }
 0x24a   : > { %v903_v51 = vpop.f32.mrf.mxu0  ;;  %v1001_v55 = vpop.f32.mrf.mxu1 }
 0x24b   : > { %v932_v37 = vadd.f32 %v2016_v39, %v922_v38  ;;  %v1018_v40 = vadd.f32 %v1014_v36, %v2016_v39 }
 0x24c   : > { %v904_v56 = vpop.f32.mrf.mxu0  ;;  %v1002_v57 = vpop.f32.mrf.mxu1 }
 0x24d   : > { %v923_v41 = vmul.f32 %v920_v35, %v904_v56  ;;  %v1015_v42 = vmul.f32 %v1002_v57, %v920_v35  ;;  %v1022_v11 = vmax.f32 %v932_v37, %v1018_v40 }
 0x24e   : > { %v906_v58 = vpop.f32.mrf.mxu0  ;;  %v1004_v59 = vpop.f32.mrf.mxu1 }
 0x24f   : > { %v933_v1 = vadd.f32 %v2016_v39, %v923_v41  ;;  %v1019_v2 = vadd.f32 %v1015_v42, %v2016_v39  ;;  %v1233_v41 = vld [vmem:[%s1619_s29 + $0xc] sm:$0x1] }
 0x250   : > { %v909_v60 = vpop.f32.mrf.mxu0  ;;  %v1007_v61 = vpop.f32.mrf.mxu1 }
 0x251   : > { %v924_v9 = vmul.f32 %v920_v35, %v909_v60  ;;  %v1016_v7 = vmul.f32 %v1007_v61, %v920_v35  ;;  %v1023_v47 = vmax.f32 %v933_v1, %v1019_v2 }
 0x252   : > { %v911_v62 = vpop.f32.mrf.mxu0  ;;  %v1009_v0 = vpop.f32.mrf.mxu1 }
 0x253   : > { %v934_v17 = vadd.f32 %v2016_v39, %v924_v9  ;;  %v1020_v18 = vadd.f32 %v1016_v7, %v2016_v39 }
 0x254   : > { %v912_v21 = vpop.f32.mrf.mxu0  ;;  %v1010_v22 = vpop.f32.mrf.mxu1 }
 0x255   : > { %v925_v19 = vmul.f32 %v920_v35, %v912_v21  ;;  %v1017_v20 = vmul.f32 %v1010_v22, %v920_v35  ;;  %v1024_v55 = vmax.f32 %v934_v17, %v1020_v18 }
 0x256   : > { %v914_v63 = vpop.f32.mrf.mxu0  ;;  %v1012_v24 = vpop.f32.mrf.mxu1 }
 0x257   : > { %v935_v56 = vadd.f32 %v2016_v39, %v925_v19  ;;  %v1021_v57 = vadd.f32 %v1017_v20, %v2016_v39 }
 0x259   : > { %v1025_v29 = vmax.f32 %v935_v56, %v1021_v57 }
 0x270   : > { %v1089_v43 = vpop.f32.mrf.mxu0  ;;  %v1179_v44 = vpop.f32.mrf.mxu1 }
 0x271   : > { %v1104_v15 = vmul.f32 %v1089_v43, %v920_v35  ;;  %v1194_v13 = vmul.f32 %v1179_v44, %v920_v35 }
 0x272   : > { %v1091_v5 = vpop.f32.mrf.mxu0  ;;  %v1181_v3 = vpop.f32.mrf.mxu1 }
 0x273   : > { %v1108_v4 = vadd.f32 %v1104_v15, %v2016_v39  ;;  %v1198_v6 = vadd.f32 %v1194_v13, %v2016_v39 }
 0x274   : > { %v1092_v8 = vpop.f32.mrf.mxu0  ;;  %v1182_v10 = vpop.f32.mrf.mxu1 }
 0x275   : > { %v1112_v12 = vmax.f32 %v1022_v11, %v1108_v4  ;;  %v1105_v14 = vmul.f32 %v1092_v8, %v920_v35  ;;  %v1195_v16 = vmul.f32 %v1182_v10, %v920_v35 }
 0x276   : > { %v1094_v45 = vpop.f32.mrf.mxu0  ;;  %v1184_v46 = vpop.f32.mrf.mxu1 }
 0x277   : > { %v1202_v48 = vmax.f32 %v1112_v12, %v1198_v6  ;;  %v1109_v49 = vadd.f32 %v1105_v14, %v2016_v39  ;;  %v1199_v52 = vadd.f32 %v1195_v16, %v2016_v39 }
 0x278   : > { %v1097_v53 = vpop.f32.mrf.mxu0  ;;  %v1187_v54 = vpop.f32.mrf.mxu1 }
 0x279   : > { %v1206_v23 = vmax.f32 %v1202_v48, 0.0  ;;  %v1113_v31 = vmax.f32 %v1023_v47, %v1109_v49  ;;  %v1106_v33 = vmul.f32 %v1097_v53, %v920_v35  ;;  %v1196_v51 = vmul.f32 %v1187_v54, %v920_v35 }
 0x27a   : > { %v1099_v58 = vpop.f32.mrf.mxu0  ;;  %v1189_v59 = vpop.f32.mrf.mxu1 }
 0x27b   : > { %v1413_v60 = vpack.c.bf16 %v1206_v23, %v1206_v23  ;;  %v1203_v61 = vmax.f32 %v1113_v31, %v1199_v52  ;;  %v1110_v62 = vadd.f32 %v1106_v33, %v2016_v39  ;;  %v1200_v0 = vadd.f32 %v1196_v51, %v2016_v39 }
 0x27c   : > { %v1100_v21 = vpop.f32.mrf.mxu0  ;;  %v1190_v22 = vpop.f32.mrf.mxu1 }
 0x27d   : > { %1227 = vst.msk [vmem:[%s1619_s29] sm:$0xf] %vm1226_vm8, %v1413_v60  ;;  %v1207_v63 = vmax.f32 %v1203_v61, 0.0  ;;  %v1114_v24 = vmax.f32 %v1024_v55, %v1110_v62  ;;  %v1107_v25 = vmul.f32 %v1100_v21, %v920_v35  ;;  %v1197_v26 = vmul.f32 %v1190_v22, %v920_v35 }
 0x27e   : > { %v1102_v27 = vpop.f32.mrf.mxu0  ;;  %v1192_v28 = vpop.f32.mrf.mxu1 }
 0x27f   : > { %v1414_v32 = vpack.c.bf16 %v1207_v63, %v1207_v63  ;;  %v1204_v30 = vmax.f32 %v1114_v24, %v1200_v0  ;;  %v1111_v50 = vadd.f32 %v1107_v25, %v2016_v39  ;;  %v1201_v36 = vadd.f32 %v1197_v26, %v2016_v39 }
 0x281   : > { %1228 = vst.msk [vmem:[%s1619_s29 + $0x4] sm:$0xf] %vm1226_vm8, %v1414_v32  ;;  %v1208_v34 = vmax.f32 %v1204_v30, 0.0  ;;  %v1115_v38 = vmax.f32 %v1025_v29, %v1111_v50 }
 0x283   : > { %v1415_v37 = vpack.c.bf16 %v1208_v34, %v1208_v34  ;;  %v1205_v40 = vmax.f32 %v1115_v38, %v1201_v36 }
 0x285   : > { %1229 = vst.msk [vmem:[%s1619_s29 + $0x8] sm:$0xf] %vm1226_vm8, %v1415_v37  ;;  %v1209_v35 = vmax.f32 %v1205_v40, 0.0 }
 0x287   : > { %v1416_v42 = vpack.c.bf16 %v1209_v35, %v1209_v35 }
 0x289   : > { %v1234_v43 = vsel %vm1232_vm11, %v1416_v42, %v1233_v41 }
 0x28a   : > { %1235 = vst [vmem:[%s1619_s29 + $0xc] sm:$0x1] %v1234_v43 }
 0x28b PF: > { %s14_s19 = sadd.s32 1, %s1548_s19   ;;  %s2062_s15 = smov %s1540_s17 }
 0x28c   : > { %p11_p11 = scmp.ge.s32.totalorder %s14_s19, 6   ;;  %s2063_s16 = smov %s1544_s18 }
 0x28d   : > { %s2064_s17 = smov %s2067_s20  ;;  %s2065_s18 = smov %s2071_s21 }
 0x28e   :  { %13 = sbr.rel (!%p11_p11) target bundleno = 3 (0x3), region = 84 }

// kernel: lenet5_forward.5
= control target key start
LH: loop header
LB: loop body
LE: loop exit
PB: predicated region body
PF: predicated region fallthrough
CT: control target
= control target key end

     0   :  { %v892_v1 = vmov 0   ;;  %v88_v21 = vlaneseq  ;;  %v893_v26 = vmov 1966171168   ;;  %vm254_vm0 = vcmask 130048   ;;  %s1129_s0 = inlined_call_operand.vmem [shape: bf16[2,400], index: 0, kind: input, shape index: {}]   ;;  %s1130_s1 = inlined_call_operand.vmem [shape: bf16[400,128], index: 1, kind: input, shape index: {}]   ;;  %s1131_s2 = inlined_call_operand.vmem [shape: bf16[128,128], index: 2, kind: input, shape index: {}]   ;;  %s1132_s3 = inlined_call_operand.vmem [shape: bf16[128,128], index: 3, kind: input, shape index: {}]   ;;  %s1133_s4 = inlined_call_operand.vmem [shape: f32[3,128], index: 4, kind: input, shape index: {}]   ;;  %s1134_s5 = inlined_call_operand.vmem [shape: f32[3,128], index: 5, kind: input, shape index: {}]   ;;  %s1135_s6 = inlined_call_operand.hbm [shape: f32[2,128], index: 6, kind: output, shape index: {}]  }
   0x1   :  { %v817_v0 = vld [vmem:[%s1130_s1 + $0x78] sm:$0xff]   ;;  %298 = vmatprep.subr.bf16.mxu1 %v892_v1  ;;  %v820_v4 = vld [vmem:[%s1130_s1 + $0x70] sm:$0xff]   ;;  %v823_v7 = vld [vmem:[%s1130_s1 + $0x68] sm:$0xff]   ;;  %v86_v27 = vunpack.c.l.s4 %v893_v26 }
   0x2   :  { %v818_v2 = vld [vmem:[%s1130_s1 + $0xb8] sm:$0xff]   ;;  %732 = vmatprep.subr.bf16.mxu0 %v817_v0  ;;  %v821_v5 = vld [vmem:[%s1130_s1 + $0xb0] sm:$0xff]   ;;  %v824_v8 = vld [vmem:[%s1130_s1 + $0xa8] sm:$0xff]   ;;  %v1012_v28 = vshrl.u32 %v88_v21, 7 }
   0x3   :  { %v819_v3 = vld [vmem:[%s1130_s1 + $0x38] sm:$0xff]   ;;  %299 = vmatpush1.bf16.msra.mxu1 %v818_v2  ;;  %v822_v6 = vld [vmem:[%s1130_s1 + $0x30] sm:$0xff]   ;;  %v825_v9 = vld [vmem:[%s1130_s1 + $0x28] sm:$0xff]   ;;  %v87_v31 = vunpack.c.0.s8 %v86_v27 }
   0x4   :  { %733 = vmatpush3.bf16.msra.mxu0 %v819_v3  ;;  %300 = vmatprep.subr.bf16.mxu1 %v892_v1  ;;  %v826_v10 = vld [vmem:[%s1130_s1 + $0x60] sm:$0xff]   ;;  %v829_v13 = vld [vmem:[%s1130_s1 + $0x58] sm:$0xff]   ;;  %v832_v16 = vld [vmem:[%s1130_s1 + $0x50] sm:$0xff]  }
   0x5   :  { %734 = vmatprep.subr.bf16.mxu0 %v820_v4  ;;  %v827_v11 = vld [vmem:[%s1130_s1 + $0xa0] sm:$0xff]   ;;  %v830_v14 = vld [vmem:[%s1130_s1 + $0x98] sm:$0xff]   ;;  %v833_v17 = vld [vmem:[%s1130_s1 + $0x90] sm:$0xff]   ;;  %v90_v32 = vsub.s32 %v87_v31, %v1012_v28 }
   0x6   :  { %v828_v12 = vld [vmem:[%s1130_s1 + $0x20] sm:$0xff]   ;;  %v831_v15 = vld [vmem:[%s1130_s1 + $0x18] sm:$0xff]   ;;  %v834_v18 = vld [vmem:[%s1130_s1 + $0x10] sm:$0xff]  }
   0x7   :  { %301 = vmatpush1.bf16.msra.mxu1 %v821_v5  ;;  %v835_v19 = vld [vmem:[%s1130_s1 + $0x48] sm:$0xff]   ;;  %v838_v23 = vld [vmem:[%s1130_s1 + $0x40] sm:$0xff]  }
   0x8   :  { %735 = vmatpush3.bf16.msra.mxu0 %v822_v6  ;;  %302 = vmatprep.subr.bf16.mxu1 %v892_v1  ;;  %v836_v20 = vld [vmem:[%s1130_s1 + $0x88] sm:$0xff]   ;;  %v689_v24 = vld.sshfl [vmem:[%s1129_s0] sm:$0x33 pattern:$0x75316420] }
   0x9   :  { %736 = vmatprep.subr.bf16.mxu0 %v823_v7  ;;  %v837_v22 = vld [vmem:[%s1130_s1 + $0x8] sm:$0xff]   ;;  %v839_v25 = vld [vmem:[%s1130_s1 + $0x80] sm:$0xff]   ;;  %v84_v30 = vcombine.high %v689_v24, %v689_v24  ;;  %v91_v35 = vrot.slane %v689_v24, %v90_v32 }
   0xa   :  { %v840_v29 = vld [vmem:[%s1130_s1] sm:$0xff]  }
   0xb   :  { %303 = vmatpush1.bf16.msra.mxu1 %v824_v8  ;;  %v841_v33 = vld [vmem:[%s1130_s1 + $0xc0] sm:$0xff]   ;;  %v98_v34 = vrot.slane %v84_v30, %v90_v32  ;;  %v99_v37 = vcombine.high %v91_v35, %v91_v35 }
   0xc   :  { %737 = vmatpush3.bf16.msra.mxu0 %v825_v9  ;;  %304 = vmatprep.subr.bf16.mxu1 %v892_v1 }
   0xd   :  { %738 = vmatprep.subr.bf16.mxu0 %v826_v10  ;;  %290 = vmatprep.mubr.bf16.mxu0 %v98_v34  ;;  %v100_v36 = vcombine.high %v98_v34, %v98_v34 }
   0xf   :  { %305 = vmatpush1.bf16.msra.mxu1 %v827_v11  ;;  %715 = vmatprep.mubr.msk.bf16.mxu1 %vm254_vm0, %v100_v36 }
  0x10   :  { %739 = vmatpush3.bf16.msra.mxu0 %v828_v12  ;;  %306 = vmatprep.subr.bf16.mxu1 %v892_v1 }
  0x11   :  { %740 = vmatprep.subr.bf16.mxu0 %v829_v13 }
  0x13   :  { %307 = vmatpush1.bf16.msra.mxu1 %v830_v14 }
  0x14   :  { %741 = vmatpush3.bf16.msra.mxu0 %v831_v15  ;;  %308 = vmatprep.subr.bf16.mxu1 %v892_v1 }
  0x15   :  { %742 = vmatprep.subr.bf16.mxu0 %v832_v16 }
  0x17   :  { %309 = vmatpush1.bf16.msra.mxu1 %v833_v17 }
  0x18   :  { %743 = vmatpush3.bf16.msra.mxu0 %v834_v18  ;;  %310 = vmatprep.subr.bf16.mxu1 %v892_v1 }
  0x19   :  { %744 = vmatprep.subr.bf16.mxu0 %v835_v19 }
  0x1b   :  { %311 = vmatpush1.bf16.msra.mxu1 %v836_v20 }
  0x1c   :  { %745 = vmatpush3.bf16.msra.mxu0 %v837_v22  ;;  %312 = vmatprep.subr.bf16.mxu1 %v892_v1 }
  0x1d   :  { %746 = vmatprep.subr.bf16.mxu0 %v838_v23 }
  0x1f   :  { %313 = vmatpush1.bf16.msra.mxu1 %v839_v25 }
  0x20   :  { %747 = vmatpush3.bf16.msra.mxu0 %v840_v29  ;;  %328 = vmatprep.subr.bf16.mxu1 %v892_v1 }
  0x23   :  { %291 = vmatmul.mubr.bf16.vlgmr.msra.gmra.mxu0 %v91_v35  ;;  %329 = vmatpush2.bf16.msra.mxu1 %v841_v33 }
  0x24   :  { %11 = vsyncpa [#allocation3], 0  ;;  %v842_v38 = vld [vmem:[%s1131_s2 + $0x38] sm:$0xff]   ;;  %v894_v39 = vmov 0.0   ;;  %v843_v40 = vld [vmem:[%s1131_s2 + $0x30] sm:$0xff]   ;;  %vm895_vm1 = vmmov 0  }
  0x25   :  { %772 = vmatprep.subr.bf16.mxu0 %v894_v39  ;;  %792 = vmatprep.subr.bf16.mxu1 %v894_v39  ;;  %v844_v41 = vld [vmem:[%s1131_s2 + $0x28] sm:$0xff]   ;;  %v845_v42 = vld [vmem:[%s1131_s2 + $0x20] sm:$0xff]   ;;  %v846_v43 = vld [vmem:[%s1131_s2 + $0x18] sm:$0xff]   ;;  %vm338_vm2 = vcmask 1041408   ;;  %v1065_v14 = vsub.s32 0, %v1012_v28 }
  0x26   :  { %331 = vmatmul.mubr.bf16.vlgmr.msra.gmra.mxu1 %v99_v37  ;;  %773 = vmatpush3.bf16.msra.mxu0 %v842_v38  ;;  %v847_v44 = vld [vmem:[%s1131_s2 + $0x10] sm:$0xff]   ;;  %v848_v45 = vld [vmem:[%s1131_s2 + $0x8] sm:$0xff]   ;;  %v849_v46 = vld [vmem:[%s1131_s2] sm:$0xff]  }
  0x27   :  { %774 = vmatprep.subr.bf16.mxu0 %v894_v39  ;;  %788 = vmatprep.mubr.msk.bf16.mxu0 %vm895_vm1, %v894_v39  ;;  %v360_v13 = vld [vmem:[%s1133_s4] sm:$0x1]  ;;  %v850_v27 = vld [vmem:[%s1132_s3 + $0x38] sm:$0xff]   ;;  %v851_v28 = vld [vmem:[%s1132_s3 + $0x30] sm:$0xff]  }
  0x28   :  { %808 = vmatprep.mubr.msk.bf16.mxu1 %vm895_vm1, %v894_v39  ;;  %v362_v17 = vld [vmem:[%s1134_s5] sm:$0x1]  ;;  %793 = vmatpush3.bf16.msra.mxu1 %v850_v27  ;;  %v852_v29 = vld [vmem:[%s1132_s3 + $0x28] sm:$0xff]   ;;  %v854_v31 = vld [vmem:[%s1132_s3 + $0x18] sm:$0xff]  }
  0x29   :  { %794 = vmatprep.subr.bf16.mxu1 %v894_v39  ;;  %v853_v30 = vld [vmem:[%s1132_s3 + $0x20] sm:$0xff]   ;;  %v855_v32 = vld [vmem:[%s1132_s3 + $0x10] sm:$0xff]   ;;  %v856_v33 = vld [vmem:[%s1132_s3 + $0x8] sm:$0xff]  }
  0x2a   :  { %775 = vmatpush3.bf16.msra.mxu0 %v843_v40  ;;  %v857_v34 = vld [vmem:[%s1132_s3] sm:$0xff]  }
  0x2b   :  { %776 = vmatprep.subr.bf16.mxu0 %v894_v39 }
  0x2c   :  { %795 = vmatpush3.bf16.msra.mxu1 %v851_v28 }
  0x2d   :  { %796 = vmatprep.subr.bf16.mxu1 %v894_v39 }
  0x2e   :  { %777 = vmatpush3.bf16.msra.mxu0 %v844_v41 }
  0x2f   :  { %778 = vmatprep.subr.bf16.mxu0 %v894_v39 }
  0x30   :  { %797 = vmatpush3.bf16.msra.mxu1 %v852_v29 }
  0x31   :  { %798 = vmatprep.subr.bf16.mxu1 %v894_v39 }
  0x32   :  { %779 = vmatpush3.bf16.msra.mxu0 %v845_v42 }
  0x33   :  { %780 = vmatprep.subr.bf16.mxu0 %v894_v39 }
  0x34   :  { %799 = vmatpush3.bf16.msra.mxu1 %v853_v30 }
  0x35   :  { %800 = vmatprep.subr.bf16.mxu1 %v894_v39 }
  0x36   :  { %781 = vmatpush3.bf16.msra.mxu0 %v846_v43 }
  0x37   :  { %782 = vmatprep.subr.bf16.mxu0 %v894_v39 }
  0x38   :  { %801 = vmatpush3.bf16.msra.mxu1 %v854_v31 }
  0x39   :  { %802 = vmatprep.subr.bf16.mxu1 %v894_v39 }
  0x3a   :  { %783 = vmatpush3.bf16.msra.mxu0 %v847_v44 }
  0x3b   :  { %784 = vmatprep.subr.bf16.mxu0 %v894_v39 }
  0x3c   :  { %803 = vmatpush3.bf16.msra.mxu1 %v855_v32 }
  0x3d   :  { %804 = vmatprep.subr.bf16.mxu1 %v894_v39 }
  0x3e   :  { %785 = vmatpush3.bf16.msra.mxu0 %v848_v45 }
  0x3f   :  { %786 = vmatprep.subr.bf16.mxu0 %v894_v39 }
  0x40   :  { %805 = vmatpush3.bf16.msra.mxu1 %v856_v33  ;;  %v644_v33 = vld [vmem:[%s1133_s4 + $0x2] sm:$0x1] }
  0x41   :  { %806 = vmatprep.subr.bf16.mxu1 %v894_v39 }
  0x42   :  { %787 = vmatpush3.bf16.msra.mxu0 %v849_v46 }
  0x44   :  { %807 = vmatpush3.bf16.msra.mxu1 %v857_v34 }
  0xe3   :  { %v748_v47 = vpop.f32.mrf.mxu0 }
  0xe5   :  { %v749_v48 = vpop.f32.mrf.mxu0 }
  0xe6   :  { %v750_v49 = vadd.f32 %v749_v48, %v748_v47  ;;  %v332_v50 = vpop.f32.mrf.mxu1 }
  0xe7   :  { %v751_v51 = vpop.f32.mrf.mxu0 }
  0xe8   :  { %v333_v52 = vadd.f32 %v750_v49, %v332_v50  ;;  %v334_v53 = vpop.f32.mrf.mxu1 }
  0xe9   :  { %v752_v54 = vpop.f32.mrf.mxu0 }
  0xea   :  { %v339_v55 = vsel %vm338_vm2, %v333_v52, 0.0  ;;  %v347_v56 = vmul.f32 %v333_v52, %v333_v52  ;;  %v335_v57 = vpop.f32.mrf.mxu1 }
  0xeb   :  { %v340_v58 = vrot.slane %v339_v55, 4 }
  0xec   :  { %v348_v59 = vsel %vm338_vm2, %v347_v56, 0.0  ;;  %v336_v60 = vpop.f32.mrf.mxu1 }
  0xed   :  { %v341_v61 = vadd.f32 %v340_v58, %v339_v55  ;;  %v349_v62 = vrot.slane %v348_v59, 4 }
  0xef   :  { %v342_v63 = vrot.slane %v341_v61, 2  ;;  %v350_v0 = vadd.f32 %v349_v62, %v348_v59  ;;  %v502_v59 = vld [vmem:[%s1133_s4 + $0x1] sm:$0x1]  ;;  %s896_s4 = smov [#allocation2]  }
  0xf0   :  { %v504_v62 = vld [vmem:[%s1134_s5 + $0x1] sm:$0x1] }
  0xf1   :  { %v343_v1 = vadd.f32 %v342_v63, %v341_v61  ;;  %v351_v2 = vrot.slane %v350_v0, 2 }
  0xf3   :  { %v344_v3 = vrot.slane %v343_v1, 1  ;;  %v352_v4 = vadd.f32 %v351_v2, %v350_v0 }
  0xf5   :  { %v345_v5 = vadd.f32 %v344_v3, %v343_v1  ;;  %v353_v6 = vrot.slane %v352_v4, 1 }
  0xf7   :  { %v346_v7 = vmul.f32 0.5, %v345_v5  ;;  %v354_v8 = vadd.f32 %v353_v6, %v352_v4 }
  0xf9   :  { %v355_v9 = vmul.f32 0.5, %v354_v8  ;;  %v356_v10 = vmul.f32 %v346_v7, %v346_v7 }
  0xfb   :  { %v357_v11 = vsub.f32 %v355_v9, %v356_v10 }
  0xfd   :  { %v358_v12 = vadd.f32 1e-05, %v357_v11 }
  0xff   :  { %858 = vrsqrt.f32 %v358_v12 }
 0x10c   :  { %v859_v15 = vpop.eup %858 }
 0x10d   :  { %v361_v16 = vmul.f32 %v859_v15, %v360_v13 }
 0x10f   :  { %v363_v18 = vmul.f32 %v361_v16, %v346_v7  ;;  %v368_v19 = vrot.slane %v361_v16, %v1065_v14 }
 0x111   :  { %v364_v20 = vsub.f32 %v362_v17, %v363_v18  ;;  %v369_v22 = vmul.f32 %v368_v19, %v333_v52 }
 0x113   :  { %v373_v23 = vrot.slane %v364_v20, %v1065_v14 }
 0x115   :  { %v374_v24 = vadd.f32 %v373_v23, %v369_v22 }
 0x117   :  { %v375_v25 = vmax.f32 %v374_v24, 0.0 }
 0x119   :  { %v376_v26 = vpack.c.bf16 %v375_v25, %v375_v25 }
 0x11b   :  { %789 = vmatmul.mubr.bf16.vlgmr.msra.gmra.mxu0 %v376_v26 }
 0x1db   :  { %v475_v35 = vpop.f32.mrf.mxu0 }
 0x1dc   :  { %v481_v36 = vsel %vm338_vm2, %v475_v35, 0.0  ;;  %v489_v37 = vmul.f32 %v475_v35, %v475_v35 }
 0x1dd   :  { %v482_v38 = vrot.slane %v481_v36, 4  ;;  %v790_v40 = vpop.f32.mrf.mxu0 }
 0x1de   :  { %v490_v41 = vsel %vm338_vm2, %v489_v37, 0.0  ;;  %v660_v40 = vand.u32 127, %v88_v21 }
 0x1df   :  { %v483_v42 = vadd.f32 %v482_v38, %v481_v36  ;;  %v491_v43 = vrot.slane %v490_v41, 4  ;;  %v478_v44 = vpop.f32.mrf.mxu0  ;;  %v646_v36 = vld [vmem:[%s1134_s5 + $0x2] sm:$0x1]  ;;  %s681_s5 = sshll.u32 %s896_s4, 4  ;;  %s682_s5 = int_to_ptr.vmem [resolvable:$true] %s681_s5 }
 0x1e0   :  { %vm661_vm3 = vcmp.lt.s32.totalorder %v660_v40, 10  ;;  %s870_s2 = scalar_lea.vmem %s682_s5, 32  ;;  %p875_p1 = scmp.lt.s32.totalorder %s682_s5, %s682_s5 }
 0x1e1   :  { %v484_v45 = vrot.slane %v483_v42, 2  ;;  %v492_v46 = vadd.f32 %v491_v43, %v490_v41  ;;  %v791_v47 = vpop.f32.mrf.mxu0  ;;  %p871_p0 = scmp.ne.s32.totalorder %s682_s5, %s870_s2  ;;  %p876_p2 = scmp.lt.s32.totalorder %s870_s2, %s870_s2 }
 0x1e3   :  { %v485_v48 = vadd.f32 %v484_v45, %v483_v42  ;;  %v493_v49 = vrot.slane %v492_v46, 2  ;;  %p877_p3 = por %p876_p2, %p875_p1 }
 0x1e5   :  { %v486_v50 = vrot.slane %v485_v48, 1  ;;  %v494_v51 = vadd.f32 %v493_v49, %v492_v46  ;;  %p878_p4 = pnand %p877_p3, %p871_p0 }
 0x1e7   :  { %v487_v39 = vadd.f32 %v486_v50, %v485_v48  ;;  %v495_v52 = vrot.slane %v494_v51, 1 }
 0x1e9   :  { %v488_v53 = vmul.f32 0.5, %v487_v39  ;;  %v496_v54 = vadd.f32 %v495_v52, %v494_v51 }
 0x1eb   :  { %v497_v55 = vmul.f32 0.5, %v496_v54  ;;  %v498_v56 = vmul.f32 %v488_v53, %v488_v53 }
 0x1ed   :  { %v499_v57 = vsub.f32 %v497_v55, %v498_v56 }
 0x1ef   :  { %v500_v58 = vadd.f32 1e-05, %v499_v57 }
 0x1f1   :  { %860 = vrsqrt.f32 %v500_v58 }
 0x1fe   :  { %v861_v60 = vpop.eup %860 }
 0x1ff   :  { %v503_v61 = vmul.f32 %v861_v60, %v502_v59 }
 0x201   :  { %v505_v63 = vmul.f32 %v503_v61, %v488_v53  ;;  %v510_v0 = vrot.slane %v503_v61, %v1065_v14 }
 0x203   :  { %v506_v1 = vsub.f32 %v504_v62, %v505_v63  ;;  %v511_v2 = vmul.f32 %v510_v0, %v475_v35 }
 0x205   :  { %v515_v3 = vrot.slane %v506_v1, %v1065_v14 }
 0x207   :  { %v516_v4 = vadd.f32 %v515_v3, %v511_v2 }
 0x209   :  { %862 = vtanh.f32 %v516_v4 }
 0x216   :  { %v863_v5 = vpop.eup %862 }
 0x217   :  { %v518_v6 = vpack.c.bf16 %v863_v5, %v863_v5 }
 0x219   :  { %809 = vmatmul.mubr.bf16.vlgmr.msra.gmra.mxu1 %v518_v6 }
 0x2d9   :  { %v617_v7 = vpop.f32.mrf.mxu1 }
 0x2da   :  { %v623_v8 = vsel %vm338_vm2, %v617_v7, 0.0  ;;  %v631_v9 = vmul.f32 %v617_v7, %v617_v7 }
 0x2db   :  { %v624_v10 = vrot.slane %v623_v8, 4  ;;  %v810_v11 = vpop.f32.mrf.mxu1 }
 0x2dc   :  { %v632_v12 = vsel %vm338_vm2, %v631_v9, 0.0 }
 0x2dd   :  { %v625_v13 = vadd.f32 %v624_v10, %v623_v8  ;;  %v633_v15 = vrot.slane %v632_v12, 4  ;;  %v620_v16 = vpop.f32.mrf.mxu1 }
 0x2df   :  { %v626_v17 = vrot.slane %v625_v13, 2  ;;  %v634_v18 = vadd.f32 %v633_v15, %v632_v12  ;;  %v811_v19 = vpop.f32.mrf.mxu1 }
 0x2e1   :  { %v627_v20 = vadd.f32 %v626_v17, %v625_v13  ;;  %v635_v22 = vrot.slane %v634_v18, 2 }
 0x2e3   :  { %v628_v23 = vrot.slane %v627_v20, 1  ;;  %v636_v24 = vadd.f32 %v635_v22, %v634_v18 }
 0x2e5   :  { %v629_v25 = vadd.f32 %v628_v23, %v627_v20  ;;  %v637_v26 = vrot.slane %v636_v24, 1 }
 0x2e7   :  { %v630_v27 = vmul.f32 0.5, %v629_v25  ;;  %v638_v28 = vadd.f32 %v637_v26, %v636_v24 }
 0x2e9   :  { %v639_v29 = vmul.f32 0.5, %v638_v28  ;;  %v640_v30 = vmul.f32 %v630_v27, %v630_v27 }
 0x2eb   :  { %v641_v31 = vsub.f32 %v639_v29, %v640_v30 }
 0x2ed   :  { %v642_v32 = vadd.f32 1e-05, %v641_v31 }
 0x2ef   :  { %864 = vrsqrt.f32 %v642_v32 }
 0x2fc   :  { %v865_v34 = vpop.eup %864 }
 0x2fd   :  { %v645_v35 = vmul.f32 %v865_v34, %v644_v33 }
 0x2ff   :  { %v652_v37 = vrot.slane %v645_v35, %v1065_v14  ;;  %v647_v38 = vmul.f32 %v645_v35, %v630_v27 }
 0x301   :  { %v648_v41 = vsub.f32 %v646_v36, %v647_v38  ;;  %v653_v42 = vmul.f32 %v652_v37, %v617_v7 }
 0x303   :  { %v657_v43 = vrot.slane %v648_v41, %v1065_v14 }
 0x305   :  { %v658_v44 = vadd.f32 %v657_v43, %v653_v42 }
 0x307   :  { %v662_v45 = vsel %vm661_vm3, %v658_v44, -1e+30 }
 0x308   :  { %v663_v46 = vsel %vm338_vm2, %v662_v45, -inf }
 0x309   :  { %664 = vmax.xlane.f32.xlu0 %v663_v46 }
 0x392   :  { %v665_v47 = vpop.xlane.xlu0 %664 }
 0x393   :  { %v666_v48 = vsub.f32 %v662_v45, %v665_v47 }
 0x395   :  { %v667_v49 = vmul.f32 1.442695, %v666_v48 }
 0x397   :  { %866 = vpow2.f32 %v667_v49 }
 0x3a4   :  { %v867_v50 = vpop.eup %866 }
 0x3a5   :  { %v669_v51 = vsel %vm338_vm2, %v867_v50, 0.0 }
 0x3a6   :  { %670 = vadd.xlane.f32.xlu0 %v669_v51 }
 0x42f   :  { %v671_v39 = vpop.xlane.xlu0 %670 }
 0x430   :  { %868 = vrcp.f32 %v671_v39 }
 0x43d   :  { %v869_v21 = vpop.eup %868 }
 0x43e   :  { %v673_v14 = vmul.f32 %v869_v21, %v867_v50 }
 0x440   :  { %674 = vst [vmem:[#allocation2] sm:$0x3] %v673_v14 }
 0x441   :  { %881 = shalt.err (!%p878_p4)
}
 0x442   :  { %684 = dma.vmem_to_hbm [thread:$0]  %s682_s5, 32, %s1135_s6, [#allocation3]  }
 0x443   :  { %890 = dma.done.wait [#allocation3], 32  }
 0x444   :  { %891 = vsyncadd [#allocation3], 4294967264 }
 0x445   :  { %688 = vsyncpa [#allocation3], 1 }

</bundles_post_ra>
